<compile_context>
chip_gen: v7x
topology: tpu7x:2x2x1
jax: 0.10.0
libtpu: 0.0.40
codegen_flags: <defaults>
</compile_context>

<pallas_src>
import numpy as np
import jax
import jax.numpy as jnp
from jax import lax
from jax.experimental import pallas as pl
from jax.experimental.pallas import tpu as pltpu

NEG_SLOPE = 0.01      # F.leaky_relu default
BN_EPS = 1e-5         # nn.BatchNorm2d default

# Fixed geometry implied by the module (16x16x3 input).
H = W = 16
C_IN = 3
K1, K2 = 5, 5
OH1 = H - K1 + 1                      # 12
SZ = (H - K1 + 1 - K2) // 2 + 1       # 4
C_OUT = 64
CPAD = 128                            # lane-dense channel padding
K1RAW = K1 * K1 * C_IN                # 75
KPAD1 = 128                           # conv1 contraction padding
KK = K2 * K2                          # 25


# ---------------------------------------------------------------------------
# Fused Pallas kernel (whole forward, everything VMEM-resident)
# ---------------------------------------------------------------------------
def _make_fused_kernel(n_batch):
    p1_rows = OH1 * OH1      # 144 conv1 output pixels per sample
    p2_rows = SZ * SZ        # 16 conv2 output pixels per sample

    def kernel(p1_ref, g_ref, w1_ref, bn1_ref, w2_ref, bn2_ref,
               wfc_ref, nsel_ref, bfc_ref, o_ref):
        # ---- conv1 (+bias) -> leaky_relu -> BN1 (batch stats, folded FMA) ----
        z1 = jnp.dot(p1_ref[...], w1_ref[...],
                     preferred_element_type=jnp.float32) + bn1_ref[0:1, :]
        l1 = jnp.where(z1 >= 0.0, z1, NEG_SLOPE * z1)
        mu1 = jnp.mean(l1, axis=0, keepdims=True)
        var1 = jnp.mean(l1 * l1, axis=0, keepdims=True) - mu1 * mu1
        s1 = bn1_ref[1:2, :] * lax.rsqrt(var1 + BN_EPS)
        t1 = bn1_ref[2:3, :] - mu1 * s1
        h1 = (l1 * s1 + t1).astype(jnp.bfloat16)           # (N*144, 128) bf16

        # ---- conv2: in-kernel im2col via 0/1 selection matmul (MXU gather) ----
        g = g_ref[...]                                      # (400, 144) bf16
        w2 = w2_ref[...]                                    # (3200, 128) bf16
        z2_blocks = []
        for n in range(n_batch):
            h1n = h1[n * p1_rows:(n + 1) * p1_rows, :]      # (144, 128)
            # Exact row gather: each G row has exactly one 1.0 -> f32 acc exact.
            sel = jnp.dot(g, h1n, preferred_element_type=jnp.float32)  # (400,128)
            selb = sel.astype(jnp.bfloat16)                 # exact (bf16 values)
            p2n = jnp.concatenate(
                [selb[kk * p2_rows:(kk + 1) * p2_rows, :] for kk in range(KK)],
                axis=1)                                     # (16, 3200) lane-dense
            z2_blocks.append(
                jnp.dot(p2n, w2, preferred_element_type=jnp.float32))  # (16,128)
        z2 = jnp.concatenate(z2_blocks, axis=0) + bn2_ref[0:1, :]      # (N*16,128)

        # ---- leaky_relu -> BN2 (batch stats, folded FMA) ----
        l2 = jnp.where(z2 >= 0.0, z2, NEG_SLOPE * z2)
        mu2 = jnp.mean(l2, axis=0, keepdims=True)
        var2 = jnp.mean(l2 * l2, axis=0, keepdims=True) - mu2 * mu2
        s2 = bn2_ref[1:2, :] * lax.rsqrt(var2 + BN_EPS)
        t2 = bn2_ref[2:3, :] - mu2 * s2
        h2 = l2 * s2 + t2                                   # (N*16, 128) f32

        # ---- fc1 + sigmoid (wfc pre-permuted to NHWC row order) ----
        prod = h2 * wfc_ref[...]                            # (N*16, 128)
        acc = jnp.dot(nsel_ref[...], prod,
                      preferred_element_type=jnp.float32)   # (N, 128) per-sample sums
        z = jnp.sum(acc, axis=1, keepdims=True) + bfc_ref[...]   # (N, 1)
        o_ref[...] = 1.0 / (1.0 + jnp.exp(-z))

    return kernel


# ---------------------------------------------------------------------------
# One-time parameter preparation (all weight reshapes hoisted out of forward)
# ---------------------------------------------------------------------------
def _pad_lane(v):
    return jnp.pad(v.astype(jnp.float32), (0, CPAD - v.shape[0]))


def prepare_params(params, n_batch):
    # conv1: (O,I,Kh,Kw) -> rows (ky,kx,cin) x cols cout, zero-padded to 128x128.
    w1 = jnp.transpose(params["w1"], (2, 3, 1, 0)).reshape(K1RAW, C_OUT)
    w1p = jnp.pad(w1, ((0, KPAD1 - K1RAW), (0, CPAD - C_OUT))).astype(jnp.bfloat16)

    # conv2: (O,I,Kh,Kw) -> (ky,kx,ci,co), pad ci/co to 128, stack to (25*128,128).
    w2 = jnp.transpose(params["w2"], (2, 3, 1, 0))                   # (5,5,64,64)
    w2p = jnp.pad(w2, ((0, 0), (0, 0), (0, CPAD - C_OUT), (0, CPAD - C_OUT)))
    w2stack = w2p.reshape(KK * CPAD, CPAD).astype(jnp.bfloat16)

    bn1p = jnp.stack([_pad_lane(params["b1"]), _pad_lane(params["g1"]),
                      _pad_lane(params["bt1"])])                     # (3,128) f32
    bn2p = jnp.stack([_pad_lane(params["b2"]), _pad_lane(params["g2"]),
                      _pad_lane(params["bt2"])])                     # (3,128) f32

    # fc1 weights permuted to the kernel's (spatial, channel) order; PyTorch
    # flatten index is co*16 + (oy*4+ox).
    wfc_sp = jnp.pad(params["wfc"].reshape(C_OUT, SZ * SZ).T,
                     ((0, 0), (0, CPAD - C_OUT))).astype(jnp.float32)  # (16,128)
    wfc_full = jnp.tile(wfc_sp, (n_batch, 1))                          # (N*16,128)

    # Static 0/1 selection matrix for conv2's im2col (per-sample, k=5, stride=2):
    # row (kk,oy,ox) selects h1 pixel (2*oy+ky, 2*ox+kx).
    g = np.zeros((KK * SZ * SZ, OH1 * OH1), np.float32)
    for ky in range(K2):
        for kx in range(K2):
            kk = ky * K2 + kx
            for oy in range(SZ):
                for ox in range(SZ):
                    g[kk * SZ * SZ + oy * SZ + ox,
                      (2 * oy + ky) * OH1 + (2 * ox + kx)] = 1.0

    # Per-sample row selector for the fc reduction (sum 16 spatial rows / sample).
    nsel = np.zeros((n_batch, n_batch * SZ * SZ), np.float32)
    for n in range(n_batch):
        nsel[n, n * SZ * SZ:(n + 1) * SZ * SZ] = 1.0

    return dict(
        w1=w1p, w2=w2stack, bn1=bn1p, bn2=bn2p, wfc=wfc_full,
        g=jnp.asarray(g, jnp.bfloat16), nsel=jnp.asarray(nsel, jnp.float32),
        bfc=params["bfc"].reshape(1, 1).astype(jnp.float32))


# ---------------------------------------------------------------------------
# Forward: (x + cond) -> conv1 im2col -> single fused pallas_call
# ---------------------------------------------------------------------------
def disc_uno_forward(prep, x_nchw, cond_nchw):
    n = x_nchw.shape[0]
    xc = jnp.transpose(x_nchw + cond_nchw, (0, 2, 3, 1))     # NHWC, add done once

    # conv1 im2col (pure static slicing), columns ordered (ky,kx,cin), K padded.
    cols = [xc[:, ky:ky + OH1, kx:kx + OH1, :]
            for ky in range(K1) for kx in range(K1)]
    p1 = jnp.stack(cols, axis=3).reshape(n * OH1 * OH1, K1RAW)
    p1 = jnp.pad(p1, ((0, 0), (0, KPAD1 - K1RAW))).astype(jnp.bfloat16)

    args = (p1, prep["g"], prep["w1"], prep["bn1"], prep["w2"], prep["bn2"],
            prep["wfc"], prep["nsel"], prep["bfc"])

    flops = (2 * n * OH1 * OH1 * KPAD1 * CPAD                # conv1
             + n * 2 * (KK * SZ * SZ) * (OH1 * OH1) * CPAD   # selection matmuls
             + n * 2 * (SZ * SZ) * (KK * CPAD) * CPAD        # conv2
             + 4 * n * SZ * SZ * CPAD)                       # fc-ish
    bytes_accessed = sum(int(np.prod(a.shape)) * a.dtype.itemsize for a in args) + n * 4
    cost = pl.CostEstimate(flops=flops, transcendentals=2 * CPAD + n,
                           bytes_accessed=bytes_accessed)

    return pl.pallas_call(
        _make_fused_kernel(n),
        out_shape=jax.ShapeDtypeStruct((n, 1), jnp.float32),
        grid=(1,),
        in_specs=[pl.BlockSpec(a.shape, lambda i, _nd=len(a.shape): (0,) * _nd)
                  for a in args],
        out_specs=pl.BlockSpec((n, 1), lambda i: (0, 0)),
        compiler_params=pltpu.CompilerParams(dimension_semantics=("arbitrary",)),
        cost_estimate=cost,
    )(*args)


# ---------------------------------------------------------------------------
# Pure-JAX reference (mirrors the PyTorch forward exactly, f32)
# ---------------------------------------------------------------------------
def disc_uno_reference(params, x, cond):
    def leaky(v):
        return jnp.where(v >= 0, v, NEG_SLOPE * v)

    def bn(v, g, b):
        m = v.mean(axis=(0, 2, 3), keepdims=True)
        var = ((v - m) ** 2).mean(axis=(0, 2, 3), keepdims=True)
        return (v - m) / jnp.sqrt(var + BN_EPS) * g[None, :, None, None] \
            + b[None, :, None, None]

    dn = ("NCHW", "OIHW", "NCHW")
    xc = x + cond
    z1 = lax.conv_general_dilated(xc, params["w1"], (1, 1), "VALID",
                                  dimension_numbers=dn) \
        + params["b1"][None, :, None, None]
    h1 = bn(leaky(z1), params["g1"], params["bt1"])
    z2 = lax.conv_general_dilated(h1, params["w2"], (2, 2), "VALID",
                                  dimension_numbers=dn) \
        + params["b2"][None, :, None, None]
    h2 = bn(leaky(z2), params["g2"], params["bt2"])
    flat = h2.reshape(x.shape[0], -1)
    return jax.nn.sigmoid(flat @ params["wfc"].T + params["bfc"][None, :])


if __name__ == "__main__":
    key = jax.random.PRNGKey(0)
    ks = jax.random.split(key, 12)
    params = {
        "w1": 0.05 * jax.random.normal(ks[0], (64, 3, 5, 5), jnp.float32),
        "b1": 0.05 * jax.random.normal(ks[1], (64,), jnp.float32),
        "g1": 1.0 + 0.1 * jax.random.normal(ks[2], (64,), jnp.float32),
        "bt1": 0.05 * jax.random.normal(ks[3], (64,), jnp.float32),
        "w2": 0.02 * jax.random.normal(ks[4], (64, 64, 5, 5), jnp.float32),
        "b2": 0.05 * jax.random.normal(ks[5], (64,), jnp.float32),
        "g2": 1.0 + 0.1 * jax.random.normal(ks[6], (64,), jnp.float32),
        "bt2": 0.05 * jax.random.normal(ks[7], (64,), jnp.float32),
        "wfc": 0.02 * jax.random.normal(ks[8], (1, 64 * SZ * SZ), jnp.float32),
        "bfc": 0.05 * jax.random.normal(ks[9], (1,), jnp.float32),
    }
    x = jax.random.normal(ks[10], (2, 3, 16, 16), jnp.float32)        # NCHW
    cond = jax.random.normal(ks[11], (2, 3, 16, 16), jnp.float32)     # NCHW

    prep = prepare_params(params, n_batch=x.shape[0])                 # hoisted
    forward = jax.jit(disc_uno_forward)

    y = jax.block_until_ready(forward(prep, x, cond))
    assert y.shape == (2, 1)
    assert bool(jnp.all(jnp.isfinite(y)))

    y_ref = jax.block_until_ready(disc_uno_reference(params, x, cond))
    np.testing.assert_allclose(np.asarray(y), np.asarray(y_ref), atol=5e-3, rtol=0)

    print("KERNEL_OK")
</pallas_src>

<mosaic_0001>
module attributes {stable_mosaic.version = 11 : i64} {
  func.func @kernel(%arg0: i32, %arg1: memref<288x128xbf16, #tpu.memory_space<vmem>>, %arg2: memref<400x144xbf16, #tpu.memory_space<vmem>>, %arg3: memref<128x128xbf16, #tpu.memory_space<vmem>>, %arg4: memref<3x128xf32, #tpu.memory_space<vmem>>, %arg5: memref<3200x128xbf16, #tpu.memory_space<vmem>>, %arg6: memref<3x128xf32, #tpu.memory_space<vmem>>, %arg7: memref<32x128xf32, #tpu.memory_space<vmem>>, %arg8: memref<2x32xf32, #tpu.memory_space<vmem>>, %arg9: memref<1x1xf32, #tpu.memory_space<vmem>>, %arg10: memref<2x1xf32, #tpu.memory_space<vmem>>) attributes {dimension_semantics = [#tpu.dimension_semantics<arbitrary>], iteration_bounds = array<i64: 1>, scalar_prefetch = 0 : i64, scratch_operands = 0 : i64, tpu.core_type = #tpu.core_type<tc>, window_params = [{pipeline_mode = #tpu.pipeline_mode<synchronous>, transform_indices = @transform_0, window_bounds = array<i64: 288, 128>}, {pipeline_mode = #tpu.pipeline_mode<synchronous>, transform_indices = @transform_1, window_bounds = array<i64: 400, 144>}, {pipeline_mode = #tpu.pipeline_mode<synchronous>, transform_indices = @transform_2, window_bounds = array<i64: 128, 128>}, {pipeline_mode = #tpu.pipeline_mode<synchronous>, transform_indices = @transform_3, window_bounds = array<i64: 3, 128>}, {pipeline_mode = #tpu.pipeline_mode<synchronous>, transform_indices = @transform_4, window_bounds = array<i64: 3200, 128>}, {pipeline_mode = #tpu.pipeline_mode<synchronous>, transform_indices = @transform_5, window_bounds = array<i64: 3, 128>}, {pipeline_mode = #tpu.pipeline_mode<synchronous>, transform_indices = @transform_6, window_bounds = array<i64: 32, 128>}, {pipeline_mode = #tpu.pipeline_mode<synchronous>, transform_indices = @transform_7, window_bounds = array<i64: 2, 32>}, {pipeline_mode = #tpu.pipeline_mode<synchronous>, transform_indices = @transform_8, window_bounds = array<i64: 1, 1>}, {pipeline_mode = #tpu.pipeline_mode<synchronous>, transform_indices = @transform_9, window_bounds = array<i64: 2, 1>}]} {
    %c0 = arith.constant 0 : index
    %c0_0 = arith.constant 0 : index
    %0 = vector.load %arg1[%c0, %c0_0] : memref<288x128xbf16, #tpu.memory_space<vmem>>, vector<288x128xbf16>
    %c0_1 = arith.constant 0 : index
    %c0_2 = arith.constant 0 : index
    %1 = vector.load %arg3[%c0_1, %c0_2] : memref<128x128xbf16, #tpu.memory_space<vmem>>, vector<128x128xbf16>
    %cst = arith.constant dense<0.000000e+00> : vector<288x128xf32>
    %2 = tpu.matmul %0, %1, %cst {dimension_numbers = #tpu.dot_dimension_numbers<[1], [0], [0], [1], [0, 0, 1, 1], [], []>} : vector<288x128xbf16>, vector<128x128xbf16>, vector<288x128xf32> -> vector<288x128xf32>
    %c0_3 = arith.constant 0 : index
    %c0_4 = arith.constant 0 : index
    %3 = vector.load %arg4[%c0_3, %c0_4] : memref<3x128xf32, #tpu.memory_space<vmem>>, vector<1x128xf32>
    %4 = vector.broadcast %3 : vector<1x128xf32> to vector<288x128xf32>
    %5 = arith.addf %2, %4 : vector<288x128xf32>
    %cst_5 = arith.constant 0.000000e+00 : f32
    %6 = vector.broadcast %cst_5 : f32 to vector<288x128xf32>
    %7 = arith.cmpf oge, %5, %6 : vector<288x128xf32>
    %cst_6 = arith.constant 0.00999999977 : f32
    %8 = vector.broadcast %cst_6 : f32 to vector<288x128xf32>
    %9 = arith.mulf %8, %5 : vector<288x128xf32>
    %10 = arith.select %7, %5, %9 : vector<288x128xi1>, vector<288x128xf32>
    %cst_7 = arith.constant dense<0.000000e+00> : vector<128xf32>
    %11 = vector.multi_reduction <add>, %10, %cst_7 [0] : vector<288x128xf32> to vector<128xf32>
    %12 = vector.shape_cast %11 : vector<128xf32> to vector<1x128xf32>
    %cst_8 = arith.constant 2.880000e+02 : f32
    %13 = vector.broadcast %cst_8 : f32 to vector<1x128xf32>
    %14 = arith.divf %12, %13 : vector<1x128xf32>
    %15 = arith.mulf %10, %10 : vector<288x128xf32>
    %cst_9 = arith.constant dense<0.000000e+00> : vector<128xf32>
    %16 = vector.multi_reduction <add>, %15, %cst_9 [0] : vector<288x128xf32> to vector<128xf32>
    %17 = vector.shape_cast %16 : vector<128xf32> to vector<1x128xf32>
    %cst_10 = arith.constant 2.880000e+02 : f32
    %18 = vector.broadcast %cst_10 : f32 to vector<1x128xf32>
    %19 = arith.divf %17, %18 : vector<1x128xf32>
    %20 = arith.mulf %14, %14 : vector<1x128xf32>
    %21 = arith.subf %19, %20 : vector<1x128xf32>
    %c1 = arith.constant 1 : index
    %c0_11 = arith.constant 0 : index
    %22 = vector.load %arg4[%c1, %c0_11] : memref<3x128xf32, #tpu.memory_space<vmem>>, vector<1x128xf32>
    %cst_12 = arith.constant 9.99999974E-6 : f32
    %23 = vector.broadcast %cst_12 : f32 to vector<1x128xf32>
    %24 = arith.addf %21, %23 : vector<1x128xf32>
    %25 = math.rsqrt %24 : vector<1x128xf32>
    %26 = arith.mulf %22, %25 : vector<1x128xf32>
    %c2 = arith.constant 2 : index
    %c0_13 = arith.constant 0 : index
    %27 = vector.load %arg4[%c2, %c0_13] : memref<3x128xf32, #tpu.memory_space<vmem>>, vector<1x128xf32>
    %28 = arith.mulf %14, %26 : vector<1x128xf32>
    %29 = arith.subf %27, %28 : vector<1x128xf32>
    %30 = vector.broadcast %26 : vector<1x128xf32> to vector<288x128xf32>
    %31 = arith.mulf %10, %30 : vector<288x128xf32>
    %32 = vector.broadcast %29 : vector<1x128xf32> to vector<288x128xf32>
    %33 = arith.addf %31, %32 : vector<288x128xf32>
    %34 = arith.truncf %33 : vector<288x128xf32> to vector<288x128xbf16>
    %c0_14 = arith.constant 0 : index
    %c0_15 = arith.constant 0 : index
    %35 = vector.load %arg2[%c0_14, %c0_15] : memref<400x144xbf16, #tpu.memory_space<vmem>>, vector<400x144xbf16>
    %c0_16 = arith.constant 0 : index
    %c0_17 = arith.constant 0 : index
    %36 = vector.load %arg5[%c0_16, %c0_17] : memref<3200x128xbf16, #tpu.memory_space<vmem>>, vector<3200x128xbf16>
    %37 = vector.extract_strided_slice %34 {offsets = [0, 0], sizes = [144, 128], strides = [1, 1]} : vector<288x128xbf16> to vector<144x128xbf16>
    %cst_18 = arith.constant dense<0.000000e+00> : vector<400x128xf32>
    %38 = tpu.matmul %35, %37, %cst_18 {dimension_numbers = #tpu.dot_dimension_numbers<[1], [0], [0], [1], [0, 0, 1, 1], [], []>} : vector<400x144xbf16>, vector<144x128xbf16>, vector<400x128xf32> -> vector<400x128xf32>
    %39 = arith.truncf %38 : vector<400x128xf32> to vector<400x128xbf16>
    %40 = vector.extract_strided_slice %39 {offsets = [0, 0], sizes = [16, 128], strides = [1, 1]} : vector<400x128xbf16> to vector<16x128xbf16>
    %41 = vector.extract_strided_slice %39 {offsets = [16, 0], sizes = [16, 128], strides = [1, 1]} : vector<400x128xbf16> to vector<16x128xbf16>
    %42 = vector.extract_strided_slice %39 {offsets = [32, 0], sizes = [16, 128], strides = [1, 1]} : vector<400x128xbf16> to vector<16x128xbf16>
    %43 = vector.extract_strided_slice %39 {offsets = [48, 0], sizes = [16, 128], strides = [1, 1]} : vector<400x128xbf16> to vector<16x128xbf16>
    %44 = vector.extract_strided_slice %39 {offsets = [64, 0], sizes = [16, 128], strides = [1, 1]} : vector<400x128xbf16> to vector<16x128xbf16>
    %45 = vector.extract_strided_slice %39 {offsets = [80, 0], sizes = [16, 128], strides = [1, 1]} : vector<400x128xbf16> to vector<16x128xbf16>
    %46 = vector.extract_strided_slice %39 {offsets = [96, 0], sizes = [16, 128], strides = [1, 1]} : vector<400x128xbf16> to vector<16x128xbf16>
    %47 = vector.extract_strided_slice %39 {offsets = [112, 0], sizes = [16, 128], strides = [1, 1]} : vector<400x128xbf16> to vector<16x128xbf16>
    %48 = vector.extract_strided_slice %39 {offsets = [128, 0], sizes = [16, 128], strides = [1, 1]} : vector<400x128xbf16> to vector<16x128xbf16>
    %49 = vector.extract_strided_slice %39 {offsets = [144, 0], sizes = [16, 128], strides = [1, 1]} : vector<400x128xbf16> to vector<16x128xbf16>
    %50 = vector.extract_strided_slice %39 {offsets = [160, 0], sizes = [16, 128], strides = [1, 1]} : vector<400x128xbf16> to vector<16x128xbf16>
    %51 = vector.extract_strided_slice %39 {offsets = [176, 0], sizes = [16, 128], strides = [1, 1]} : vector<400x128xbf16> to vector<16x128xbf16>
    %52 = vector.extract_strided_slice %39 {offsets = [192, 0], sizes = [16, 128], strides = [1, 1]} : vector<400x128xbf16> to vector<16x128xbf16>
    %53 = vector.extract_strided_slice %39 {offsets = [208, 0], sizes = [16, 128], strides = [1, 1]} : vector<400x128xbf16> to vector<16x128xbf16>
    %54 = vector.extract_strided_slice %39 {offsets = [224, 0], sizes = [16, 128], strides = [1, 1]} : vector<400x128xbf16> to vector<16x128xbf16>
    %55 = vector.extract_strided_slice %39 {offsets = [240, 0], sizes = [16, 128], strides = [1, 1]} : vector<400x128xbf16> to vector<16x128xbf16>
    %56 = vector.extract_strided_slice %39 {offsets = [256, 0], sizes = [16, 128], strides = [1, 1]} : vector<400x128xbf16> to vector<16x128xbf16>
    %57 = vector.extract_strided_slice %39 {offsets = [272, 0], sizes = [16, 128], strides = [1, 1]} : vector<400x128xbf16> to vector<16x128xbf16>
    %58 = vector.extract_strided_slice %39 {offsets = [288, 0], sizes = [16, 128], strides = [1, 1]} : vector<400x128xbf16> to vector<16x128xbf16>
    %59 = vector.extract_strided_slice %39 {offsets = [304, 0], sizes = [16, 128], strides = [1, 1]} : vector<400x128xbf16> to vector<16x128xbf16>
    %60 = vector.extract_strided_slice %39 {offsets = [320, 0], sizes = [16, 128], strides = [1, 1]} : vector<400x128xbf16> to vector<16x128xbf16>
    %61 = vector.extract_strided_slice %39 {offsets = [336, 0], sizes = [16, 128], strides = [1, 1]} : vector<400x128xbf16> to vector<16x128xbf16>
    %62 = vector.extract_strided_slice %39 {offsets = [352, 0], sizes = [16, 128], strides = [1, 1]} : vector<400x128xbf16> to vector<16x128xbf16>
    %63 = vector.extract_strided_slice %39 {offsets = [368, 0], sizes = [16, 128], strides = [1, 1]} : vector<400x128xbf16> to vector<16x128xbf16>
    %64 = vector.extract_strided_slice %39 {offsets = [384, 0], sizes = [16, 128], strides = [1, 1]} : vector<400x128xbf16> to vector<16x128xbf16>
    %65 = tpu.concatenate %40, %41, %42, %43, %44, %45, %46, %47, %48, %49, %50, %51, %52, %53, %54, %55 in 1 : vector<16x128xbf16>, vector<16x128xbf16>, vector<16x128xbf16>, vector<16x128xbf16>, vector<16x128xbf16>, vector<16x128xbf16>, vector<16x128xbf16>, vector<16x128xbf16>, vector<16x128xbf16>, vector<16x128xbf16>, vector<16x128xbf16>, vector<16x128xbf16>, vector<16x128xbf16>, vector<16x128xbf16>, vector<16x128xbf16>, vector<16x128xbf16> -> vector<16x2048xbf16>
    %66 = tpu.concatenate %56, %57, %58, %59, %60, %61, %62, %63, %64 in 1 : vector<16x128xbf16>, vector<16x128xbf16>, vector<16x128xbf16>, vector<16x128xbf16>, vector<16x128xbf16>, vector<16x128xbf16>, vector<16x128xbf16>, vector<16x128xbf16>, vector<16x128xbf16> -> vector<16x1152xbf16>
    %67 = tpu.concatenate %65, %66 in 1 : vector<16x2048xbf16>, vector<16x1152xbf16> -> vector<16x3200xbf16>
    %cst_19 = arith.constant dense<0.000000e+00> : vector<16x128xf32>
    %68 = tpu.matmul %67, %36, %cst_19 {dimension_numbers = #tpu.dot_dimension_numbers<[1], [0], [0], [1], [0, 0, 1, 1], [], []>} : vector<16x3200xbf16>, vector<3200x128xbf16>, vector<16x128xf32> -> vector<16x128xf32>
    %69 = vector.extract_strided_slice %34 {offsets = [144, 0], sizes = [144, 128], strides = [1, 1]} : vector<288x128xbf16> to vector<144x128xbf16>
    %cst_20 = arith.constant dense<0.000000e+00> : vector<400x128xf32>
    %70 = tpu.matmul %35, %69, %cst_20 {dimension_numbers = #tpu.dot_dimension_numbers<[1], [0], [0], [1], [0, 0, 1, 1], [], []>} : vector<400x144xbf16>, vector<144x128xbf16>, vector<400x128xf32> -> vector<400x128xf32>
    %71 = arith.truncf %70 : vector<400x128xf32> to vector<400x128xbf16>
    %72 = vector.extract_strided_slice %71 {offsets = [0, 0], sizes = [16, 128], strides = [1, 1]} : vector<400x128xbf16> to vector<16x128xbf16>
    %73 = vector.extract_strided_slice %71 {offsets = [16, 0], sizes = [16, 128], strides = [1, 1]} : vector<400x128xbf16> to vector<16x128xbf16>
    %74 = vector.extract_strided_slice %71 {offsets = [32, 0], sizes = [16, 128], strides = [1, 1]} : vector<400x128xbf16> to vector<16x128xbf16>
    %75 = vector.extract_strided_slice %71 {offsets = [48, 0], sizes = [16, 128], strides = [1, 1]} : vector<400x128xbf16> to vector<16x128xbf16>
    %76 = vector.extract_strided_slice %71 {offsets = [64, 0], sizes = [16, 128], strides = [1, 1]} : vector<400x128xbf16> to vector<16x128xbf16>
    %77 = vector.extract_strided_slice %71 {offsets = [80, 0], sizes = [16, 128], strides = [1, 1]} : vector<400x128xbf16> to vector<16x128xbf16>
    %78 = vector.extract_strided_slice %71 {offsets = [96, 0], sizes = [16, 128], strides = [1, 1]} : vector<400x128xbf16> to vector<16x128xbf16>
    %79 = vector.extract_strided_slice %71 {offsets = [112, 0], sizes = [16, 128], strides = [1, 1]} : vector<400x128xbf16> to vector<16x128xbf16>
    %80 = vector.extract_strided_slice %71 {offsets = [128, 0], sizes = [16, 128], strides = [1, 1]} : vector<400x128xbf16> to vector<16x128xbf16>
    %81 = vector.extract_strided_slice %71 {offsets = [144, 0], sizes = [16, 128], strides = [1, 1]} : vector<400x128xbf16> to vector<16x128xbf16>
    %82 = vector.extract_strided_slice %71 {offsets = [160, 0], sizes = [16, 128], strides = [1, 1]} : vector<400x128xbf16> to vector<16x128xbf16>
    %83 = vector.extract_strided_slice %71 {offsets = [176, 0], sizes = [16, 128], strides = [1, 1]} : vector<400x128xbf16> to vector<16x128xbf16>
    %84 = vector.extract_strided_slice %71 {offsets = [192, 0], sizes = [16, 128], strides = [1, 1]} : vector<400x128xbf16> to vector<16x128xbf16>
    %85 = vector.extract_strided_slice %71 {offsets = [208, 0], sizes = [16, 128], strides = [1, 1]} : vector<400x128xbf16> to vector<16x128xbf16>
    %86 = vector.extract_strided_slice %71 {offsets = [224, 0], sizes = [16, 128], strides = [1, 1]} : vector<400x128xbf16> to vector<16x128xbf16>
    %87 = vector.extract_strided_slice %71 {offsets = [240, 0], sizes = [16, 128], strides = [1, 1]} : vector<400x128xbf16> to vector<16x128xbf16>
    %88 = vector.extract_strided_slice %71 {offsets = [256, 0], sizes = [16, 128], strides = [1, 1]} : vector<400x128xbf16> to vector<16x128xbf16>
    %89 = vector.extract_strided_slice %71 {offsets = [272, 0], sizes = [16, 128], strides = [1, 1]} : vector<400x128xbf16> to vector<16x128xbf16>
    %90 = vector.extract_strided_slice %71 {offsets = [288, 0], sizes = [16, 128], strides = [1, 1]} : vector<400x128xbf16> to vector<16x128xbf16>
    %91 = vector.extract_strided_slice %71 {offsets = [304, 0], sizes = [16, 128], strides = [1, 1]} : vector<400x128xbf16> to vector<16x128xbf16>
    %92 = vector.extract_strided_slice %71 {offsets = [320, 0], sizes = [16, 128], strides = [1, 1]} : vector<400x128xbf16> to vector<16x128xbf16>
    %93 = vector.extract_strided_slice %71 {offsets = [336, 0], sizes = [16, 128], strides = [1, 1]} : vector<400x128xbf16> to vector<16x128xbf16>
    %94 = vector.extract_strided_slice %71 {offsets = [352, 0], sizes = [16, 128], strides = [1, 1]} : vector<400x128xbf16> to vector<16x128xbf16>
    %95 = vector.extract_strided_slice %71 {offsets = [368, 0], sizes = [16, 128], strides = [1, 1]} : vector<400x128xbf16> to vector<16x128xbf16>
    %96 = vector.extract_strided_slice %71 {offsets = [384, 0], sizes = [16, 128], strides = [1, 1]} : vector<400x128xbf16> to vector<16x128xbf16>
    %97 = tpu.concatenate %72, %73, %74, %75, %76, %77, %78, %79, %80, %81, %82, %83, %84, %85, %86, %87 in 1 : vector<16x128xbf16>, vector<16x128xbf16>, vector<16x128xbf16>, vector<16x128xbf16>, vector<16x128xbf16>, vector<16x128xbf16>, vector<16x128xbf16>, vector<16x128xbf16>, vector<16x128xbf16>, vector<16x128xbf16>, vector<16x128xbf16>, vector<16x128xbf16>, vector<16x128xbf16>, vector<16x128xbf16>, vector<16x128xbf16>, vector<16x128xbf16> -> vector<16x2048xbf16>
    %98 = tpu.concatenate %88, %89, %90, %91, %92, %93, %94, %95, %96 in 1 : vector<16x128xbf16>, vector<16x128xbf16>, vector<16x128xbf16>, vector<16x128xbf16>, vector<16x128xbf16>, vector<16x128xbf16>, vector<16x128xbf16>, vector<16x128xbf16>, vector<16x128xbf16> -> vector<16x1152xbf16>
    %99 = tpu.concatenate %97, %98 in 1 : vector<16x2048xbf16>, vector<16x1152xbf16> -> vector<16x3200xbf16>
    %cst_21 = arith.constant dense<0.000000e+00> : vector<16x128xf32>
    %100 = tpu.matmul %99, %36, %cst_21 {dimension_numbers = #tpu.dot_dimension_numbers<[1], [0], [0], [1], [0, 0, 1, 1], [], []>} : vector<16x3200xbf16>, vector<3200x128xbf16>, vector<16x128xf32> -> vector<16x128xf32>
    %101 = tpu.concatenate %68, %100 in 0 : vector<16x128xf32>, vector<16x128xf32> -> vector<32x128xf32>
    %c0_22 = arith.constant 0 : index
    %c0_23 = arith.constant 0 : index
    %102 = vector.load %arg6[%c0_22, %c0_23] : memref<3x128xf32, #tpu.memory_space<vmem>>, vector<1x128xf32>
    %103 = vector.broadcast %102 : vector<1x128xf32> to vector<32x128xf32>
    %104 = arith.addf %101, %103 : vector<32x128xf32>
    %cst_24 = arith.constant 0.000000e+00 : f32
    %105 = vector.broadcast %cst_24 : f32 to vector<32x128xf32>
    %106 = arith.cmpf oge, %104, %105 : vector<32x128xf32>
    %cst_25 = arith.constant 0.00999999977 : f32
    %107 = vector.broadcast %cst_25 : f32 to vector<32x128xf32>
    %108 = arith.mulf %107, %104 : vector<32x128xf32>
    %109 = arith.select %106, %104, %108 : vector<32x128xi1>, vector<32x128xf32>
    %cst_26 = arith.constant dense<0.000000e+00> : vector<128xf32>
    %110 = vector.multi_reduction <add>, %109, %cst_26 [0] : vector<32x128xf32> to vector<128xf32>
    %111 = vector.shape_cast %110 : vector<128xf32> to vector<1x128xf32>
    %cst_27 = arith.constant 3.200000e+01 : f32
    %112 = vector.broadcast %cst_27 : f32 to vector<1x128xf32>
    %113 = arith.divf %111, %112 : vector<1x128xf32>
    %114 = arith.mulf %109, %109 : vector<32x128xf32>
    %cst_28 = arith.constant dense<0.000000e+00> : vector<128xf32>
    %115 = vector.multi_reduction <add>, %114, %cst_28 [0] : vector<32x128xf32> to vector<128xf32>
    %116 = vector.shape_cast %115 : vector<128xf32> to vector<1x128xf32>
    %cst_29 = arith.constant 3.200000e+01 : f32
    %117 = vector.broadcast %cst_29 : f32 to vector<1x128xf32>
    %118 = arith.divf %116, %117 : vector<1x128xf32>
    %119 = arith.mulf %113, %113 : vector<1x128xf32>
    %120 = arith.subf %118, %119 : vector<1x128xf32>
    %c1_30 = arith.constant 1 : index
    %c0_31 = arith.constant 0 : index
    %121 = vector.load %arg6[%c1_30, %c0_31] : memref<3x128xf32, #tpu.memory_space<vmem>>, vector<1x128xf32>
    %cst_32 = arith.constant 9.99999974E-6 : f32
    %122 = vector.broadcast %cst_32 : f32 to vector<1x128xf32>
    %123 = arith.addf %120, %122 : vector<1x128xf32>
    %124 = math.rsqrt %123 : vector<1x128xf32>
    %125 = arith.mulf %121, %124 : vector<1x128xf32>
    %c2_33 = arith.constant 2 : index
    %c0_34 = arith.constant 0 : index
    %126 = vector.load %arg6[%c2_33, %c0_34] : memref<3x128xf32, #tpu.memory_space<vmem>>, vector<1x128xf32>
    %127 = arith.mulf %113, %125 : vector<1x128xf32>
    %128 = arith.subf %126, %127 : vector<1x128xf32>
    %129 = vector.broadcast %125 : vector<1x128xf32> to vector<32x128xf32>
    %130 = arith.mulf %109, %129 : vector<32x128xf32>
    %131 = vector.broadcast %128 : vector<1x128xf32> to vector<32x128xf32>
    %132 = arith.addf %130, %131 : vector<32x128xf32>
    %c0_35 = arith.constant 0 : index
    %c0_36 = arith.constant 0 : index
    %133 = vector.load %arg7[%c0_35, %c0_36] : memref<32x128xf32, #tpu.memory_space<vmem>>, vector<32x128xf32>
    %134 = arith.mulf %132, %133 : vector<32x128xf32>
    %c0_37 = arith.constant 0 : index
    %c0_38 = arith.constant 0 : index
    %135 = vector.load %arg8[%c0_37, %c0_38] : memref<2x32xf32, #tpu.memory_space<vmem>>, vector<2x32xf32>
    %cst_39 = arith.constant dense<0.000000e+00> : vector<2x128xf32>
    %136 = tpu.matmul %135, %134, %cst_39 {dimension_numbers = #tpu.dot_dimension_numbers<[1], [0], [0], [1], [0, 0, 1, 1], [], []>} : vector<2x32xf32>, vector<32x128xf32>, vector<2x128xf32> -> vector<2x128xf32>
    %cst_40 = arith.constant dense<0.000000e+00> : vector<2xf32>
    %137 = vector.multi_reduction <add>, %136, %cst_40 [1] : vector<2x128xf32> to vector<2xf32>
    %138 = vector.shape_cast %137 : vector<2xf32> to vector<2x1xf32>
    %c0_41 = arith.constant 0 : index
    %c0_42 = arith.constant 0 : index
    %139 = vector.load %arg9[%c0_41, %c0_42] : memref<1x1xf32, #tpu.memory_space<vmem>>, vector<1x1xf32>
    %140 = vector.broadcast %139 : vector<1x1xf32> to vector<2x1xf32>
    %141 = arith.addf %138, %140 : vector<2x1xf32>
    %cst_43 = arith.constant 0.000000e+00 : f32
    %142 = vector.broadcast %cst_43 : f32 to vector<2x1xf32>
    %143 = arith.subf %142, %141 : vector<2x1xf32>
    %144 = math.exp %143 : vector<2x1xf32>
    %cst_44 = arith.constant 1.000000e+00 : f32
    %145 = vector.broadcast %cst_44 : f32 to vector<2x1xf32>
    %146 = arith.addf %145, %144 : vector<2x1xf32>
    %cst_45 = arith.constant 1.000000e+00 : f32
    %147 = vector.broadcast %cst_45 : f32 to vector<2x1xf32>
    %148 = arith.divf %147, %146 : vector<2x1xf32>
    %c0_46 = arith.constant 0 : index
    %c0_47 = arith.constant 0 : index
    %149 = vector.load %arg10[%c0_46, %c0_47] : memref<2x1xf32, #tpu.memory_space<vmem>>, vector<2x1xf32>
    tpu.vector_store %arg10[%c0_46, %c0_47], %148 {strides = array<i32>} : memref<2x1xf32, #tpu.memory_space<vmem>>, vector<2x1xf32>,
    return
  }
  func.func @transform_0(%arg0: i32) -> (i32, i32) {
    %c0_i32 = arith.constant 0 : i32
    %c0_i32_0 = arith.constant 0 : i32
    %c0_i32_1 = arith.constant 0 : i32
    return %c0_i32, %c0_i32_0 : i32, i32
  }
  func.func @transform_1(%arg0: i32) -> (i32, i32) {
    %c0_i32 = arith.constant 0 : i32
    %c0_i32_0 = arith.constant 0 : i32
    %c0_i32_1 = arith.constant 0 : i32
    return %c0_i32, %c0_i32_0 : i32, i32
  }
  func.func @transform_2(%arg0: i32) -> (i32, i32) {
    %c0_i32 = arith.constant 0 : i32
    %c0_i32_0 = arith.constant 0 : i32
    %c0_i32_1 = arith.constant 0 : i32
    return %c0_i32, %c0_i32_0 : i32, i32
  }
  func.func @transform_3(%arg0: i32) -> (i32, i32) {
    %c0_i32 = arith.constant 0 : i32
    %c0_i32_0 = arith.constant 0 : i32
    %c0_i32_1 = arith.constant 0 : i32
    return %c0_i32, %c0_i32_0 : i32, i32
  }
  func.func @transform_4(%arg0: i32) -> (i32, i32) {
    %c0_i32 = arith.constant 0 : i32
    %c0_i32_0 = arith.constant 0 : i32
    %c0_i32_1 = arith.constant 0 : i32
    return %c0_i32, %c0_i32_0 : i32, i32
  }
  func.func @transform_5(%arg0: i32) -> (i32, i32) {
    %c0_i32 = arith.constant 0 : i32
    %c0_i32_0 = arith.constant 0 : i32
    %c0_i32_1 = arith.constant 0 : i32
    return %c0_i32, %c0_i32_0 : i32, i32
  }
  func.func @transform_6(%arg0: i32) -> (i32, i32) {
    %c0_i32 = arith.constant 0 : i32
    %c0_i32_0 = arith.constant 0 : i32
    %c0_i32_1 = arith.constant 0 : i32
    return %c0_i32, %c0_i32_0 : i32, i32
  }
  func.func @transform_7(%arg0: i32) -> (i32, i32) {
    %c0_i32 = arith.constant 0 : i32
    %c0_i32_0 = arith.constant 0 : i32
    %c0_i32_1 = arith.constant 0 : i32
    return %c0_i32, %c0_i32_0 : i32, i32
  }
  func.func @transform_8(%arg0: i32) -> (i32, i32) {
    %c0_i32 = arith.constant 0 : i32
    %c0_i32_0 = arith.constant 0 : i32
    %c0_i32_1 = arith.constant 0 : i32
    return %c0_i32, %c0_i32_0 : i32, i32
  }
  func.func @transform_9(%arg0: i32) -> (i32, i32) {
    %c0_i32 = arith.constant 0 : i32
    %c0_i32_0 = arith.constant 0 : i32
    %c0_i32_1 = arith.constant 0 : i32
    return %c0_i32, %c0_i32_0 : i32, i32
  }
}

</mosaic_0001>

<bundles_post_ra>
// kernel: disc_uno_forward.1
= control target key start
LH: loop header
LB: loop body
LE: loop exit
PB: predicated region body
PF: predicated region fallthrough
CT: control target
= control target key end

     0   :  { %v5995_v32 = vmov 0   ;;  %s8425_s2 = inlined_call_operand.vmem [shape: bf16[128,128], index: 2, kind: input, shape index: {}]   ;;  %s8426_s0 = inlined_call_operand.vmem [shape: bf16[288,128], index: 0, kind: input, shape index: {}]   ;;  %s8427_s3 = inlined_call_operand.vmem [shape: f32[3,128], index: 3, kind: input, shape index: {}]   ;;  %s8428_s1 = inlined_call_operand.vmem [shape: bf16[400,144], index: 1, kind: input, shape index: {}]   ;;  %s8429_s4 = inlined_call_operand.vmem [shape: bf16[3200,128], index: 4, kind: input, shape index: {}]   ;;  %s8430_s5 = inlined_call_operand.vmem [shape: f32[3,128], index: 5, kind: input, shape index: {}]   ;;  %s8431_s6 = inlined_call_operand.vmem [shape: f32[32,128], index: 6, kind: input, shape index: {}]   ;;  %s8432_s7 = inlined_call_operand.vmem [shape: f32[2,32], index: 7, kind: input, shape index: {}]   ;;  %s8433_s8 = inlined_call_operand.<no memory space> [shape: f32[1,1], index: 8, kind: input, shape index: {}]   ;;  %s8434_s9 = inlined_call_operand.vmem [shape: f32[2,1], index: 9, kind: output, shape index: {}]  }
   0x1   :  { %v5492_v0 = vld [vmem:[%s8425_s2] sm:$0xff]   ;;  %v5493_v1 = vld [vmem:[%s8425_s2 + $0x8] sm:$0xff]   ;;  %v5494_v2 = vld [vmem:[%s8425_s2 + $0x10] sm:$0xff]   ;;  %1512 = vmatprep.subr.bf16.mxu1 %v5995_v32 }
   0x2   :  { %5379 = vmatprep.subr.bf16.mxu0 %v5492_v0  ;;  %v5495_v3 = vld [vmem:[%s8425_s2 + $0x18] sm:$0xff]   ;;  %v5500_v4 = vld [vmem:[%s8426_s0] sm:$0xff]   ;;  %v5497_v6 = vld [vmem:[%s8425_s2 + $0x28] sm:$0xff]  }
   0x3   :  { %5380 = vmatpush3.bf16.msra.mxu0 %v5492_v0  ;;  %5395 = vmatprep.mubr.bf16.mxu0 %v5500_v4  ;;  %v5496_v5 = vld [vmem:[%s8425_s2 + $0x20] sm:$0xff]   ;;  %v5498_v7 = vld [vmem:[%s8425_s2 + $0x30] sm:$0xff]   ;;  %v5499_v8 = vld [vmem:[%s8425_s2 + $0x38] sm:$0xff]  }
   0x4   :  { %5381 = vmatprep.subr.bf16.mxu0 %v5493_v1  ;;  %v5501_v9 = vld [vmem:[%s8426_s0 + $0x8] sm:$0xff]   ;;  %v5502_v10 = vld [vmem:[%s8426_s0 + $0x10] sm:$0xff]   ;;  %v5503_v11 = vld [vmem:[%s8426_s0 + $0x18] sm:$0xff]  }
   0x5   :  { %v5504_v12 = vld [vmem:[%s8426_s0 + $0x20] sm:$0xff]   ;;  %v5505_v13 = vld [vmem:[%s8426_s0 + $0x28] sm:$0xff]   ;;  %v5506_v14 = vld [vmem:[%s8426_s0 + $0x30] sm:$0xff]  }
   0x6   :  { %v5507_v15 = vld [vmem:[%s8426_s0 + $0x38] sm:$0xff]   ;;  %v5508_v16 = vld [vmem:[%s8426_s0 + $0x40] sm:$0xff]   ;;  %v5509_v17 = vld [vmem:[%s8426_s0 + $0x48] sm:$0xff]  }
   0x7   :  { %5382 = vmatpush3.bf16.msra.mxu0 %v5493_v1  ;;  %v5510_v18 = vld [vmem:[%s8426_s0 + $0x50] sm:$0xff]   ;;  %v5511_v19 = vld [vmem:[%s8426_s0 + $0x58] sm:$0xff]   ;;  %v5512_v20 = vld [vmem:[%s8426_s0 + $0x60] sm:$0xff]  }
   0x8   :  { %5383 = vmatprep.subr.bf16.mxu0 %v5494_v2  ;;  %v5513_v21 = vld [vmem:[%s8426_s0 + $0x68] sm:$0xff]   ;;  %v5514_v22 = vld [vmem:[%s8426_s0 + $0x70] sm:$0xff]   ;;  %v5515_v23 = vld [vmem:[%s8426_s0 + $0x78] sm:$0xff]  }
   0x9   :  { %v5516_v24 = vld [vmem:[%s8426_s0 + $0x80] sm:$0xff]   ;;  %v5517_v25 = vld [vmem:[%s8426_s0 + $0x88] sm:$0xff]  }
   0xa   :  { %v6130_v26 = vld [vmem:[%s8427_s3] ss:$0 sm:$0xff] }
   0xb   :  { %5384 = vmatpush3.bf16.msra.mxu0 %v5494_v2 }
   0xc   :  { %5385 = vmatprep.subr.bf16.mxu0 %v5495_v3 }
   0xf   :  { %5386 = vmatpush3.bf16.msra.mxu0 %v5495_v3 }
  0x10   :  { %5387 = vmatprep.subr.bf16.mxu0 %v5496_v5 }
  0x13   :  { %5388 = vmatpush3.bf16.msra.mxu0 %v5496_v5 }
  0x14   :  { %5389 = vmatprep.subr.bf16.mxu0 %v5497_v6 }
  0x17   :  { %5390 = vmatpush3.bf16.msra.mxu0 %v5497_v6 }
  0x18   :  { %5391 = vmatprep.subr.bf16.mxu0 %v5498_v7 }
  0x1b   :  { %5392 = vmatpush3.bf16.msra.mxu0 %v5498_v7 }
  0x1c   :  { %5393 = vmatprep.subr.bf16.mxu0 %v5499_v8 }
  0x1f   :  { %5394 = vmatpush3.bf16.msra.mxu0 %v5499_v8 }
  0x22   :  { %5396 = vmatmul.mubr.bf16.vlgmr.msra.gmra.mrb[0].mxu0 %v5501_v9 }
  0x23   :  { %5399 = vmatprep.mubr.bf16.mxu0 %v5502_v10 }
  0x2a   :  { %5400 = vmatmul.mubr.bf16.gmra.mrb[4].mxu0 %v5503_v11 }
  0x2b   :  { %5403 = vmatprep.mubr.bf16.mxu0 %v5504_v12 }
  0x32   :  { %5404 = vmatmul.mubr.bf16.gmra.mrb[8].mxu0 %v5505_v13 }
  0x33   :  { %5407 = vmatprep.mubr.bf16.mxu0 %v5506_v14 }
  0x3a   :  { %5408 = vmatmul.mubr.bf16.gmra.mrb[12].mxu0 %v5507_v15 }
  0x3b   :  { %5411 = vmatprep.mubr.bf16.mxu0 %v5508_v16 }
  0x42   :  { %5412 = vmatmul.mubr.bf16.gmra.mrb[16].mxu0 %v5509_v17 }
  0x43   :  { %5415 = vmatprep.mubr.bf16.mxu0 %v5510_v18 }
  0x4a   :  { %5416 = vmatmul.mubr.bf16.gmra.mrb[20].mxu0 %v5511_v19 }
  0x4b   :  { %5419 = vmatprep.mubr.bf16.mxu0 %v5512_v20 }
  0x52   :  { %5420 = vmatmul.mubr.bf16.gmra.mrb[24].mxu0 %v5513_v21 }
  0x53   :  { %5423 = vmatprep.mubr.bf16.mxu0 %v5514_v22 }
  0x5a   :  { %5424 = vmatmul.mubr.bf16.gmra.mrb[28].mxu0 %v5515_v23 }
  0x5b   :  { %5427 = vmatprep.mubr.bf16.mxu0 %v5516_v24 }
  0x62   :  { %5428 = vmatmul.mubr.bf16.gmra.mrb[32].mxu0 %v5517_v25 }
  0xf5   :  { %v5397_v27 = vpop.f32.mrb[0].mxu0 }
  0xf6   :  { %v291_v28 = vadd.f32 %v5397_v27, %v6130_v26  ;;  %v282_v29 = vpop.f32.mrb[1].mxu0 }
  0xf7   :  { %v283_v30 = vadd.f32 %v6130_v26, %v282_v29  ;;  %v5398_v31 = vpop.f32.mrb[2].mxu0 }
  0xf8   :  { %v294_v33 = vadd.f32 %v5398_v31, %v6130_v26  ;;  %v285_v34 = vpop.f32.mrb[3].mxu0  ;;  %v463_v35 = vmul.f32 0.01, %v291_v28  ;;  %vm427_vm1 = vcmp.ge.f32.partialorder %v291_v28, 0.0 }
  0xf9   :  { %vm425_vm0 = vcmp.ge.f32.partialorder %v283_v30, 0.0  ;;  %v461_v36 = vmul.f32 0.01, %v283_v30  ;;  %v286_v37 = vadd.f32 %v6130_v26, %v285_v34 }
  0xfa   :  { %v464_v39 = vmul.f32 0.01, %v294_v33  ;;  %vm428_vm3 = vcmp.ge.f32.partialorder %v294_v33, 0.0  ;;  %v6139_v41 = vsel %vm427_vm1, %v291_v28, %v463_v35 }
  0xfb   :  { %v6137_v38 = vsel %vm425_vm0, %v283_v30, %v461_v36  ;;  %vm426_vm2 = vcmp.ge.f32.partialorder %v286_v37, 0.0  ;;  %v462_v40 = vmul.f32 0.01, %v286_v37  ;;  %v578_v52 = vmul.f32 %v6139_v41, %v6139_v41 }
  0xfc   :  { %v576_v44 = vmul.f32 %v6137_v38, %v6137_v38  ;;  %v6149_v48 = vsel %vm428_vm3, %v294_v33, %v464_v39 }
  0xfd   :  { %v6141_v42 = vsel %vm426_vm2, %v286_v37, %v462_v40  ;;  %v5401_v43 = vpop.f32.mrb[4].mxu0  ;;  %v579_v59 = vmul.f32 %v6149_v48, %v6149_v48 }
  0xfe   :  { %v533_v45 = vadd.f32 %v6141_v42, %v6137_v38  ;;  %v577_v46 = vmul.f32 %v6141_v42, %v6141_v42  ;;  %v298_v47 = vpop.f32.mrb[5].mxu0  ;;  %v307_v49 = vadd.f32 %v5401_v43, %v6130_v26 }
  0xff   :  { %v299_v50 = vadd.f32 %v6130_v26, %v298_v47  ;;  %v5402_v51 = vpop.f32.mrb[6].mxu0 }
 0x100   :  { %v534_v53 = vadd.f32 %v533_v45, %v6139_v41  ;;  %v612_v54 = vadd.f32 %v577_v46, %v576_v44  ;;  %v301_v55 = vpop.f32.mrb[7].mxu0  ;;  %v310_v57 = vadd.f32 %v5402_v51, %v6130_v26  ;;  %vm431_vm5 = vcmp.ge.f32.partialorder %v307_v49, 0.0 }
 0x101   :  { %vm429_vm4 = vcmp.ge.f32.partialorder %v299_v50, 0.0  ;;  %v465_v56 = vmul.f32 0.01, %v299_v50  ;;  %v302_v58 = vadd.f32 %v6130_v26, %v301_v55  ;;  %v467_v62 = vmul.f32 0.01, %v307_v49 }
 0x102   :  { %v613_v60 = vadd.f32 %v612_v54, %v578_v52  ;;  %v535_v61 = vadd.f32 %v534_v53, %v6149_v48  ;;  %v468_v0 = vmul.f32 0.01, %v310_v57  ;;  %vm432_vm7 = vcmp.ge.f32.partialorder %v310_v57, 0.0 }
 0x103   :  { %v6161_v63 = vsel %vm429_vm4, %v299_v50, %v465_v56  ;;  %vm430_vm6 = vcmp.ge.f32.partialorder %v302_v58, 0.0  ;;  %v466_v4 = vmul.f32 0.01, %v302_v58  ;;  %v6167_v9 = vsel %vm431_vm5, %v307_v49, %v467_v62 }
 0x104   :  { %v536_v1 = vadd.f32 %v535_v61, %v6161_v63  ;;  %v580_v2 = vmul.f32 %v6161_v63, %v6161_v63  ;;  %v614_v3 = vadd.f32 %v613_v60, %v579_v59  ;;  %v6172_v13 = vsel %vm432_vm7, %v310_v57, %v468_v0 }
 0x105   :  { %v5405_v5 = vpop.f32.mrb[8].mxu0  ;;  %v6169_v10 = vsel %vm430_vm6, %v302_v58, %v466_v4  ;;  %v582_v20 = vmul.f32 %v6167_v9, %v6167_v9  ;;  %v583_v24 = vmul.f32 %v6172_v13, %v6172_v13  ;;  %vm1436_vm4 = vcmask 130048  }
 0x106   :  { %v615_v6 = vadd.f32 %v614_v3, %v580_v2  ;;  %v323_v7 = vadd.f32 %v5405_v5, %v6130_v26  ;;  %v314_v8 = vpop.f32.mrb[9].mxu0  ;;  %v537_v14 = vadd.f32 %v536_v1, %v6169_v10  ;;  %v581_v15 = vmul.f32 %v6169_v10, %v6169_v10 }
 0x107   :  { %v315_v11 = vadd.f32 %v6130_v26, %v314_v8  ;;  %v5406_v12 = vpop.f32.mrb[10].mxu0 }
 0x108   :  { %v317_v16 = vpop.f32.mrb[11].mxu0  ;;  %v326_v18 = vadd.f32 %v5406_v12, %v6130_v26  ;;  %v538_v21 = vadd.f32 %v537_v14, %v6167_v9  ;;  %v616_v22 = vadd.f32 %v615_v6, %v581_v15  ;;  %v471_v23 = vmul.f32 0.01, %v323_v7 }
 0x109   :  { %vm433_vm8 = vcmp.ge.f32.partialorder %v315_v11, 0.0  ;;  %v469_v17 = vmul.f32 0.01, %v315_v11  ;;  %v318_v19 = vadd.f32 %v6130_v26, %v317_v16  ;;  %vm435_vm9 = vcmp.ge.f32.partialorder %v323_v7, 0.0 }
 0x10a   :  { %v472_v27 = vmul.f32 0.01, %v326_v18  ;;  %v617_v28 = vadd.f32 %v616_v22, %v582_v20  ;;  %v539_v29 = vadd.f32 %v538_v21, %v6172_v13  ;;  %vm436_vm11 = vcmp.ge.f32.partialorder %v326_v18, 0.0 }
 0x10b   :  { %v6184_v25 = vsel %vm433_vm8, %v315_v11, %v469_v17  ;;  %vm434_vm10 = vcmp.ge.f32.partialorder %v318_v19, 0.0  ;;  %v470_v31 = vmul.f32 0.01, %v318_v19  ;;  %v6189_v34 = vsel %vm435_vm9, %v323_v7, %v471_v23 }
 0x10c   :  { %v584_v30 = vmul.f32 %v6184_v25, %v6184_v25  ;;  %v540_v35 = vadd.f32 %v539_v29, %v6184_v25  ;;  %v618_v36 = vadd.f32 %v617_v28, %v583_v24  ;;  %v6196_v46 = vsel %vm436_vm11, %v326_v18, %v472_v27 }
 0x10d   :  { %v5409_v33 = vpop.f32.mrb[12].mxu0  ;;  %v6193_v40 = vsel %vm434_vm10, %v318_v19, %v470_v31  ;;  %v586_v51 = vmul.f32 %v6189_v34, %v6189_v34  ;;  %v587_v58 = vmul.f32 %v6196_v46, %v6196_v46 }
 0x10e   :  { %v339_v37 = vadd.f32 %v5409_v33, %v6130_v26  ;;  %v330_v39 = vpop.f32.mrb[13].mxu0  ;;  %v619_v45 = vadd.f32 %v618_v36, %v584_v30  ;;  %v541_v47 = vadd.f32 %v540_v35, %v6193_v40  ;;  %v585_v49 = vmul.f32 %v6193_v40, %v6193_v40 }
 0x10f   :  { %v331_v43 = vadd.f32 %v6130_v26, %v330_v39  ;;  %v5410_v44 = vpop.f32.mrb[14].mxu0 }
 0x110   :  { %v333_v50 = vpop.f32.mrb[15].mxu0  ;;  %v342_v53 = vadd.f32 %v5410_v44, %v6130_v26  ;;  %v542_v54 = vadd.f32 %v541_v47, %v6189_v34  ;;  %v620_v55 = vadd.f32 %v619_v45, %v585_v49  ;;  %v475_v56 = vmul.f32 0.01, %v339_v37  ;;  %v5520_v49 = vld [vmem:[%s8428_s1 + $0x4] ss:$8 sps:$4 sm:$0xff]  }
 0x111   :  { %vm437_vm12 = vcmp.ge.f32.partialorder %v331_v43, 0.0  ;;  %v473_v52 = vmul.f32 0.01, %v331_v43  ;;  %v334_v57 = vadd.f32 %v6130_v26, %v333_v50  ;;  %vm439_vm13 = vcmp.ge.f32.partialorder %v339_v37, 0.0  ;;  %4549 = vmatprep.mubr.msk.bf16.mxu1 %vm1436_vm4, %v5520_v49 }
 0x112   :  { %v621_v60 = vadd.f32 %v620_v55, %v586_v51  ;;  %v543_v61 = vadd.f32 %v542_v54, %v6196_v46  ;;  %v476_v0 = vmul.f32 0.01, %v342_v53  ;;  %vm440_vm14 = vcmp.ge.f32.partialorder %v342_v53, 0.0 }
 0x113   :  { %v6208_v59 = vsel %vm437_vm12, %v331_v43, %v473_v52  ;;  %vm438_vm15 = vcmp.ge.f32.partialorder %v334_v57, 0.0  ;;  %v474_v1 = vmul.f32 0.01, %v334_v57  ;;  %v6213_v3 = vsel %vm439_vm13, %v339_v37, %v475_v56 }
 0x114   :  { %v588_v62 = vmul.f32 %v6208_v59, %v6208_v59  ;;  %v544_v4 = vadd.f32 %v543_v61, %v6208_v59  ;;  %v622_v5 = vadd.f32 %v621_v60, %v587_v58  ;;  %v6220_v15 = vsel %vm440_vm14, %v342_v53, %v476_v0 }
 0x115   :  { %v5413_v2 = vpop.f32.mrb[16].mxu0  ;;  %v6217_v8 = vsel %vm438_vm15, %v334_v57, %v474_v1  ;;  %v590_v19 = vmul.f32 %v6213_v3, %v6213_v3  ;;  %v591_v28 = vmul.f32 %v6220_v15, %v6220_v15 }
 0x116   :  { %v355_v6 = vadd.f32 %v5413_v2, %v6130_v26  ;;  %v346_v7 = vpop.f32.mrb[17].mxu0  ;;  %v623_v14 = vadd.f32 %v622_v5, %v588_v62  ;;  %v545_v16 = vadd.f32 %v544_v4, %v6217_v8  ;;  %v589_v17 = vmul.f32 %v6217_v8, %v6217_v8 }
 0x117   :  { %v347_v11 = vadd.f32 %v6130_v26, %v346_v7  ;;  %v5414_v12 = vpop.f32.mrb[18].mxu0 }
 0x118   :  { %v349_v18 = vpop.f32.mrb[19].mxu0  ;;  %v358_v21 = vadd.f32 %v5414_v12, %v6130_v26  ;;  %v546_v22 = vadd.f32 %v545_v16, %v6213_v3  ;;  %v624_v23 = vadd.f32 %v623_v14, %v589_v17  ;;  %v479_v24 = vmul.f32 0.01, %v355_v6 }
 0x119   :  { %vm441_vm0 = vcmp.ge.f32.partialorder %v347_v11, 0.0  ;;  %v477_v20 = vmul.f32 0.01, %v347_v11  ;;  %v350_v27 = vadd.f32 %v6130_v26, %v349_v18  ;;  %vm443_vm1 = vcmp.ge.f32.partialorder %v355_v6, 0.0 }
 0x11a   :  { %vm444_vm2 = vcmp.ge.f32.partialorder %v358_v21, 0.0  ;;  %v625_v30 = vadd.f32 %v624_v23, %v590_v19  ;;  %v547_v31 = vadd.f32 %v546_v22, %v6220_v15  ;;  %v480_v35 = vmul.f32 0.01, %v358_v21 }
 0x11b   :  { %v6232_v29 = vsel %vm441_vm0, %v347_v11, %v477_v20  ;;  %vm442_vm3 = vcmp.ge.f32.partialorder %v350_v27, 0.0  ;;  %v478_v36 = vmul.f32 0.01, %v350_v27  ;;  %v6237_v39 = vsel %vm443_vm1, %v355_v6, %v479_v24 }
 0x11c   :  { %v592_v33 = vmul.f32 %v6232_v29, %v6232_v29  ;;  %v548_v43 = vadd.f32 %v547_v31, %v6232_v29  ;;  %v626_v44 = vadd.f32 %v625_v30, %v591_v28  ;;  %v6248_v54 = vsel %vm444_vm2, %v358_v21, %v480_v35 }
 0x11d   :  { %v5417_v37 = vpop.f32.mrb[20].mxu0  ;;  %v6244_v50 = vsel %vm442_vm3, %v350_v27, %v478_v36  ;;  %v594_v58 = vmul.f32 %v6237_v39, %v6237_v39  ;;  %v595_v4 = vmul.f32 %v6248_v54, %v6248_v54 }
 0x11e   :  { %v371_v45 = vadd.f32 %v5417_v37, %v6130_v26  ;;  %v362_v47 = vpop.f32.mrb[21].mxu0  ;;  %v627_v53 = vadd.f32 %v626_v44, %v592_v33  ;;  %v549_v55 = vadd.f32 %v548_v43, %v6244_v50  ;;  %v593_v56 = vmul.f32 %v6244_v50, %v6244_v50 }
 0x11f   :  { %v363_v51 = vadd.f32 %v6130_v26, %v362_v47  ;;  %v5418_v52 = vpop.f32.mrb[22].mxu0 }
 0x120   :  { %v365_v57 = vpop.f32.mrb[23].mxu0  ;;  %v374_v61 = vadd.f32 %v5418_v52, %v6130_v26  ;;  %v550_v62 = vadd.f32 %v549_v55, %v6237_v39  ;;  %v628_v0 = vadd.f32 %v627_v53, %v593_v56  ;;  %v483_v1 = vmul.f32 0.01, %v371_v45 }
 0x121   :  { %vm445_vm5 = vcmp.ge.f32.partialorder %v363_v51, 0.0  ;;  %v481_v60 = vmul.f32 0.01, %v363_v51  ;;  %v366_v2 = vadd.f32 %v6130_v26, %v365_v57  ;;  %vm447_vm6 = vcmp.ge.f32.partialorder %v371_v45, 0.0 }
 0x122   :  { %vm448_vm7 = vcmp.ge.f32.partialorder %v374_v61, 0.0  ;;  %v629_v6 = vadd.f32 %v628_v0, %v594_v58  ;;  %v551_v7 = vadd.f32 %v550_v62, %v6248_v54  ;;  %v484_v12 = vmul.f32 0.01, %v374_v61 }
 0x123   :  { %v6261_v5 = vsel %vm445_vm5, %v363_v51, %v481_v60  ;;  %vm446_vm8 = vcmp.ge.f32.partialorder %v366_v2, 0.0  ;;  %v482_v14 = vmul.f32 0.01, %v366_v2  ;;  %v6266_v17 = vsel %vm447_vm6, %v371_v45, %v483_v1 }
 0x124   :  { %v596_v11 = vmul.f32 %v6261_v5, %v6261_v5  ;;  %v552_v18 = vadd.f32 %v551_v7, %v6261_v5  ;;  %v630_v19 = vadd.f32 %v629_v6, %v595_v4  ;;  %v6274_v28 = vsel %vm448_vm7, %v374_v61, %v484_v12 }
 0x125   :  { %v5421_v16 = vpop.f32.mrb[24].mxu0  ;;  %v6270_v22 = vsel %vm446_vm8, %v366_v2, %v482_v14  ;;  %v598_v35 = vmul.f32 %v6266_v17, %v6266_v17  ;;  %v599_v47 = vmul.f32 %v6274_v28, %v6274_v28  ;;  %vm5997_vm6 = vmmov 0  }
 0x126   :  { %v387_v20 = vadd.f32 %v5421_v16, %v6130_v26  ;;  %v378_v21 = vpop.f32.mrb[25].mxu0  ;;  %v631_v27 = vadd.f32 %v630_v19, %v596_v11  ;;  %v553_v30 = vadd.f32 %v552_v18, %v6270_v22  ;;  %v597_v31 = vmul.f32 %v6270_v22, %v6270_v22 }
 0x127   :  { %v379_v23 = vadd.f32 %v6130_v26, %v378_v21  ;;  %v5422_v24 = vpop.f32.mrb[26].mxu0 }
 0x128   :  { %v381_v33 = vpop.f32.mrb[27].mxu0  ;;  %v390_v37 = vadd.f32 %v5422_v24, %v6130_v26  ;;  %v554_v43 = vadd.f32 %v553_v30, %v6266_v17  ;;  %v632_v44 = vadd.f32 %v631_v27, %v597_v31  ;;  %vm451_vm10 = vcmp.ge.f32.partialorder %v387_v20, 0.0 }
 0x129   :  { %vm449_vm9 = vcmp.ge.f32.partialorder %v379_v23, 0.0  ;;  %v485_v36 = vmul.f32 0.01, %v379_v23  ;;  %v382_v45 = vadd.f32 %v6130_v26, %v381_v33  ;;  %v487_v49 = vmul.f32 0.01, %v387_v20 }
 0x12a   :  { %vm452_vm11 = vcmp.ge.f32.partialorder %v390_v37, 0.0  ;;  %v633_v52 = vadd.f32 %v632_v44, %v598_v35  ;;  %v555_v53 = vadd.f32 %v554_v43, %v6274_v28  ;;  %v488_v56 = vmul.f32 0.01, %v390_v37 }
 0x12b   :  { %v6286_v51 = vsel %vm449_vm9, %v379_v23, %v485_v36  ;;  %vm450_vm12 = vcmp.ge.f32.partialorder %v382_v45, 0.0  ;;  %v486_v57 = vmul.f32 0.01, %v382_v45  ;;  %v6293_v0 = vsel %vm451_vm10, %v387_v20, %v487_v49 }
 0x12c   :  { %v600_v55 = vmul.f32 %v6286_v51, %v6286_v51  ;;  %v556_v60 = vadd.f32 %v555_v53, %v6286_v51  ;;  %v634_v61 = vadd.f32 %v633_v52, %v599_v47  ;;  %v6300_v11 = vsel %vm452_vm11, %v390_v37, %v488_v56 }
 0x12d   :  { %v5425_v58 = vpop.f32.mrb[28].mxu0  ;;  %v6295_v1 = vsel %vm450_vm12, %v382_v45, %v486_v57  ;;  %v602_v20 = vmul.f32 %v6293_v0, %v6293_v0  ;;  %v603_v27 = vmul.f32 %v6300_v11, %v6300_v11  ;;  %vm4374_vm10 = vcmask 261120  }
 0x12e   :  { %v394_v62 = vpop.f32.mrb[29].mxu0  ;;  %v403_v2 = vadd.f32 %v5425_v58, %v6130_v26  ;;  %v635_v7 = vadd.f32 %v634_v61, %v600_v55  ;;  %v557_v12 = vadd.f32 %v556_v60, %v6295_v1  ;;  %v601_v14 = vmul.f32 %v6295_v1, %v6295_v1 }
 0x12f   :  { %v395_v4 = vadd.f32 %v6130_v26, %v394_v62  ;;  %v5426_v6 = vpop.f32.mrb[30].mxu0  ;;  %vm4448_vm11 = vcmask 1041408   ;;  %vm4466_vm12 = vcmask 1024  }
 0x130   :  { %v397_v16 = vpop.f32.mrb[31].mxu0  ;;  %v406_v19 = vadd.f32 %v5426_v6, %v6130_v26  ;;  %v558_v21 = vadd.f32 %v557_v12, %v6293_v0  ;;  %v636_v23 = vadd.f32 %v635_v7, %v601_v14  ;;  %vm455_vm14 = vcmp.ge.f32.partialorder %v403_v2, 0.0 }
 0x131   :  { %vm453_vm13 = vcmp.ge.f32.partialorder %v395_v4, 0.0  ;;  %v489_v18 = vmul.f32 0.01, %v395_v4  ;;  %v398_v24 = vadd.f32 %v6130_v26, %v397_v16  ;;  %v491_v30 = vmul.f32 0.01, %v403_v2 }
 0x132   :  { %v637_v33 = vadd.f32 %v636_v23, %v602_v20  ;;  %v559_v35 = vadd.f32 %v558_v21, %v6300_v11  ;;  %v492_v37 = vmul.f32 0.01, %v406_v19  ;;  %vm456_vm15 = vcmp.ge.f32.partialorder %v406_v19, 0.0 }
 0x133   :  { %v6312_v31 = vsel %vm453_vm13, %v395_v4, %v489_v18  ;;  %vm454_vm0 = vcmp.ge.f32.partialorder %v398_v24, 0.0  ;;  %v490_v43 = vmul.f32 0.01, %v398_v24  ;;  %v6318_v52 = vsel %vm455_vm14, %v403_v2, %v491_v30 }
 0x134   :  { %v604_v36 = vmul.f32 %v6312_v31, %v6312_v31  ;;  %v560_v45 = vadd.f32 %v559_v35, %v6312_v31  ;;  %v638_v47 = vadd.f32 %v637_v33, %v603_v27  ;;  %v6324_v60 = vsel %vm456_vm15, %v406_v19, %v492_v37 }
 0x135   :  { %v5429_v44 = vpop.f32.mrb[32].mxu0  ;;  %v6320_v53 = vsel %vm454_vm0, %v398_v24, %v490_v43  ;;  %v606_v7 = vmul.f32 %v6318_v52, %v6318_v52  ;;  %v607_v18 = vmul.f32 %v6324_v60, %v6324_v60 }
 0x136   :  { %v410_v49 = vpop.f32.mrb[33].mxu0  ;;  %v419_v55 = vadd.f32 %v5429_v44, %v6130_v26  ;;  %v639_v58 = vadd.f32 %v638_v47, %v604_v36  ;;  %v561_v61 = vadd.f32 %v560_v45, %v6320_v53  ;;  %v605_v62 = vmul.f32 %v6320_v53, %v6320_v53 }
 0x137   :  { %v411_v56 = vadd.f32 %v6130_v26, %v410_v49  ;;  %v5430_v57 = vpop.f32.mrb[34].mxu0 }
 0x138   :  { %v413_v4 = vpop.f32.mrb[35].mxu0  ;;  %v422_v2 = vadd.f32 %v5430_v57, %v6130_v26  ;;  %v562_v12 = vadd.f32 %v561_v61, %v6318_v52  ;;  %v640_v14 = vadd.f32 %v639_v58, %v605_v62  ;;  %v495_v19 = vmul.f32 0.01, %v419_v55 }
 0x139   :  { %vm457_vm1 = vcmp.ge.f32.partialorder %v411_v56, 0.0  ;;  %v493_v6 = vmul.f32 0.01, %v411_v56  ;;  %v414_v16 = vadd.f32 %v6130_v26, %v413_v4  ;;  %vm459_vm2 = vcmp.ge.f32.partialorder %v419_v55, 0.0 }
 0x13a   :  { %v641_v21 = vadd.f32 %v640_v14, %v606_v7  ;;  %v563_v23 = vadd.f32 %v562_v12, %v6324_v60  ;;  %v496_v27 = vmul.f32 0.01, %v422_v2  ;;  %vm460_vm5 = vcmp.ge.f32.partialorder %v422_v2, 0.0 }
 0x13b   :  { %v6336_v20 = vsel %vm457_vm1, %v411_v56, %v493_v6  ;;  %vm458_vm3 = vcmp.ge.f32.partialorder %v414_v16, 0.0  ;;  %v494_v30 = vmul.f32 0.01, %v414_v16  ;;  %v6342_v26 = vsel %vm459_vm2, %v419_v55, %v495_v19 }
 0x13c   :  { %v608_v24 = vmul.f32 %v6336_v20, %v6336_v20  ;;  %v564_v33 = vadd.f32 %v563_v23, %v6336_v20  ;;  %v642_v35 = vadd.f32 %v641_v21, %v607_v18  ;;  %v6344_v45 = vsel %vm460_vm5, %v422_v2, %v496_v27 }
 0x13d   :  { %v530_v36 = vsel %vm458_vm3, %v414_v16, %v494_v30  ;;  %v610_v47 = vmul.f32 %v6342_v26, %v6342_v26  ;;  %v611_v57 = vmul.f32 %v6344_v45, %v6344_v45 }
 0x13e   :  { %v643_v37 = vadd.f32 %v642_v35, %v608_v24  ;;  %v565_v43 = vadd.f32 %v564_v33, %v530_v36  ;;  %v609_v44 = vmul.f32 %v530_v36, %v530_v36 }
 0x140   :  { %v566_v49 = vadd.f32 %v565_v43, %v6342_v26  ;;  %v644_v56 = vadd.f32 %v643_v37, %v609_v44  ;;  %v663_v37 = vlaneseq  ;;  %v656_v44 = vld [vmem:[%s8427_s3 + $0x1] sm:$0x1] }
 0x142   :  { %v567_v58 = vadd.f32 %v566_v49, %v6344_v45  ;;  %v645_v61 = vadd.f32 %v644_v56, %v610_v47  ;;  %v664_v43 = vshrl.u32 %v663_v37, 7 }
 0x144   :  { %v568_v55 = vrot.slane %v567_v58, 4  ;;  %v646_v62 = vadd.f32 %v645_v61, %v611_v57  ;;  %v6355_v47 = vsub.s32 0, %v664_v43  ;;  %v660_v57 = vld [vmem:[%s8427_s3 + $0x2] sm:$0x1] }
 0x146   :  { %v569_v4 = vadd.f32 %v568_v55, %v567_v58  ;;  %v647_v6 = vrot.slane %v646_v62, 4  ;;  %8442 = vst [vmem:[#allocation3_spill] sm:$0xff] %v6355_v47 }
 0x148   :  { %v570_v7 = vrot.slane %v569_v4, 2  ;;  %v648_v12 = vadd.f32 %v647_v6, %v646_v62 }
 0x14a   :  { %v571_v2 = vadd.f32 %v570_v7, %v569_v4  ;;  %v649_v14 = vrot.slane %v648_v12, 2 }
 0x14c   :  { %v572_v16 = vrot.slane %v571_v2, 1  ;;  %v650_v18 = vadd.f32 %v649_v14, %v648_v12 }
 0x14e   :  { %v573_v19 = vadd.f32 %v572_v16, %v571_v2  ;;  %v651_v21 = vrot.slane %v650_v18, 1 }
 0x150   :  { %v575_v23 = vmul.f32 0.0034722222, %v573_v19  ;;  %v652_v24 = vadd.f32 %v651_v21, %v650_v18 }
 0x152   :  { %v653_v27 = vmul.f32 0.0034722222, %v652_v24  ;;  %v654_v30 = vmul.f32 %v575_v23, %v575_v23 }
 0x154   :  { %v655_v33 = vsub.f32 %v653_v27, %v654_v30 }
 0x156   :  { %v657_v35 = vadd.f32 1e-05, %v655_v33 }
 0x158   :  { %5793 = vrsqrt.f32 %v657_v35 }
 0x162   :  { %v5794_v49 = vpop.eup %5793 }
 0x163   :  { %v659_v56 = vmul.f32 %v5794_v49, %v656_v44 }
 0x165   :  { %v661_v58 = vmul.f32 %v659_v56, %v575_v23  ;;  %v666_v61 = vrot.slane %v659_v56, %v6355_v47 }
 0x167   :  { %v662_v55 = vsub.f32 %v660_v57, %v661_v58  ;;  %v700_v62 = vmul.f32 %v666_v61, %v530_v36  ;;  %v669_v4 = vmul.f32 %v666_v61, %v6139_v41  ;;  %v670_v6 = vmul.f32 %v666_v61, %v6149_v48 }
 0x168   :  { %v671_v7 = vmul.f32 %v666_v61, %v6161_v63  ;;  %v672_v12 = vmul.f32 %v666_v61, %v6169_v10  ;;  %v673_v2 = vmul.f32 %v666_v61, %v6167_v9  ;;  %v674_v14 = vmul.f32 %v666_v61, %v6172_v13 }
 0x169   :  { %v6368_v16 = vrot.slane %v662_v55, %v6355_v47  ;;  %v675_v18 = vmul.f32 %v666_v61, %v6184_v25  ;;  %v676_v19 = vmul.f32 %v666_v61, %v6193_v40  ;;  %v677_v36 = vmul.f32 %v666_v61, %v6189_v34 }
 0x16a   :  { %v678_v41 = vmul.f32 %v666_v61, %v6196_v46  ;;  %v679_v48 = vmul.f32 %v666_v61, %v6208_v59  ;;  %v680_v63 = vmul.f32 %v666_v61, %v6217_v8  ;;  %v681_v10 = vmul.f32 %v666_v61, %v6213_v3 }
 0x16b   :  { %v6378_v9 = vadd.f32 %v6368_v16, %v700_v62  ;;  %v682_v13 = vmul.f32 %v666_v61, %v6220_v15  ;;  %v683_v21 = vmul.f32 %v666_v61, %v6232_v29  ;;  %v684_v25 = vmul.f32 %v666_v61, %v6244_v50 }
 0x16c   :  { %v685_v40 = vmul.f32 %v666_v61, %v6237_v39  ;;  %v686_v34 = vmul.f32 %v666_v61, %v6248_v54  ;;  %v687_v46 = vmul.f32 %v666_v61, %v6261_v5  ;;  %v688_v59 = vmul.f32 %v666_v61, %v6270_v22 }
 0x16d   :  { %v689_v8 = vmul.f32 %v666_v61, %v6266_v17  ;;  %v690_v3 = vmul.f32 %v666_v61, %v6274_v28  ;;  %v691_v23 = vmul.f32 %v666_v61, %v6286_v51  ;;  %v692_v15 = vmul.f32 %v666_v61, %v6295_v1 }
 0x16e   :  { %v693_v29 = vmul.f32 %v666_v61, %v6293_v0  ;;  %v694_v50 = vmul.f32 %v666_v61, %v6300_v11  ;;  %v695_v39 = vmul.f32 %v666_v61, %v6312_v31  ;;  %v696_v54 = vmul.f32 %v666_v61, %v6320_v53 }
 0x16f   :  { %v697_v5 = vmul.f32 %v666_v61, %v6318_v52  ;;  %v698_v22 = vmul.f32 %v666_v61, %v6324_v60  ;;  %v699_v17 = vmul.f32 %v666_v61, %v6336_v20  ;;  %v701_v28 = vmul.f32 %v666_v61, %v6342_v26 }
 0x170   :  { %v702_v51 = vmul.f32 %v666_v61, %v6344_v45  ;;  %v6401_v1 = vadd.f32 %v6368_v16, %v685_v40  ;;  %v6404_v0 = vadd.f32 %v6368_v16, %v686_v34  ;;  %v6407_v11 = vadd.f32 %v6368_v16, %v687_v46 }
 0x171   :  { %v6410_v31 = vadd.f32 %v6368_v16, %v688_v59  ;;  %v6413_v52 = vadd.f32 %v6368_v16, %v689_v8  ;;  %v6416_v53 = vadd.f32 %v6368_v16, %v690_v3  ;;  %v6419_v60 = vadd.f32 %v6368_v16, %v691_v23 }
 0x172   :  { %v6422_v20 = vadd.f32 %v6368_v16, %v692_v15  ;;  %v6425_v26 = vadd.f32 %v6368_v16, %v693_v29  ;;  %v6428_v45 = vadd.f32 %v6368_v16, %v694_v50  ;;  %v6431_v24 = vadd.f32 %v6368_v16, %v695_v39  ;;  %v7258_v50 = vld [vmem:[%s8429_s4 + $0x400] sm:$0xff]  }
 0x173   :  { %v6434_v27 = vadd.f32 %v6368_v16, %v696_v54  ;;  %v6437_v30 = vadd.f32 %v6368_v16, %v697_v5  ;;  %v6440_v33 = vadd.f32 %v6368_v16, %v698_v22  ;;  %v6443_v35 = vadd.f32 %v6368_v16, %v699_v17  ;;  %v5560_v54 = vld [vmem:[%s8429_s4 + $0x2c0] sm:$0xff]   ;;  %v5521_v22 = vld [vmem:[%s8428_s1 + $0x14] ss:$8 sps:$4 sm:$0xff]  }
 0x174   :  { %v6446_v37 = vadd.f32 %v6368_v16, %v701_v28  ;;  %v6449_v43 = vadd.f32 %v6368_v16, %v702_v51  ;;  %v667_v44 = vmul.f32 %v666_v61, %v6137_v38  ;;  %v668_v49 = vmul.f32 %v666_v61, %v6141_v42  ;;  %v5518_v5 = vld [vmem:[%s8428_s1] ss:$8 sps:$4 sm:$0xff]  }
 0x175   :  { %v709_v56 = vadd.f32 %v6368_v16, %v669_v4  ;;  %v710_v57 = vadd.f32 %v6368_v16, %v670_v6  ;;  %v711_v58 = vadd.f32 %v6368_v16, %v671_v7  ;;  %v712_v55 = vadd.f32 %v6368_v16, %v672_v12  ;;  %v5561_v17 = vld [vmem:[%s8429_s4 + $0x280] sm:$0xff]   ;;  %v5571_v28 = vld [vmem:[%s8429_s4 + $0x2c8] sm:$0xff]  }
 0x176   :  { %v707_v62 = vadd.f32 %v6368_v16, %v667_v44  ;;  %v708_v40 = vadd.f32 %v6368_v16, %v668_v49  ;;  %v713_v34 = vadd.f32 %v6368_v16, %v673_v2  ;;  %v714_v46 = vadd.f32 %v6368_v16, %v674_v14  ;;  %v5572_v51 = vld [vmem:[%s8429_s4 + $0x288] sm:$0xff]   ;;  %v5523_v44 = vld [vmem:[%s8428_s1 + $0x10] ss:$8 sps:$4 sm:$0xff]  }
 0x177   :  { %v744_v59 = vpack.c.bf16 %v710_v57, %v709_v56  ;;  %v745_v38 = vpack.c.bf16 %v712_v55, %v711_v58  ;;  %v715_v42 = vadd.f32 %v6368_v16, %v675_v18  ;;  %v716_v61 = vadd.f32 %v6368_v16, %v676_v19  ;;  %v5524_v49 = vld [vmem:[%s8428_s1 + $0x24] ss:$8 sps:$4 sm:$0xff]   ;;  %v5526_v56 = vld [vmem:[%s8428_s1 + $0x20] ss:$8 sps:$4 sm:$0xff]   ;;  %v5527_v57 = vld [vmem:[%s8428_s1 + $0x34] ss:$8 sps:$4 sm:$0xff]  }
 0x178   :  { %v743_v4 = vpack.c.bf16 %v708_v40, %v707_v62  ;;  %v746_v6 = vpack.c.bf16 %v714_v46, %v713_v34  ;;  %v717_v7 = vadd.f32 %v6368_v16, %v677_v36  ;;  %v718_v12 = vadd.f32 %v6368_v16, %v678_v41  ;;  %v5529_v58 = vld [vmem:[%s8428_s1 + $0x30] ss:$8 sps:$4 sm:$0xff]   ;;  %v5530_v55 = vld [vmem:[%s8428_s1 + $0x44] ss:$8 sps:$4 sm:$0xff]   ;;  %v5532_v34 = vld [vmem:[%s8428_s1 + $0x40] ss:$8 sps:$4 sm:$0xff]  }
 0x179   :  { %v747_v8 = vpack.c.bf16 %v716_v61, %v715_v42  ;;  %v719_v3 = vadd.f32 %v6368_v16, %v679_v48  ;;  %v720_v23 = vadd.f32 %v6368_v16, %v680_v63  ;;  %v721_v2 = vadd.f32 %v6368_v16, %v681_v10  ;;  %v5582_v62 = vld [vmem:[%s8429_s4 + $0x2d0] sm:$0xff]   ;;  %v5538_v42 = vld [vmem:[%s8428_s1 + $0x60] ss:$8 sps:$4 sm:$0xff]  }
 0x17a   :  { %1513 = vmatpush1.bf16.msra.mxu1 %v743_v4  ;;  %v748_v14 = vpack.c.bf16 %v718_v12, %v717_v7  ;;  %v722_v15 = vadd.f32 %v6368_v16, %v682_v13  ;;  %v723_v18 = vadd.f32 %v6368_v16, %v683_v21  ;;  %v724_v19 = vadd.f32 %v6368_v16, %v684_v25  ;;  %v5583_v40 = vld [vmem:[%s8429_s4 + $0x290] sm:$0xff]   ;;  %v5593_v4 = vld [vmem:[%s8429_s4 + $0x2d8] sm:$0xff]   ;;  %v5542_v12 = vld [vmem:[%s8428_s1 + $0x84] ss:$8 sps:$4 sm:$0xff]  }
 0x17b   :  { %1514 = vmatprep.subr.bf16.mxu1 %v5995_v32  ;;  %v749_v36 = vpack.c.bf16 %v720_v23, %v719_v3  ;;  %v752_v41 = vpack.c.bf16 %v6404_v0, %v6401_v1  ;;  %v753_v48 = vpack.c.bf16 %v6410_v31, %v6407_v11  ;;  %v754_v63 = vpack.c.bf16 %v6416_v53, %v6413_v52  ;;  %v5533_v46 = vld [vmem:[%s8428_s1 + $0x54] ss:$8 sps:$4 sm:$0xff]   ;;  %v5541_v7 = vld [vmem:[%s8428_s1 + $0x70] ss:$8 sps:$4 sm:$0xff]   ;;  %v5599_v3 = vld [vmem:[%s8429_s4] sm:$0xff]  }
 0x17c   :  { %v750_v10 = vpack.c.bf16 %v722_v15, %v721_v2  ;;  %v751_v29 = vpack.c.bf16 %v724_v19, %v723_v18  ;;  %v5539_v61 = vld [vmem:[%s8428_s1 + $0x74] ss:$8 sps:$4 sm:$0xff]   ;;  %v5600_v23 = vld [vmem:[%s8429_s4 + $0x48] sm:$0xff]   ;;  %v7397_v11 = vld [vmem:[%s8429_s4 + $0x540] sm:$0xff]   ;;  %v8443_v52 = vpack.c.bf16 %v6422_v20, %v6419_v60  ;;  %v8446_v20 = vpack.c.bf16 %v6428_v45, %v6425_v26 }
 0x17d   :  { %v5544_v2 = vld [vmem:[%s8428_s1 + $0x80] ss:$8 sps:$4 sm:$0xff]   ;;  %v5545_v15 = vld [vmem:[%s8428_s1 + $0x94] ss:$8 sps:$4 sm:$0xff]   ;;  %v8447_v26 = vpack.c.bf16 %v6434_v27, %v6431_v24  ;;  %v8448_v24 = vpack.c.bf16 %v6440_v33, %v6437_v30  ;;  %v8449_v30 = vpack.c.bf16 %v6378_v9, %v6443_v35  ;;  %v8450_v9 = vpack.c.bf16 %v6449_v43, %v6446_v37 }
 0x17e   :  { %1515 = vmatpush1.bf16.msra.mxu1 %v744_v59  ;;  %v5535_v59 = vld [vmem:[%s8428_s1 + $0x50] ss:$8 sps:$4 sm:$0xff]   ;;  %v5601_v18 = vld [vmem:[%s8429_s4 + $0x8] sm:$0xff]   ;;  %v7404_v31 = vld [vmem:[%s8429_s4 + $0x500] sm:$0xff]  }
 0x17f   :  { %1516 = vmatprep.subr.bf16.mxu1 %v5995_v32  ;;  %v5602_v19 = vld [vmem:[%s8429_s4 + $0x50] sm:$0xff]   ;;  %v7339_v13 = vld [vmem:[%s8429_s4 + $0x468] sm:$0xff]   ;;  %v7451_v45 = vld [vmem:[%s8429_s4 + $0x558] sm:$0xff]  }
 0x180   :  { %v7300_v25 = vld [vmem:[%s8429_s4 + $0x410] sm:$0xff]   ;;  %v7413_v53 = vld [vmem:[%s8429_s4 + $0x548] sm:$0xff]   ;;  %v7467_v27 = vld [vmem:[%s8429_s4 + $0x560] sm:$0xff]  }
 0x181   :  { %v7370_v0 = vld [vmem:[%s8429_s4 + $0x430] sm:$0xff]   ;;  %v7426_v60 = vld [vmem:[%s8429_s4 + $0x508] sm:$0xff]  }
 0x182   :  { %1517 = vmatpush1.bf16.msra.mxu1 %v745_v38  ;;  %v5536_v38 = vld [vmem:[%s8428_s1 + $0x64] ss:$8 sps:$4 sm:$0xff]   ;;  %v7499_v35 = vld [vmem:[%s8429_s4 + $0x570] sm:$0xff]  }
 0x183   :  { %1518 = vmatprep.subr.bf16.mxu1 %v5995_v32  ;;  %v7483_v33 = vld [vmem:[%s8429_s4 + $0x568] sm:$0xff]   ;;  %v7511_v43 = vld [vmem:[%s8429_s4 + $0x530] sm:$0xff]  }
 0x186   :  { %1519 = vmatpush1.bf16.msra.mxu1 %v746_v6  ;;  %v5594_v6 = vld [vmem:[%s8429_s4 + $0x298] sm:$0xff]  }
 0x187   :  { %1520 = vmatprep.subr.bf16.mxu1 %v5995_v32 }
 0x18a   :  { %1521 = vmatpush1.bf16.msra.mxu1 %v747_v8  ;;  %v5598_v8 = vld [vmem:[%s8429_s4 + $0x40] sm:$0xff]  }
 0x18b   :  { %1522 = vmatprep.subr.bf16.mxu1 %v5995_v32  ;;  %4828 = vmatprep.subr.bf16.mxu0 %v5598_v8  ;;  %v5567_v8 = vld [vmem:[%s8428_s1 + $0xf0] ss:$8 sps:$4 sm:$0xff]  }
 0x18c   :  { %4829 = vmatpush3.bf16.msra.mxu0 %v5599_v3  ;;  %v5568_v3 = vld [vmem:[%s8428_s1 + $0x104] ss:$8 sps:$4 sm:$0xff]  }
 0x18d   :  { %4830 = vmatprep.subr.bf16.mxu0 %v5600_v23  ;;  %v5570_v23 = vld [vmem:[%s8428_s1 + $0x100] ss:$8 sps:$4 sm:$0xff]  }
 0x18e   :  { %1523 = vmatpush1.bf16.msra.mxu1 %v748_v14  ;;  %v5606_v14 = vld [vmem:[%s8429_s4 + $0x2e0] sm:$0xff]  }
 0x18f   :  { %1524 = vmatprep.subr.bf16.mxu1 %v5995_v32 }
 0x190   :  { %4831 = vmatpush3.bf16.msra.mxu0 %v5601_v18  ;;  %v5575_v18 = vld [vmem:[%s8428_s1 + $0x110] ss:$8 sps:$4 sm:$0xff]  }
 0x191   :  { %4832 = vmatprep.subr.bf16.mxu0 %v5602_v19  ;;  %v5576_v19 = vld [vmem:[%s8428_s1 + $0x124] ss:$8 sps:$4 sm:$0xff]  }
 0x192   :  { %1525 = vmatpush1.bf16.msra.mxu1 %v749_v36  ;;  %v5607_v36 = vld [vmem:[%s8429_s4 + $0x2a0] sm:$0xff]  }
 0x193   :  { %1526 = vmatprep.subr.bf16.mxu1 %v5995_v32 }
 0x196   :  { %1527 = vmatpush1.bf16.msra.mxu1 %v750_v10  ;;  %v5603_v10 = vld [vmem:[%s8429_s4 + $0x10] sm:$0xff]  }
 0x197   :  { %1528 = vmatprep.subr.bf16.mxu1 %v5995_v32  ;;  %4833 = vmatpush3.bf16.msra.mxu0 %v5603_v10  ;;  %v5579_v10 = vld [vmem:[%s8428_s1 + $0x134] ss:$8 sps:$4 sm:$0xff]  }
 0x19a   :  { %1529 = vmatpush1.bf16.msra.mxu1 %v751_v29  ;;  %v5604_v29 = vld [vmem:[%s8429_s4 + $0x58] sm:$0xff]  }
 0x19b   :  { %4938 = vmatprep.subr.bf16.mxu1 %v5560_v54  ;;  %v5605_v54 = vld [vmem:[%s8429_s4 + $0x18] sm:$0xff]   ;;  %4834 = vmatprep.subr.bf16.mxu0 %v5604_v29 }
 0x19c   :  { %4835 = vmatpush3.bf16.msra.mxu0 %v5605_v54  ;;  %v5581_v29 = vld [vmem:[%s8428_s1 + $0x130] ss:$8 sps:$4 sm:$0xff]   ;;  %v5584_v54 = vld [vmem:[%s8428_s1 + $0x144] ss:$8 sps:$4 sm:$0xff]  }
 0x19d   :  { %1545 = vmatmul.mubr.bf16.vlgmr.msra.gmra.mrb[0].mxu1 %v5518_v5  ;;  %v5547_v5 = vld [vmem:[%s8428_s1 + $0x90] ss:$8 sps:$4 sm:$0xff]  }
 0x19e   :  { %4550 = vmatprep.mubr.msk.bf16.mxu1 %vm1436_vm4, %v5521_v22  ;;  %4939 = vmatpush3.bf16.msra.mxu1 %v5561_v17  ;;  %v5608_v22 = vld [vmem:[%s8429_s4 + $0x60] sm:$0xff]  }
 0x19f   :  { %4940 = vmatprep.subr.bf16.mxu1 %v5571_v28  ;;  %v5548_v17 = vld [vmem:[%s8428_s1 + $0xa4] ss:$8 sps:$4 sm:$0xff]   ;;  %4836 = vmatprep.subr.bf16.mxu0 %v5608_v22  ;;  %v5654_v22 = vld [vmem:[%s8429_s4 + $0x2b8] sm:$0xff]  }
 0x1a0   :  { %v5609_v28 = vld [vmem:[%s8429_s4 + $0x20] sm:$0xff]  }
 0x1a1   :  { %4837 = vmatpush3.bf16.msra.mxu0 %v5609_v28  ;;  %v5587_v28 = vld [vmem:[%s8428_s1 + $0x154] ss:$8 sps:$4 sm:$0xff]  }
 0x1a2   :  { %4941 = vmatpush3.bf16.msra.mxu1 %v5572_v51  ;;  %v5550_v51 = vld [vmem:[%s8428_s1 + $0xa0] ss:$8 sps:$4 sm:$0xff]  }
 0x1a3   :  { %4942 = vmatprep.subr.bf16.mxu1 %v5582_v62  ;;  %v5613_v62 = vld [vmem:[%s8429_s4 + $0x30] sm:$0xff]  }
 0x1a5   :  { %1553 = vmatmul.mubr.bf16.gmra.mrb[4].mxu1 %v5523_v44  ;;  %v5551_v44 = vld [vmem:[%s8428_s1 + $0xb4] ss:$8 sps:$4 sm:$0xff]  }
 0x1a6   :  { %4551 = vmatprep.mubr.msk.bf16.mxu1 %vm1436_vm4, %v5524_v49  ;;  %4943 = vmatpush3.bf16.msra.mxu1 %v5583_v40  ;;  %v5553_v49 = vld [vmem:[%s8428_s1 + $0xb0] ss:$8 sps:$4 sm:$0xff]   ;;  %v5556_v40 = vld [vmem:[%s8428_s1 + $0xc0] ss:$8 sps:$4 sm:$0xff]  }
 0x1a7   :  { %4944 = vmatprep.subr.bf16.mxu1 %v5593_v4  ;;  %v5620_v4 = vld [vmem:[%s8429_s4 + $0x2e8] sm:$0xff]  }
 0x1aa   :  { %4945 = vmatpush3.bf16.msra.mxu1 %v5594_v6  ;;  %v5621_v6 = vld [vmem:[%s8429_s4 + $0x2a8] sm:$0xff]  }
 0x1ab   :  { %4946 = vmatprep.subr.bf16.mxu1 %v5606_v14  ;;  %v5634_v14 = vld [vmem:[%s8429_s4 + $0x2f0] sm:$0xff]  }
 0x1ad   :  { %1561 = vmatmul.mubr.bf16.gmra.mrb[8].mxu1 %v5526_v56  ;;  %v5554_v56 = vld [vmem:[%s8428_s1 + $0xc4] ss:$8 sps:$4 sm:$0xff]  }
 0x1ae   :  { %4552 = vmatprep.mubr.msk.bf16.mxu1 %vm1436_vm4, %v5527_v57  ;;  %4947 = vmatpush3.bf16.msra.mxu1 %v5607_v36  ;;  %v5610_v57 = vld [vmem:[%s8429_s4 + $0x68] sm:$0xff]  }
 0x1af   :  { %4838 = vmatprep.subr.bf16.mxu0 %v5610_v57  ;;  %4948 = vmatprep.subr.bf16.mxu1 %v5620_v4  ;;  %v5578_v36 = vld [vmem:[%s8428_s1 + $0x120] ss:$8 sps:$4 sm:$0xff]  }
 0x1b0   :  { %v5666_v57 = vld [vmem:[%s8429_s4 + $0x3c0] sm:$0xff]  }
 0x1b2   :  { %4949 = vmatpush3.bf16.msra.mxu1 %v5621_v6 }
 0x1b3   :  { %4950 = vmatprep.subr.bf16.mxu1 %v5634_v14 }
 0x1b5   :  { %1569 = vmatmul.mubr.bf16.gmra.mrb[12].mxu1 %v5529_v58  ;;  %v5611_v58 = vld [vmem:[%s8429_s4 + $0x28] sm:$0xff]  }
 0x1b6   :  { %4553 = vmatprep.mubr.msk.bf16.mxu1 %vm1436_vm4, %v5530_v55  ;;  %v5612_v55 = vld [vmem:[%s8429_s4 + $0x70] sm:$0xff]   ;;  %4839 = vmatpush3.bf16.msra.mxu0 %v5611_v58 }
 0x1b7   :  { %4840 = vmatprep.subr.bf16.mxu0 %v5612_v55  ;;  %v5597_v58 = vld [vmem:[%s8428_s1 + $0x170] ss:$8 sps:$4 sm:$0xff]   ;;  %v5640_v55 = vld [vmem:[%s8428_s1 + $0x184] ss:$8 sps:$4 sm:$0xff]  }
 0x1ba   :  { %4841 = vmatpush3.bf16.msra.mxu0 %v5613_v62  ;;  %v5642_v62 = vld [vmem:[%s8428_s1 + $0x180] ss:$8 sps:$4 sm:$0xff]  }
 0x1bd   :  { %1577 = vmatmul.mubr.bf16.gmra.mrb[16].mxu1 %v5532_v34  ;;  %v5557_v34 = vld [vmem:[%s8428_s1 + $0xd4] ss:$8 sps:$4 sm:$0xff]  }
 0x1be   :  { %4554 = vmatprep.mubr.msk.bf16.mxu1 %vm1436_vm4, %v5533_v46  ;;  %v5614_v46 = vld [vmem:[%s8429_s4 + $0x78] sm:$0xff]  }
 0x1bf   :  { %4842 = vmatprep.subr.bf16.mxu0 %v5614_v46 }
 0x1c5   :  { %1585 = vmatmul.mubr.bf16.gmra.mrb[20].mxu1 %v5535_v59  ;;  %v5615_v59 = vld [vmem:[%s8429_s4 + $0x38] sm:$0xff]  }
 0x1c6   :  { %4555 = vmatprep.mubr.msk.bf16.mxu1 %vm1436_vm4, %v5536_v38  ;;  %4843 = vmatpush3.bf16.msra.mxu0 %v5615_v59  ;;  %v5616_v38 = vld [vmem:[%s8429_s4 + $0xc0] sm:$0xff]  }
 0x1c7   :  { %4850 = vmatprep.subr.bf16.mxu0 %v5616_v38 }
 0x1cd   :  { %1593 = vmatmul.mubr.bf16.gmra.mrb[24].mxu1 %v5538_v42  ;;  %v5559_v42 = vld [vmem:[%s8428_s1 + $0xd0] ss:$8 sps:$4 sm:$0xff]  }
 0x1ce   :  { %4556 = vmatprep.mubr.msk.bf16.mxu1 %vm1436_vm4, %v5539_v61  ;;  %v5562_v61 = vld [vmem:[%s8428_s1 + $0xe4] ss:$8 sps:$4 sm:$0xff]  }
 0x1d5   :  { %1601 = vmatmul.mubr.bf16.gmra.mrb[28].mxu1 %v5541_v7  ;;  %v5564_v7 = vld [vmem:[%s8428_s1 + $0xe0] ss:$8 sps:$4 sm:$0xff]  }
 0x1d6   :  { %4557 = vmatprep.mubr.msk.bf16.mxu1 %vm1436_vm4, %v5542_v12  ;;  %v5565_v12 = vld [vmem:[%s8428_s1 + $0xf4] ss:$8 sps:$4 sm:$0xff]  }
 0x1dd   :  { %1609 = vmatmul.mubr.bf16.gmra.mrb[32].mxu1 %v5544_v2  ;;  %v5573_v2 = vld [vmem:[%s8428_s1 + $0x114] ss:$8 sps:$4 sm:$0xff]  }
 0x1de   :  { %4558 = vmatprep.mubr.msk.bf16.mxu1 %vm1436_vm4, %v5545_v15  ;;  %v5636_v15 = vld [vmem:[%s8429_s4 + $0x2b0] sm:$0xff]  }
 0x1df   :  { %4951 = vmatpush3.bf16.msra.mxu1 %v5636_v15 }
 0x1e5   :  { %1617 = vmatmul.mubr.bf16.gmra.mrb[36].mxu1 %v5547_v5  ;;  %v5652_v5 = vld [vmem:[%s8429_s4 + $0x2f8] sm:$0xff]  }
 0x1e6   :  { %4559 = vmatprep.mubr.msk.bf16.mxu1 %vm1436_vm4, %v5548_v17  ;;  %4952 = vmatprep.subr.bf16.mxu1 %v5652_v5  ;;  %v5586_v17 = vld [vmem:[%s8428_s1 + $0x140] ss:$8 sps:$4 sm:$0xff]  }
 0x1e7   :  { %4953 = vmatpush3.bf16.msra.mxu1 %v5654_v22  ;;  %v5626_v5 = vld [vmem:[%s8429_s4 + $0xe0] sm:$0xff]  }
 0x1e8   :  { %4982 = vmatprep.subr.bf16.mxu1 %v5666_v57 }
 0x1ed   :  { %1625 = vmatmul.mubr.bf16.gmra.mrb[40].mxu1 %v5550_v51  ;;  %v5589_v51 = vld [vmem:[%s8428_s1 + $0x150] ss:$8 sps:$4 sm:$0xff]  }
 0x1ee   :  { %4560 = vmatprep.mubr.msk.bf16.mxu1 %vm1436_vm4, %v5551_v44  ;;  %v5590_v44 = vld [vmem:[%s8428_s1 + $0x164] ss:$8 sps:$4 sm:$0xff]  }
 0x1f5   :  { %1633 = vmatmul.mubr.bf16.gmra.mrb[44].mxu1 %v5553_v49  ;;  %v5592_v49 = vld [vmem:[%s8428_s1 + $0x160] ss:$8 sps:$4 sm:$0xff]  }
 0x1f6   :  { %4561 = vmatprep.mubr.msk.bf16.mxu1 %vm1436_vm4, %v5554_v56  ;;  %v5595_v56 = vld [vmem:[%s8428_s1 + $0x174] ss:$8 sps:$4 sm:$0xff]  }
 0x1fd   :  { %1641 = vmatmul.mubr.bf16.gmra.mrb[48].mxu1 %v5556_v40 }
 0x1fe   :  { %4562 = vmatprep.mubr.msk.bf16.mxu1 %vm1436_vm4, %v5557_v34 }
 0x205   :  { %1649 = vmatmul.mubr.bf16.gmra.mrb[52].mxu1 %v5559_v42 }
 0x206   :  { %4563 = vmatprep.mubr.msk.bf16.mxu1 %vm1436_vm4, %v5562_v61 }
 0x20d   :  { %1657 = vmatmul.mubr.bf16.gmra.mrb[56].mxu1 %v5564_v7 }
 0x20e   :  { %4564 = vmatprep.mubr.msk.bf16.mxu1 %vm1436_vm4, %v5565_v12  ;;  %v5617_v12 = vld [vmem:[%s8429_s4 + $0x80] sm:$0xff]  }
 0x215   :  { %1665 = vmatmul.mubr.bf16.gmra.mrb[60].mxu1 %v5567_v8  ;;  %v5618_v8 = vld [vmem:[%s8429_s4 + $0xc8] sm:$0xff]  }
 0x216   :  { %4565 = vmatprep.mubr.msk.bf16.mxu1 %vm1436_vm4, %v5568_v3  ;;  %v5619_v3 = vld [vmem:[%s8429_s4 + $0x88] sm:$0xff]  }
 0x21d   :  { %1673 = vmatmul.mubr.bf16.gmra.mrb[64].mxu1 %v5570_v23 }
 0x21e   :  { %4566 = vmatprep.mubr.msk.bf16.mxu1 %vm1436_vm4, %v5573_v2  ;;  %v5622_v2 = vld [vmem:[%s8429_s4 + $0xd0] sm:$0xff]  }
 0x225   :  { %1681 = vmatmul.mubr.bf16.gmra.mrb[68].mxu1 %v5575_v18 }
 0x226   :  { %4567 = vmatprep.mubr.msk.bf16.mxu1 %vm1436_vm4, %v5576_v19 }
 0x22d   :  { %1689 = vmatmul.mubr.bf16.gmra.mrb[72].mxu1 %v5578_v36  ;;  %v5623_v36 = vld [vmem:[%s8429_s4 + $0x90] sm:$0xff]  }
 0x22e   :  { %4568 = vmatprep.mubr.msk.bf16.mxu1 %vm1436_vm4, %v5579_v10  ;;  %v5624_v10 = vld [vmem:[%s8429_s4 + $0xd8] sm:$0xff]  }
 0x235   :  { %1697 = vmatmul.mubr.bf16.gmra.mrb[76].mxu1 %v5581_v29  ;;  %v5625_v29 = vld [vmem:[%s8429_s4 + $0x98] sm:$0xff]  }
 0x236   :  { %4569 = vmatprep.mubr.msk.bf16.mxu1 %vm1436_vm4, %v5584_v54 }
 0x23d   :  { %1705 = vmatmul.mubr.bf16.gmra.mrb[80].mxu1 %v5586_v17 }
 0x23e   :  { %4570 = vmatprep.mubr.msk.bf16.mxu1 %vm1436_vm4, %v5587_v28 }
 0x245   :  { %1713 = vmatmul.mubr.bf16.gmra.mrb[84].mxu1 %v5589_v51 }
 0x246   :  { %4571 = vmatprep.mubr.msk.bf16.mxu1 %vm1436_vm4, %v5590_v44  ;;  %v5627_v44 = vld [vmem:[%s8429_s4 + $0xa0] sm:$0xff]  }
 0x24d   :  { %1721 = vmatmul.mubr.bf16.gmra.mrb[88].mxu1 %v5592_v49  ;;  %v5628_v49 = vld [vmem:[%s8429_s4 + $0xe8] sm:$0xff]  }
 0x24e   :  { %4572 = vmatprep.mubr.msk.bf16.mxu1 %vm1436_vm4, %v5595_v56  ;;  %v5629_v56 = vld [vmem:[%s8429_s4 + $0xa8] sm:$0xff]  }
 0x255   :  { %1729 = vmatmul.mubr.bf16.gmra.mrb[92].mxu1 %v5597_v58  ;;  %v5630_v58 = vld [vmem:[%s8429_s4 + $0xf0] sm:$0xff]  }
 0x256   :  { %4573 = vmatprep.mubr.msk.bf16.mxu1 %vm1436_vm4, %v5640_v55 }
 0x25d   :  { %1737 = vmatmul.mubr.bf16.gmra.mrb[96].mxu1 %v5642_v62 }
 0x270   :  { %v1546_v40 = vpop.f32.mrb[0].mxu1 }
 0x271   :  { %v1548_v34 = vpop.f32.mrb[1].mxu1 }
 0x272   :  { %v1549_v46 = vpop.f32.mrb[2].mxu1 }
 0x273   :  { %v1745_v59 = vpack.c.bf16 %v1549_v46, %v1546_v40  ;;  %v1551_v38 = vpop.f32.mrb[3].mxu1  ;;  %v5631_v46 = vld [vmem:[%s8429_s4 + $0xb0] sm:$0xff]  }
 0x274   :  { %v5633_v38 = vld [vmem:[%s8429_s4 + $0xb8] sm:$0xff]  }
 0x278   :  { %v1554_v42 = vpop.f32.mrb[4].mxu1 }
 0x279   :  { %v1556_v61 = vpop.f32.mrb[5].mxu1 }
 0x27a   :  { %v1557_v4 = vpop.f32.mrb[6].mxu1  ;;  %v5635_v61 = vld [vmem:[%s8429_s4 + $0x140] sm:$0xff]  }
 0x27b   :  { %v1746_v6 = vpack.c.bf16 %v1557_v4, %v1554_v42  ;;  %v1559_v7 = vpop.f32.mrb[7].mxu1 }
 0x27d   :  { %3002 = vmatprep.mubr.bf16.mxu0 %v1746_v6 }
 0x27e   :  { %3003 = vmatmul.mubr.bf16.vlgmr.msra.gmra.mrb[36].mxu0 %v1745_v59  ;;  %v5632_v59 = vld [vmem:[%s8429_s4 + $0xf8] sm:$0xff]  }
 0x27f   :  { %4851 = vmatpush3.bf16.msra.mxu0 %v5617_v12 }
 0x280   :  { %v1562_v23 = vpop.f32.mrb[8].mxu1  ;;  %4852 = vmatprep.subr.bf16.mxu0 %v5618_v8  ;;  %v5637_v8 = vld [vmem:[%s8429_s4 + $0x100] sm:$0xff]  }
 0x281   :  { %v1564_v14 = vpop.f32.mrb[9].mxu1 }
 0x282   :  { %v1565_v15 = vpop.f32.mrb[10].mxu1  ;;  %v5643_v14 = vld [vmem:[%s8429_s4 + $0x150] sm:$0xff]  }
 0x283   :  { %v1747_v18 = vpack.c.bf16 %v1565_v15, %v1562_v23  ;;  %4853 = vmatpush3.bf16.msra.mxu0 %v5619_v3  ;;  %v1567_v19 = vpop.f32.mrb[11].mxu1  ;;  %v5638_v3 = vld [vmem:[%s8429_s4 + $0x148] sm:$0xff]  }
 0x284   :  { %4854 = vmatprep.subr.bf16.mxu0 %v5622_v2  ;;  %v5639_v23 = vld [vmem:[%s8429_s4 + $0x108] sm:$0xff]  }
 0x287   :  { %4855 = vmatpush3.bf16.msra.mxu0 %v5623_v36 }
 0x288   :  { %v1570_v54 = vpop.f32.mrb[12].mxu1  ;;  %4856 = vmatprep.subr.bf16.mxu0 %v5624_v10  ;;  %v5644_v10 = vld [vmem:[%s8429_s4 + $0x110] sm:$0xff]  }
 0x289   :  { %v1572_v22 = vpop.f32.mrb[13].mxu1 }
 0x28a   :  { %v1573_v17 = vpop.f32.mrb[14].mxu1  ;;  %v5647_v22 = vld [vmem:[%s8429_s4 + $0x160] sm:$0xff]  }
 0x28b   :  { %v1748_v28 = vpack.c.bf16 %v1573_v17, %v1570_v54  ;;  %4857 = vmatpush3.bf16.msra.mxu0 %v5625_v29  ;;  %v1575_v51 = vpop.f32.mrb[15].mxu1  ;;  %v5645_v29 = vld [vmem:[%s8429_s4 + $0x158] sm:$0xff]  }
 0x28c   :  { %4858 = vmatprep.subr.bf16.mxu0 %v5626_v5  ;;  %v5646_v54 = vld [vmem:[%s8429_s4 + $0x118] sm:$0xff]  }
 0x28d   :  { %3043 = vmatprep.mubr.bf16.mxu0 %v1748_v28 }
 0x28f   :  { %4859 = vmatpush3.bf16.msra.mxu0 %v5627_v44 }
 0x290   :  { %v6803_v57 = vpop.f32.mrb[16].mxu1  ;;  %4860 = vmatprep.subr.bf16.mxu0 %v5628_v49  ;;  %v5648_v49 = vld [vmem:[%s8429_s4 + $0x120] sm:$0xff]  }
 0x291   :  { %v1580_v55 = vpop.f32.mrb[17].mxu1 }
 0x292   :  { %v6808_v62 = vpop.f32.mrb[18].mxu1 }
 0x293   :  { %v1749_v40 = vpack.c.bf16 %v6808_v62, %v6803_v57  ;;  %4861 = vmatpush3.bf16.msra.mxu0 %v5629_v56  ;;  %v1583_v34 = vpop.f32.mrb[19].mxu1  ;;  %v5649_v56 = vld [vmem:[%s8429_s4 + $0x168] sm:$0xff]   ;;  %v5662_v57 = vld [vmem:[%s8429_s4 + $0x190] sm:$0xff]   ;;  %v5663_v62 = vld [vmem:[%s8429_s4 + $0x1d8] sm:$0xff]  }
 0x294   :  { %4862 = vmatprep.subr.bf16.mxu0 %v5630_v58  ;;  %v5650_v58 = vld [vmem:[%s8429_s4 + $0x128] sm:$0xff]   ;;  %v5651_v34 = vld [vmem:[%s8429_s4 + $0x170] sm:$0xff]  }
 0x297   :  { %4863 = vmatpush3.bf16.msra.mxu0 %v5631_v46 }
 0x298   :  { %v1586_v42 = vpop.f32.mrb[20].mxu1  ;;  %4864 = vmatprep.subr.bf16.mxu0 %v5632_v59 }
 0x299   :  { %v1588_v4 = vpop.f32.mrb[21].mxu1 }
 0x29a   :  { %v1589_v6 = vpop.f32.mrb[22].mxu1  ;;  %v5655_v4 = vld [vmem:[%s8429_s4 + $0x178] sm:$0xff]  }
 0x29b   :  { %v1750_v7 = vpack.c.bf16 %v1589_v6, %v1586_v42  ;;  %4865 = vmatpush3.bf16.msra.mxu0 %v5633_v38  ;;  %v1591_v12 = vpop.f32.mrb[23].mxu1  ;;  %v5656_v6 = vld [vmem:[%s8429_s4 + $0x138] sm:$0xff]  }
 0x29c   :  { %4872 = vmatprep.subr.bf16.mxu0 %v5635_v61  ;;  %v5653_v61 = vld [vmem:[%s8429_s4 + $0x130] sm:$0xff]   ;;  %v5657_v12 = vld [vmem:[%s8429_s4 + $0x1c0] sm:$0xff]  }
 0x29e   :  { %3044 = vmatmul.mubr.bf16.vlgmr.msra.gmra.mrb[40].mxu0 %v1747_v18 }
 0x29f   :  { %4873 = vmatpush3.bf16.msra.mxu0 %v5637_v8  ;;  %3084 = vmatprep.mubr.bf16.mxu0 %v1750_v7 }
 0x2a0   :  { %v6833_v2 = vpop.f32.mrb[24].mxu1  ;;  %4874 = vmatprep.subr.bf16.mxu0 %v5638_v3 }
 0x2a1   :  { %v1596_v15 = vpop.f32.mrb[25].mxu1 }
 0x2a2   :  { %v6838_v19 = vpop.f32.mrb[26].mxu1  ;;  %v5658_v15 = vld [vmem:[%s8429_s4 + $0x180] sm:$0xff]  }
 0x2a3   :  { %v1751_v36 = vpack.c.bf16 %v6838_v19, %v6833_v2  ;;  %4875 = vmatpush3.bf16.msra.mxu0 %v5639_v23  ;;  %v1599_v18 = vpop.f32.mrb[27].mxu1  ;;  %v5689_v2 = vld [vmem:[%s8429_s4 + $0x250] sm:$0xff]  }
 0x2a4   :  { %4876 = vmatprep.subr.bf16.mxu0 %v5643_v14  ;;  %v5659_v18 = vld [vmem:[%s8429_s4 + $0x1c8] sm:$0xff]  }
 0x2a7   :  { %4877 = vmatpush3.bf16.msra.mxu0 %v5644_v10  ;;  %v5660_v10 = vld [vmem:[%s8429_s4 + $0x188] sm:$0xff]  }
 0x2a8   :  { %v1602_v5 = vpop.f32.mrb[28].mxu1  ;;  %4878 = vmatprep.subr.bf16.mxu0 %v5645_v29 }
 0x2a9   :  { %v1604_v17 = vpop.f32.mrb[29].mxu1 }
 0x2aa   :  { %v1605_v28 = vpop.f32.mrb[30].mxu1 }
 0x2ab   :  { %v1752_v51 = vpack.c.bf16 %v1605_v28, %v1602_v5  ;;  %4879 = vmatpush3.bf16.msra.mxu0 %v5646_v54  ;;  %v1607_v44 = vpop.f32.mrb[31].mxu1  ;;  %v5661_v54 = vld [vmem:[%s8429_s4 + $0x1d0] sm:$0xff]  }
 0x2ac   :  { %4880 = vmatprep.subr.bf16.mxu0 %v5647_v22  ;;  %v5665_v44 = vld [vmem:[%s8429_s4 + $0x1e0] sm:$0xff]  }
 0x2af   :  { %4881 = vmatpush3.bf16.msra.mxu0 %v5648_v49 }
 0x2b0   :  { %v6863_v55 = vpop.f32.mrb[32].mxu1  ;;  %4882 = vmatprep.subr.bf16.mxu0 %v5649_v56 }
 0x2b1   :  { %v1612_v46 = vpop.f32.mrb[33].mxu1 }
 0x2b2   :  { %v6868_v59 = vpop.f32.mrb[34].mxu1  ;;  %v5667_v46 = vld [vmem:[%s8429_s4 + $0x1a0] sm:$0xff]  }
 0x2b3   :  { %v1753_v38 = vpack.c.bf16 %v6868_v59, %v6863_v55  ;;  %4883 = vmatpush3.bf16.msra.mxu0 %v5650_v58  ;;  %v1615_v42 = vpop.f32.mrb[35].mxu1  ;;  %v5720_v55 = vld [vmem:[%s8429_s4 + $0x4a8] sm:$0xff]   ;;  %v7129_v59 = vld [vmem:[%s8429_s4 + $0x350] sm:$0xff]  }
 0x2b4   :  { %4884 = vmatprep.subr.bf16.mxu0 %v5651_v34  ;;  %v5668_v42 = vld [vmem:[%s8429_s4 + $0x380] sm:$0xff]  }
 0x2b7   :  { %4885 = vmatpush3.bf16.msra.mxu0 %v5653_v61  ;;  %v5669_v61 = vld [vmem:[%s8429_s4 + $0x1e8] sm:$0xff]  }
 0x2b8   :  { %v6881_v7 = vpop.f32.mrb[36].mxu1  ;;  %4886 = vmatprep.subr.bf16.mxu0 %v5655_v4  ;;  %v5670_v4 = vld [vmem:[%s8429_s4 + $0x3c8] sm:$0xff]  }
 0x2b9   :  { %v1620_v8 = vpop.f32.mrb[37].mxu1 }
 0x2ba   :  { %v6886_v3 = vpop.f32.mrb[38].mxu1 }
 0x2bb   :  { %v1754_v23 = vpack.c.bf16 %v6886_v3, %v6881_v7  ;;  %4887 = vmatpush3.bf16.msra.mxu0 %v5656_v6  ;;  %v1623_v14 = vpop.f32.mrb[39].mxu1  ;;  %v5671_v6 = vld [vmem:[%s8429_s4 + $0x1a8] sm:$0xff]  }
 0x2bc   :  { %4894 = vmatprep.subr.bf16.mxu0 %v5657_v12  ;;  %v5672_v12 = vld [vmem:[%s8429_s4 + $0x388] sm:$0xff]   ;;  %v5673_v14 = vld [vmem:[%s8429_s4 + $0x1f0] sm:$0xff]  }
 0x2be   :  { %3085 = vmatmul.mubr.bf16.vlgmr.msra.gmra.mrb[44].mxu0 %v1749_v40  ;;  %v5664_v40 = vld [vmem:[%s8429_s4 + $0x198] sm:$0xff]  }
 0x2bf   :  { %4895 = vmatpush3.bf16.msra.mxu0 %v5658_v15  ;;  %3125 = vmatprep.mubr.bf16.mxu0 %v1752_v51  ;;  %v5674_v15 = vld [vmem:[%s8429_s4 + $0x3d0] sm:$0xff]  }
 0x2c0   :  { %v1626_v29 = vpop.f32.mrb[40].mxu1  ;;  %4896 = vmatprep.subr.bf16.mxu0 %v5659_v18 }
 0x2c1   :  { %v1628_v5 = vpop.f32.mrb[41].mxu1 }
 0x2c2   :  { %v1629_v22 = vpop.f32.mrb[42].mxu1  ;;  %v5675_v5 = vld [vmem:[%s8429_s4 + $0x1b0] sm:$0xff]  }
 0x2c3   :  { %v1755_v17 = vpack.c.bf16 %v1629_v22, %v1626_v29  ;;  %4897 = vmatpush3.bf16.msra.mxu0 %v5660_v10  ;;  %v1631_v28 = vpop.f32.mrb[43].mxu1  ;;  %v5676_v22 = vld [vmem:[%s8429_s4 + $0x390] sm:$0xff]  }
 0x2c4   :  { %4898 = vmatprep.subr.bf16.mxu0 %v5661_v54  ;;  %v5678_v28 = vld [vmem:[%s8429_s4 + $0x3d8] sm:$0xff]  }
 0x2c7   :  { %4899 = vmatpush3.bf16.msra.mxu0 %v5662_v57  ;;  %v5679_v57 = vld [vmem:[%s8429_s4 + $0x1b8] sm:$0xff]  }
 0x2c8   :  { %v1634_v51 = vpop.f32.mrb[44].mxu1  ;;  %4900 = vmatprep.subr.bf16.mxu0 %v5663_v62  ;;  %v5680_v62 = vld [vmem:[%s8429_s4 + $0x398] sm:$0xff]  }
 0x2c9   :  { %v1636_v49 = vpop.f32.mrb[45].mxu1 }
 0x2ca   :  { %v1637_v56 = vpop.f32.mrb[46].mxu1 }
 0x2cb   :  { %v1756_v58 = vpack.c.bf16 %v1637_v56, %v1634_v51  ;;  %4901 = vmatpush3.bf16.msra.mxu0 %v5664_v40  ;;  %v1639_v34 = vpop.f32.mrb[47].mxu1  ;;  %v5681_v51 = vld [vmem:[%s8429_s4 + $0x240] sm:$0xff]  }
 0x2cc   :  { %4902 = vmatprep.subr.bf16.mxu0 %v5665_v44  ;;  %v5682_v44 = vld [vmem:[%s8429_s4 + $0x3e0] sm:$0xff]  }
 0x2cd   :  { %3207 = vmatprep.mubr.bf16.mxu1 %v1756_v58 }
 0x2ce   :  { %3208 = vmatmul.mubr.bf16.vlgmr.msra.gmra.mrb[100].mxu1 %v1755_v17  ;;  %v5677_v17 = vld [vmem:[%s8429_s4 + $0x1f8] sm:$0xff]  }
 0x2cf   :  { %4903 = vmatpush3.bf16.msra.mxu0 %v5667_v46  ;;  %4983 = vmatpush3.bf16.msra.mxu1 %v5668_v42  ;;  %v5683_v46 = vld [vmem:[%s8429_s4 + $0x200] sm:$0xff]  }
 0x2d0   :  { %v6935_v8 = vpop.f32.mrb[48].mxu1  ;;  %4904 = vmatprep.subr.bf16.mxu0 %v5669_v61  ;;  %4984 = vmatprep.subr.bf16.mxu1 %v5670_v4  ;;  %v5684_v42 = vld [vmem:[%s8429_s4 + $0x3a0] sm:$0xff]   ;;  %v5685_v61 = vld [vmem:[%s8429_s4 + $0x248] sm:$0xff]  }
 0x2d1   :  { %v1644_v18 = vpop.f32.mrb[49].mxu1  ;;  %v5686_v4 = vld [vmem:[%s8429_s4 + $0x3e8] sm:$0xff]  }
 0x2d2   :  { %v6943_v10 = vpop.f32.mrb[50].mxu1  ;;  %v5692_v18 = vld [vmem:[%s8429_s4 + $0x3b0] sm:$0xff]  }
 0x2d3   :  { %v1757_v29 = vpack.c.bf16 %v6943_v10, %v6935_v8  ;;  %4905 = vmatpush3.bf16.msra.mxu0 %v5671_v6  ;;  %4985 = vmatpush3.bf16.msra.mxu1 %v5672_v12  ;;  %v1647_v54 = vpop.f32.mrb[51].mxu1  ;;  %v5687_v6 = vld [vmem:[%s8429_s4 + $0x208] sm:$0xff]   ;;  %v7291_v10 = vld [vmem:[%s8429_s4 + $0x450] sm:$0xff]  }
 0x2d4   :  { %4906 = vmatprep.subr.bf16.mxu0 %v5673_v14  ;;  %4986 = vmatprep.subr.bf16.mxu1 %v5674_v15  ;;  %v5688_v14 = vld [vmem:[%s8429_s4 + $0x3a8] sm:$0xff]   ;;  %v5691_v15 = vld [vmem:[%s8429_s4 + $0x210] sm:$0xff]   ;;  %v5693_v54 = vld [vmem:[%s8429_s4 + $0x258] sm:$0xff]  }
 0x2d5   :  { %v5752_v8 = vld [vmem:[%s8429_s4 + $0x5a8] sm:$0xff]  }
 0x2d7   :  { %4907 = vmatpush3.bf16.msra.mxu0 %v5675_v5  ;;  %4987 = vmatpush3.bf16.msra.mxu1 %v5676_v22  ;;  %v5694_v5 = vld [vmem:[%s8429_s4 + $0x3f8] sm:$0xff]  }
 0x2d8   :  { %v6965_v40 = vpop.f32.mrb[52].mxu1  ;;  %4908 = vmatprep.subr.bf16.mxu0 %v5677_v17  ;;  %4988 = vmatprep.subr.bf16.mxu1 %v5678_v28  ;;  %v5695_v22 = vld [vmem:[%s8429_s4 + $0x218] sm:$0xff]  }
 0x2d9   :  { %v1652_v49 = vpop.f32.mrb[53].mxu1  ;;  %v5696_v28 = vld [vmem:[%s8429_s4 + $0x3b8] sm:$0xff]  }
 0x2da   :  { %v6973_v56 = vpop.f32.mrb[54].mxu1 }
 0x2db   :  { %v1758_v58 = vpack.c.bf16 %v6973_v56, %v6965_v40  ;;  %4909 = vmatpush3.bf16.msra.mxu0 %v5679_v57  ;;  %4989 = vmatpush3.bf16.msra.mxu1 %v5680_v62  ;;  %v1655_v34 = vpop.f32.mrb[55].mxu1  ;;  %v5697_v57 = vld [vmem:[%s8429_s4 + $0x260] sm:$0xff]   ;;  %v5722_v40 = vld [vmem:[%s8429_s4 + $0x4f0] sm:$0xff]  }
 0x2dc   :  { %4916 = vmatprep.subr.bf16.mxu0 %v5681_v51  ;;  %4990 = vmatprep.subr.bf16.mxu1 %v5682_v44  ;;  %v5698_v51 = vld [vmem:[%s8429_s4 + $0x4c0] sm:$0xff]  }
 0x2de   :  { %3126 = vmatmul.mubr.bf16.vlgmr.msra.gmra.mrb[48].mxu0 %v1751_v36  ;;  %v5690_v36 = vld [vmem:[%s8429_s4 + $0x3f0] sm:$0xff]  }
 0x2df   :  { %4917 = vmatpush3.bf16.msra.mxu0 %v5683_v46  ;;  %3166 = vmatprep.mubr.bf16.mxu0 %v1754_v23  ;;  %v5699_v46 = vld [vmem:[%s8429_s4 + $0x220] sm:$0xff]  }
 0x2e0   :  { %4991 = vmatpush3.bf16.msra.mxu1 %v5684_v42  ;;  %v1658_v12 = vpop.f32.mrb[56].mxu1  ;;  %4918 = vmatprep.subr.bf16.mxu0 %v5685_v61  ;;  %v5700_v42 = vld [vmem:[%s8429_s4 + $0x480] sm:$0xff]   ;;  %v5701_v61 = vld [vmem:[%s8429_s4 + $0x268] sm:$0xff]  }
 0x2e1   :  { %v1660_v19 = vpop.f32.mrb[57].mxu1  ;;  %4992 = vmatprep.subr.bf16.mxu1 %v5686_v4  ;;  %v5702_v4 = vld [vmem:[%s8429_s4 + $0x4c8] sm:$0xff]  }
 0x2e2   :  { %v1661_v7 = vpop.f32.mrb[58].mxu1 }
 0x2e3   :  { %v1759_v3 = vpack.c.bf16 %v1661_v7, %v1658_v12  ;;  %4919 = vmatpush3.bf16.msra.mxu0 %v5687_v6  ;;  %v1663_v23 = vpop.f32.mrb[59].mxu1  ;;  %v5703_v6 = vld [vmem:[%s8429_s4 + $0x228] sm:$0xff]  }
 0x2e4   :  { %4993 = vmatpush3.bf16.msra.mxu1 %v5688_v14  ;;  %4920 = vmatprep.subr.bf16.mxu0 %v5689_v2  ;;  %v5704_v14 = vld [vmem:[%s8429_s4 + $0x488] sm:$0xff]   ;;  %v5705_v2 = vld [vmem:[%s8429_s4 + $0x270] sm:$0xff]  }
 0x2e5   :  { %4994 = vmatprep.subr.bf16.mxu1 %v5690_v36  ;;  %v5706_v36 = vld [vmem:[%s8429_s4 + $0x4d0] sm:$0xff]  }
 0x2e7   :  { %4921 = vmatpush3.bf16.msra.mxu0 %v5691_v15  ;;  %v5707_v15 = vld [vmem:[%s8429_s4 + $0x230] sm:$0xff]  }
 0x2e8   :  { %4995 = vmatpush3.bf16.msra.mxu1 %v5692_v18  ;;  %v1666_v17 = vpop.f32.mrb[60].mxu1  ;;  %4922 = vmatprep.subr.bf16.mxu0 %v5693_v54  ;;  %v5708_v18 = vld [vmem:[%s8429_s4 + $0x490] sm:$0xff]   ;;  %v5709_v54 = vld [vmem:[%s8429_s4 + $0x278] sm:$0xff]  }
 0x2e9   :  { %v1668_v62 = vpop.f32.mrb[61].mxu1  ;;  %4996 = vmatprep.subr.bf16.mxu1 %v5694_v5  ;;  %v5710_v5 = vld [vmem:[%s8429_s4 + $0x4d8] sm:$0xff]  }
 0x2ea   :  { %v1669_v44 = vpop.f32.mrb[62].mxu1 }
 0x2eb   :  { %v1760_v49 = vpack.c.bf16 %v1669_v44, %v1666_v17  ;;  %4923 = vmatpush3.bf16.msra.mxu0 %v5695_v22  ;;  %v1671_v34 = vpop.f32.mrb[63].mxu1  ;;  %v5711_v22 = vld [vmem:[%s8429_s4 + $0x238] sm:$0xff]  }
 0x2ec   :  { %4997 = vmatpush3.bf16.msra.mxu1 %v5696_v28  ;;  %4924 = vmatprep.subr.bf16.mxu0 %v5697_v57  ;;  %v5712_v28 = vld [vmem:[%s8429_s4 + $0x498] sm:$0xff]   ;;  %v7084_v57 = vld [vmem:[%s8429_s4 + $0x340] sm:$0xff]  }
 0x2ed   :  { %3289 = vmatprep.mubr.bf16.mxu1 %v1760_v49  ;;  %5026 = vmatprep.subr.bf16.mxu1 %v5698_v51  ;;  %v5714_v51 = vld [vmem:[%s8429_s4 + $0x4e0] sm:$0xff]  }
 0x2ef   :  { %4925 = vmatpush3.bf16.msra.mxu0 %v5699_v46  ;;  %3290 = vmatmul.mubr.bf16.vlgmr.msra.gmra.mrb[104].mxu1 %v1759_v3  ;;  %v7096_v46 = vld [vmem:[%s8429_s4 + $0x300] sm:$0xff]  }
 0x2f0   :  { %5027 = vmatpush3.bf16.msra.mxu1 %v5700_v42  ;;  %v7046_v12 = vpop.f32.mrb[64].mxu1  ;;  %4926 = vmatprep.subr.bf16.mxu0 %v5701_v61  ;;  %v5716_v42 = vld [vmem:[%s8429_s4 + $0x4a0] sm:$0xff]   ;;  %v7105_v61 = vld [vmem:[%s8429_s4 + $0x348] sm:$0xff]  }
 0x2f1   :  { %v1676_v19 = vpop.f32.mrb[65].mxu1  ;;  %5028 = vmatprep.subr.bf16.mxu1 %v5702_v4  ;;  %v5718_v4 = vld [vmem:[%s8429_s4 + $0x4e8] sm:$0xff]  }
 0x2f2   :  { %v7057_v7 = vpop.f32.mrb[66].mxu1  ;;  %v7138_v19 = vld [vmem:[%s8429_s4 + $0x310] sm:$0xff]  }
 0x2f3   :  { %4927 = vmatpush3.bf16.msra.mxu0 %v5703_v6  ;;  %v1679_v23 = vpop.f32.mrb[67].mxu1  ;;  %v7120_v6 = vld [vmem:[%s8429_s4 + $0x308] sm:$0xff]  }
 0x2f4   :  { %5029 = vmatpush3.bf16.msra.mxu1 %v5704_v14  ;;  %4928 = vmatprep.subr.bf16.mxu0 %v5705_v2  ;;  %v7147_v23 = vld [vmem:[%s8429_s4 + $0x358] sm:$0xff]  }
 0x2f5   :  { %5030 = vmatprep.subr.bf16.mxu1 %v5706_v36  ;;  %v5724_v36 = vld [vmem:[%s8429_s4 + $0x4b0] sm:$0xff]  }
 0x2f7   :  { %4929 = vmatpush3.bf16.msra.mxu0 %v5707_v15  ;;  %v5726_v15 = vld [vmem:[%s8429_s4 + $0x4f8] sm:$0xff]  }
 0x2f8   :  { %5031 = vmatpush3.bf16.msra.mxu1 %v5708_v18  ;;  %v7076_v17 = vpop.f32.mrb[68].mxu1  ;;  %4930 = vmatprep.subr.bf16.mxu0 %v5709_v54  ;;  %v7156_v18 = vld [vmem:[%s8429_s4 + $0x318] sm:$0xff]  }
 0x2f9   :  { %v1684_v62 = vpop.f32.mrb[69].mxu1  ;;  %5032 = vmatprep.subr.bf16.mxu1 %v5710_v5  ;;  %v5728_v5 = vld [vmem:[%s8429_s4 + $0x4b8] sm:$0xff]  }
 0x2fa   :  { %v7089_v44 = vpop.f32.mrb[70].mxu1  ;;  %v5730_v62 = vld [vmem:[%s8429_s4 + $0x5c0] sm:$0xff]  }
 0x2fb   :  { %v1762_v49 = vpack.c.bf16 %v7089_v44, %v7076_v17  ;;  %4931 = vmatpush3.bf16.msra.mxu0 %v5711_v22  ;;  %v1687_v34 = vpop.f32.mrb[71].mxu1  ;;  %v7165_v22 = vld [vmem:[%s8429_s4 + $0x360] sm:$0xff]   ;;  %v5754_v17 = vld [vmem:[%s8429_s4 + $0x5f0] sm:$0xff]  }
 0x2fc   :  { %5033 = vmatpush3.bf16.msra.mxu1 %v5712_v28  ;;  %4960 = vmatprep.subr.bf16.mxu0 %v7084_v57 }
 0x2fd   :  { %5034 = vmatprep.subr.bf16.mxu1 %v5714_v51 }
 0x2fe   :  { %3167 = vmatmul.mubr.bf16.vlgmr.msra.gmra.mrb[52].mxu0 %v1753_v38 }
 0x2ff   :  { %4961 = vmatpush3.bf16.msra.mxu0 %v7096_v46  ;;  %3248 = vmatprep.mubr.bf16.mxu0 %v1758_v58 }
 0x300   :  { %5035 = vmatpush3.bf16.msra.mxu1 %v5716_v42  ;;  %v1690_v14 = vpop.f32.mrb[72].mxu1  ;;  %4962 = vmatprep.subr.bf16.mxu0 %v7105_v61 }
 0x301   :  { %v1692_v38 = vpop.f32.mrb[73].mxu1  ;;  %5036 = vmatprep.subr.bf16.mxu1 %v5718_v4  ;;  %v7174_v4 = vld [vmem:[%s8429_s4 + $0x320] sm:$0xff]  }
 0x302   :  { %v1693_v56 = vpop.f32.mrb[74].mxu1  ;;  %v5734_v38 = vld [vmem:[%s8429_s4 + $0x5c8] sm:$0xff]  }
 0x303   :  { %v1763_v58 = vpack.c.bf16 %v1693_v56, %v1690_v14  ;;  %4963 = vmatpush3.bf16.msra.mxu0 %v7120_v6  ;;  %v1695_v2 = vpop.f32.mrb[75].mxu1  ;;  %v5732_v14 = vld [vmem:[%s8429_s4 + $0x580] sm:$0xff]  }
 0x304   :  { %5037 = vmatpush3.bf16.msra.mxu1 %v5720_v55  ;;  %4964 = vmatprep.subr.bf16.mxu0 %v7129_v59  ;;  %v7183_v55 = vld [vmem:[%s8429_s4 + $0x368] sm:$0xff]  }
 0x305   :  { %5038 = vmatprep.subr.bf16.mxu1 %v5722_v40  ;;  %v7192_v40 = vld [vmem:[%s8429_s4 + $0x328] sm:$0xff]  }
 0x306   :  { %v5736_v2 = vld [vmem:[%s8429_s4 + $0x588] sm:$0xff]  }
 0x307   :  { %4965 = vmatpush3.bf16.msra.mxu0 %v7138_v19 }
 0x308   :  { %5039 = vmatpush3.bf16.msra.mxu1 %v5724_v36  ;;  %v1698_v54 = vpop.f32.mrb[76].mxu1  ;;  %4966 = vmatprep.subr.bf16.mxu0 %v7147_v23  ;;  %v7203_v36 = vld [vmem:[%s8429_s4 + $0x370] sm:$0xff]  }
 0x309   :  { %v1700_v28 = vpop.f32.mrb[77].mxu1  ;;  %5040 = vmatprep.subr.bf16.mxu1 %v5726_v15  ;;  %v5738_v15 = vld [vmem:[%s8429_s4 + $0x5d0] sm:$0xff]  }
 0x30a   :  { %v1701_v51 = vpop.f32.mrb[78].mxu1 }
 0x30b   :  { %v1764_v34 = vpack.c.bf16 %v1701_v51, %v1698_v54  ;;  %4967 = vmatpush3.bf16.msra.mxu0 %v7156_v18  ;;  %v1703_v42 = vpop.f32.mrb[79].mxu1  ;;  %v5740_v51 = vld [vmem:[%s8429_s4 + $0x590] sm:$0xff]  }
 0x30c   :  { %5041 = vmatpush3.bf16.msra.mxu1 %v5728_v5  ;;  %4968 = vmatprep.subr.bf16.mxu0 %v7165_v22  ;;  %v5742_v42 = vld [vmem:[%s8429_s4 + $0x5d8] sm:$0xff]  }
 0x30d   :  { %3371 = vmatprep.mubr.bf16.mxu1 %v1764_v34  ;;  %5070 = vmatprep.subr.bf16.mxu1 %v5730_v62  ;;  %v7216_v62 = vld [vmem:[%s8429_s4 + $0x330] sm:$0xff]   ;;  %v7225_v34 = vld [vmem:[%s8429_s4 + $0x378] sm:$0xff]  }
 0x30f   :  { %4969 = vmatpush3.bf16.msra.mxu0 %v7174_v4  ;;  %3372 = vmatmul.mubr.bf16.vlgmr.msra.gmra.mrb[108].mxu1 %v1763_v58 }
 0x310   :  { %5071 = vmatpush3.bf16.msra.mxu1 %v5732_v14  ;;  %v7194_v56 = vpop.f32.mrb[80].mxu1  ;;  %4970 = vmatprep.subr.bf16.mxu0 %v7183_v55  ;;  %v7234_v14 = vld [vmem:[%s8429_s4 + $0x338] sm:$0xff]  }
 0x311   :  { %v1708_v58 = vpop.f32.mrb[81].mxu1  ;;  %5072 = vmatprep.subr.bf16.mxu1 %v5734_v38 }
 0x312   :  { %v7208_v54 = vpop.f32.mrb[82].mxu1  ;;  %v7245_v58 = vld [vmem:[%s8429_s4 + $0x440] sm:$0xff]  }
 0x313   :  { %4971 = vmatpush3.bf16.msra.mxu0 %v7192_v40  ;;  %v1711_v28 = vpop.f32.mrb[83].mxu1 }
 0x314   :  { %5073 = vmatpush3.bf16.msra.mxu1 %v5736_v2  ;;  %4972 = vmatprep.subr.bf16.mxu0 %v7203_v36  ;;  %v5744_v2 = vld [vmem:[%s8429_s4 + $0x598] sm:$0xff]   ;;  %v5746_v28 = vld [vmem:[%s8429_s4 + $0x5e0] sm:$0xff]  }
 0x315   :  { %5074 = vmatprep.subr.bf16.mxu1 %v5738_v15 }
 0x317   :  { %4973 = vmatpush3.bf16.msra.mxu0 %v7216_v62 }
 0x318   :  { %5075 = vmatpush3.bf16.msra.mxu1 %v5740_v51  ;;  %v7236_v38 = vpop.f32.mrb[84].mxu1  ;;  %4974 = vmatprep.subr.bf16.mxu0 %v7225_v34 }
 0x319   :  { %v1716_v15 = vpop.f32.mrb[85].mxu1  ;;  %5076 = vmatprep.subr.bf16.mxu1 %v5742_v42  ;;  %v5748_v42 = vld [vmem:[%s8429_s4 + $0x5a0] sm:$0xff]  }
 0x31a   :  { %v7250_v51 = vpop.f32.mrb[86].mxu1  ;;  %v7267_v15 = vld [vmem:[%s8429_s4 + $0x448] sm:$0xff]  }
 0x31b   :  { %4975 = vmatpush3.bf16.msra.mxu0 %v7234_v14  ;;  %v1719_v39 = vpop.f32.mrb[87].mxu1 }
 0x31c   :  { %5077 = vmatpush3.bf16.msra.mxu1 %v5744_v2  ;;  %5004 = vmatprep.subr.bf16.mxu0 %v7245_v58  ;;  %v5750_v39 = vld [vmem:[%s8429_s4 + $0x5e8] sm:$0xff]  }
 0x31d   :  { %5078 = vmatprep.subr.bf16.mxu1 %v5746_v28  ;;  %v7282_v2 = vld [vmem:[%s8429_s4 + $0x408] sm:$0xff]  }
 0x31e   :  { %3249 = vmatmul.mubr.bf16.vlgmr.msra.gmra.mrb[56].mxu0 %v1757_v29 }
 0x31f   :  { %5005 = vmatpush3.bf16.msra.mxu0 %v7258_v50  ;;  %3330 = vmatprep.mubr.bf16.mxu0 %v1762_v49 }
 0x320   :  { %5079 = vmatpush3.bf16.msra.mxu1 %v5748_v42  ;;  %v1722_v28 = vpop.f32.mrb[88].mxu1  ;;  %5006 = vmatprep.subr.bf16.mxu0 %v7267_v15 }
 0x321   :  { %v1724_v29 = vpop.f32.mrb[89].mxu1  ;;  %5080 = vmatprep.subr.bf16.mxu1 %v5750_v39  ;;  %v5756_v39 = vld [vmem:[%s8429_s4 + $0x5b0] sm:$0xff]  }
 0x322   :  { %v1725_v44 = vpop.f32.mrb[90].mxu1  ;;  %v7309_v29 = vld [vmem:[%s8429_s4 + $0x458] sm:$0xff]  }
 0x323   :  { %v1767_v49 = vpack.c.bf16 %v1725_v44, %v1722_v28  ;;  %5007 = vmatpush3.bf16.msra.mxu0 %v7282_v2  ;;  %v1727_v42 = vpop.f32.mrb[91].mxu1  ;;  %v5758_v28 = vld [vmem:[%s8429_s4 + $0x5f8] sm:$0xff]  }
 0x324   :  { %5081 = vmatpush3.bf16.msra.mxu1 %v5752_v8  ;;  %5008 = vmatprep.subr.bf16.mxu0 %v7291_v10  ;;  %v7318_v8 = vld [vmem:[%s8429_s4 + $0x418] sm:$0xff]  }
 0x325   :  { %5082 = vmatprep.subr.bf16.mxu1 %v5754_v17  ;;  %v5760_v42 = vld [vmem:[%s8429_s4 + $0x5b8] sm:$0xff]   ;;  %v7327_v17 = vld [vmem:[%s8429_s4 + $0x460] sm:$0xff]  }
 0x327   :  { %5009 = vmatpush3.bf16.msra.mxu0 %v7300_v25 }
 0x328   :  { %5083 = vmatpush3.bf16.msra.mxu1 %v5756_v39  ;;  %v1730_v44 = vpop.f32.mrb[92].mxu1  ;;  %5010 = vmatprep.subr.bf16.mxu0 %v7309_v29  ;;  %v7333_v39 = vld [vmem:[%s8429_s4 + $0x420] sm:$0xff]  }
 0x329   :  { %v1732_v21 = vpop.f32.mrb[93].mxu1  ;;  %5084 = vmatprep.subr.bf16.mxu1 %v5758_v28 }
 0x32a   :  { %v1733_v16 = vpop.f32.mrb[94].mxu1  ;;  %v7355_v21 = vld [vmem:[%s8429_s4 + $0x470] sm:$0xff]  }
 0x32b   :  { %v1768_v5 = vpack.c.bf16 %v1733_v16, %v1730_v44  ;;  %5011 = vmatpush3.bf16.msra.mxu0 %v7318_v8  ;;  %v1735_v3 = vpop.f32.mrb[95].mxu1  ;;  %v7346_v16 = vld [vmem:[%s8429_s4 + $0x428] sm:$0xff]   ;;  %v7381_v44 = vld [vmem:[%s8429_s4 + $0x478] sm:$0xff]  }
 0x32c   :  { %5085 = vmatpush3.bf16.msra.mxu1 %v5760_v42  ;;  %5012 = vmatprep.subr.bf16.mxu0 %v7327_v17  ;;  %v7388_v42 = vld [vmem:[%s8429_s4 + $0x438] sm:$0xff]  }
 0x32d   :  { %3453 = vmatprep.mubr.bf16.mxu1 %v1768_v5  ;;  %3503 = vmatprep.subr.bf16.mxu1 %v5995_v32  ;;  %v5801_v5 = vld [vmem:[%s8428_s1 + $0x4] ss:$8 sps:$4 sm:$0xff]  }
 0x32f   :  { %5013 = vmatpush3.bf16.msra.mxu0 %v7333_v39  ;;  %3454 = vmatmul.mubr.bf16.vlgmr.msra.gmra.mrb[112].mxu1 %v1767_v49 }
 0x330   :  { %3504 = vmatpush1.bf16.msra.mxu1 %v752_v41  ;;  %5014 = vmatprep.subr.bf16.mxu0 %v7339_v13  ;;  %v7357_v3 = vpop.f32.mrb[96].mxu1 }
 0x331   :  { %3505 = vmatprep.subr.bf16.mxu1 %v5995_v32  ;;  %4774 = vmatprep.mubr.msk.bf16.mxu1 %vm1436_vm4, %v5801_v5  ;;  %v1740_v49 = vpop.f32.mrb[97].mxu1  ;;  %v7490_v5 = vld [vmem:[%s8429_s4 + $0x528] sm:$0xff]  }
 0x332   :  { %v7364_v1 = vpop.f32.mrb[98].mxu1 }
 0x333   :  { %5015 = vmatpush3.bf16.msra.mxu0 %v7346_v16  ;;  %v1769_v41 = vpack.c.bf16 %v7364_v1, %v7357_v3  ;;  %v1743_v28 = vpop.f32.mrb[99].mxu1  ;;  %v5818_v3 = vld [vmem:[%s8429_s4 + $0x8] sm:$0xff]   ;;  %v5819_v1 = vld [vmem:[%s8428_s1 + $0x74] ss:$8 sps:$4 sm:$0xff]  }
 0x334   :  { %3506 = vmatpush1.bf16.msra.mxu1 %v753_v48  ;;  %5016 = vmatprep.subr.bf16.mxu0 %v7355_v21  ;;  %v8444_v48 = vpack.c.bf16 %v7057_v7, %v7046_v12  ;;  %v7435_v12 = vld [vmem:[%s8429_s4 + $0x550] sm:$0xff]   ;;  %v5802_v28 = vld [vmem:[%s8428_s1] ss:$8 sps:$4 sm:$0xff]  }
 0x335   :  { %3507 = vmatprep.subr.bf16.mxu1 %v5995_v32  ;;  %v7442_v7 = vld [vmem:[%s8429_s4 + $0x510] sm:$0xff]  }
 0x337   :  { %5017 = vmatpush3.bf16.msra.mxu0 %v7370_v0 }
 0x338   :  { %3508 = vmatpush1.bf16.msra.mxu1 %v754_v63  ;;  %5018 = vmatprep.subr.bf16.mxu0 %v7381_v44  ;;  %v8445_v63 = vpack.c.bf16 %v7250_v51, %v7236_v38  ;;  %v7458_v38 = vld [vmem:[%s8429_s4 + $0x518] sm:$0xff]   ;;  %v7474_v51 = vld [vmem:[%s8429_s4 + $0x520] sm:$0xff]  }
 0x339   :  { %3509 = vmatprep.subr.bf16.mxu1 %v5995_v32 }
 0x33b   :  { %5019 = vmatpush3.bf16.msra.mxu0 %v7388_v42 }
 0x33c   :  { %3510 = vmatpush1.bf16.msra.mxu1 %v8443_v52  ;;  %5048 = vmatprep.subr.bf16.mxu0 %v7397_v11 }
 0x33d   :  { %3511 = vmatprep.subr.bf16.mxu1 %v5995_v32 }
 0x33e   :  { %3331 = vmatmul.mubr.bf16.vlgmr.msra.gmra.mrb[60].mxu0 %v8444_v48 }
 0x33f   :  { %5049 = vmatpush3.bf16.msra.mxu0 %v7404_v31  ;;  %3412 = vmatprep.mubr.bf16.mxu0 %v8445_v63  ;;  %v7521_v63 = vld [vmem:[%s8429_s4 + $0x578] sm:$0xff]  }
 0x340   :  { %3512 = vmatpush1.bf16.msra.mxu1 %v8446_v20  ;;  %5050 = vmatprep.subr.bf16.mxu0 %v7413_v53 }
 0x341   :  { %3513 = vmatprep.subr.bf16.mxu1 %v5995_v32 }
 0x343   :  { %5051 = vmatpush3.bf16.msra.mxu0 %v7426_v60 }
 0x344   :  { %3514 = vmatpush1.bf16.msra.mxu1 %v8447_v26  ;;  %5052 = vmatprep.subr.bf16.mxu0 %v7435_v12  ;;  %v7531_v26 = vld [vmem:[%s8429_s4 + $0x538] sm:$0xff]  }
 0x345   :  { %3515 = vmatprep.subr.bf16.mxu1 %v5995_v32 }
 0x347   :  { %5053 = vmatpush3.bf16.msra.mxu0 %v7442_v7 }
 0x348   :  { %3516 = vmatpush1.bf16.msra.mxu1 %v8448_v24  ;;  %5054 = vmatprep.subr.bf16.mxu0 %v7451_v45  ;;  %v5804_v24 = vld [vmem:[%s8428_s1 + $0x10] ss:$8 sps:$4 sm:$0xff]  }
 0x349   :  { %3517 = vmatprep.subr.bf16.mxu1 %v5995_v32 }
 0x34b   :  { %5055 = vmatpush3.bf16.msra.mxu0 %v7458_v38 }
 0x34c   :  { %3518 = vmatpush1.bf16.msra.mxu1 %v8449_v30  ;;  %5056 = vmatprep.subr.bf16.mxu0 %v7467_v27  ;;  %v7559_v30 = vld [vmem:[%s8429_s4 + $0x608] sm:$0xff]  }
 0x34d   :  { %3519 = vmatprep.subr.bf16.mxu1 %v5995_v32 }
 0x34f   :  { %5057 = vmatpush3.bf16.msra.mxu0 %v7474_v51 }
 0x350   :  { %3520 = vmatpush1.bf16.msra.mxu1 %v8450_v9  ;;  %5058 = vmatprep.subr.bf16.mxu0 %v7483_v33 }
 0x351   :  { %v4844_v49 = vpop.f32.mrb[36].mxu0  ;;  %5233 = vmatprep.subr.bf16.mxu1 %v7084_v57  ;;  %v5803_v57 = vld [vmem:[%s8428_s1 + $0x14] ss:$8 sps:$4 sm:$0xff]  }
 0x352   :  { %v4845_v32 = vpop.f32.mrb[37].mxu0 }
 0x353   :  { %3536 = vmatmul.mubr.bf16.vlgmr.msra.gmra.mrb[116].mxu1 %v5802_v28  ;;  %v7505_v52 = vadd.f32 %v4845_v32, %v4844_v49  ;;  %5059 = vmatpush3.bf16.msra.mxu0 %v7490_v5  ;;  %v4847_v37 = vpop.f32.mrb[38].mxu0 }
 0x354   :  { %v4848_v48 = vpop.f32.mrb[39].mxu0  ;;  %5060 = vmatprep.subr.bf16.mxu0 %v7499_v35  ;;  %4775 = vmatprep.mubr.msk.bf16.mxu1 %vm1436_vm4, %v5803_v57  ;;  %v5812_v57 = vld [vmem:[%s8428_s1 + $0x50] ss:$8 sps:$4 sm:$0xff]  }
 0x355   :  { %v7523_v20 = vadd.f32 %v4848_v48, %v4847_v37  ;;  %5234 = vmatpush3.bf16.msra.mxu1 %v7096_v46  ;;  %v7543_v46 = vld [vmem:[%s8429_s4 + $0x600] sm:$0xff]   ;;  %v7636_v48 = vld [vmem:[%s8429_s4 + $0x638] sm:$0xff]  }
 0x356   :  { %5235 = vmatprep.subr.bf16.mxu1 %v7105_v61  ;;  %v8435_v61 = vmov 0.0   ;;  %8454 = vst [vmem:[#allocation6_spill] sm:$0xff] %v7636_v48 }
 0x357   :  { %5061 = vmatpush3.bf16.msra.mxu0 %v7511_v43 }
 0x358   :  { %5062 = vmatprep.subr.bf16.mxu0 %v7521_v63 }
 0x359   :  { %5236 = vmatpush3.bf16.msra.mxu1 %v7120_v6  ;;  %v5805_v6 = vld [vmem:[%s8428_s1 + $0x24] ss:$8 sps:$4 sm:$0xff]  }
 0x35a   :  { %5237 = vmatprep.subr.bf16.mxu1 %v7129_v59  ;;  %v8451_v59 = vpack.c.bf16 %v7208_v54, %v7194_v56  ;;  %v7611_v56 = vld [vmem:[%s8429_s4 + $0x628] sm:$0xff]  }
 0x35b   :  { %3544 = vmatmul.mubr.bf16.gmra.mrb[120].mxu1 %v5804_v24  ;;  %5063 = vmatpush3.bf16.msra.mxu0 %v7531_v26  ;;  %8452 = vst [vmem:[#allocation4_spill] sm:$0xff] %v7611_v56  ;;  %v5815_v24 = vld [vmem:[%s8429_s4] sm:$0xff]  }
 0x35c   :  { %5431 = vmatprep.subr.bf16.mxu0 %v8435_v61  ;;  %4776 = vmatprep.mubr.msk.bf16.mxu1 %vm1436_vm4, %v5805_v6  ;;  %v5816_v6 = vld [vmem:[%s8429_s4 + $0x48] sm:$0xff]  }
 0x35d   :  { %5238 = vmatpush3.bf16.msra.mxu1 %v7138_v19  ;;  %v7570_v19 = vld [vmem:[%s8429_s4 + $0x610] sm:$0xff]  }
 0x35e   :  { %3413 = vmatmul.mubr.bf16.vlgmr.msra.gmra.mrb[64].mxu0 %v8451_v59  ;;  %5239 = vmatprep.subr.bf16.mxu1 %v7147_v23  ;;  %v5806_v23 = vld [vmem:[%s8428_s1 + $0x20] ss:$8 sps:$4 sm:$0xff]  }
 0x35f   :  { %5432 = vmatpush3.bf16.msra.mxu0 %v7543_v46  ;;  %5447 = vmatprep.mubr.msk.bf16.mxu0 %vm5997_vm6, %v8435_v61  ;;  %v5817_v59 = vld [vmem:[%s8428_s1 + $0x60] ss:$8 sps:$4 sm:$0xff]  }
 0x360   :  { %5433 = vmatprep.subr.bf16.mxu0 %v8435_v61 }
 0x361   :  { %5240 = vmatpush3.bf16.msra.mxu1 %v7156_v18  ;;  %v5807_v18 = vld [vmem:[%s8428_s1 + $0x34] ss:$8 sps:$4 sm:$0xff]  }
 0x362   :  { %5241 = vmatprep.subr.bf16.mxu1 %v7165_v22  ;;  %v7586_v22 = vld [vmem:[%s8429_s4 + $0x618] sm:$0xff]  }
 0x363   :  { %5434 = vmatpush3.bf16.msra.mxu0 %v7559_v30  ;;  %3552 = vmatmul.mubr.bf16.gmra.mrb[124].mxu1 %v5806_v23  ;;  %v5821_v23 = vld [vmem:[%s8429_s4 + $0x10] sm:$0xff]  }
 0x364   :  { %5435 = vmatprep.subr.bf16.mxu0 %v8435_v61  ;;  %4777 = vmatprep.mubr.msk.bf16.mxu1 %vm1436_vm4, %v5807_v18  ;;  %v5822_v18 = vld [vmem:[%s8429_s4 + $0x58] sm:$0xff]  }
 0x365   :  { %5242 = vmatpush3.bf16.msra.mxu1 %v7174_v4  ;;  %v7595_v4 = vld [vmem:[%s8429_s4 + $0x620] sm:$0xff]  }
 0x366   :  { %5243 = vmatprep.subr.bf16.mxu1 %v7183_v55  ;;  %v5808_v55 = vld [vmem:[%s8428_s1 + $0x30] ss:$8 sps:$4 sm:$0xff]  }
 0x367   :  { %5436 = vmatpush3.bf16.msra.mxu0 %v7570_v19 }
 0x368   :  { %5437 = vmatprep.subr.bf16.mxu0 %v8435_v61 }
 0x369   :  { %5244 = vmatpush3.bf16.msra.mxu1 %v7192_v40  ;;  %v5809_v40 = vld [vmem:[%s8428_s1 + $0x44] ss:$8 sps:$4 sm:$0xff]  }
 0x36a   :  { %5245 = vmatprep.subr.bf16.mxu1 %v7203_v36 }
 0x36b   :  { %5438 = vmatpush3.bf16.msra.mxu0 %v7586_v22  ;;  %3560 = vmatmul.mubr.bf16.gmra.mrb[128].mxu1 %v5808_v55  ;;  %v5823_v55 = vld [vmem:[%s8428_s1 + $0x70] ss:$8 sps:$4 sm:$0xff]  }
 0x36c   :  { %5439 = vmatprep.subr.bf16.mxu0 %v8435_v61  ;;  %4778 = vmatprep.mubr.msk.bf16.mxu1 %vm1436_vm4, %v5809_v40  ;;  %v5824_v40 = vld [vmem:[%s8429_s4 + $0x18] sm:$0xff]  }
 0x36d   :  { %5246 = vmatpush3.bf16.msra.mxu1 %v7216_v62  ;;  %v7620_v62 = vld [vmem:[%s8429_s4 + $0x630] sm:$0xff]  }
 0x36e   :  { %5247 = vmatprep.subr.bf16.mxu1 %v7225_v34  ;;  %8453 = vst [vmem:[#allocation5_spill] sm:$0xff] %v7620_v62  ;;  %v5810_v34 = vld [vmem:[%s8428_s1 + $0x40] ss:$8 sps:$4 sm:$0xff]  }
 0x36f   :  { %5440 = vmatpush3.bf16.msra.mxu0 %v7595_v4 }
 0x370   :  { %5441 = vmatprep.subr.bf16.mxu0 %v8435_v61 }
 0x371   :  { %v4866_v36 = vpop.f32.mrb[40].mxu0  ;;  %5248 = vmatpush3.bf16.msra.mxu1 %v7234_v14  ;;  %v5811_v14 = vld [vmem:[%s8428_s1 + $0x54] ss:$8 sps:$4 sm:$0xff]  }
 0x372   :  { %v4867_v54 = vpop.f32.mrb[41].mxu0  ;;  %5277 = vmatprep.subr.bf16.mxu1 %v7245_v58 }
 0x373   :  { %v4868_v9 = vadd.f32 %v4867_v54, %v4866_v36  ;;  %v4869_v49 = vpop.f32.mrb[42].mxu0  ;;  %5442 = vmatpush3.bf16.msra.mxu0 %v7611_v56  ;;  %3568 = vmatmul.mubr.bf16.gmra.mrb[132].mxu1 %v5810_v34  ;;  %v5825_v36 = vld [vmem:[%s8428_s1 + $0x84] ss:$8 sps:$4 sm:$0xff]  }
 0x374   :  { %v4870_v32 = vpop.f32.mrb[43].mxu0  ;;  %5443 = vmatprep.subr.bf16.mxu0 %v8435_v61  ;;  %4779 = vmatprep.mubr.msk.bf16.mxu1 %vm1436_vm4, %v5811_v14  ;;  %v5826_v54 = vld [vmem:[%s8429_s4 + $0x60] sm:$0xff]  }
 0x375   :  { %v3046_v58 = vadd.f32 %v4868_v9, %v7505_v52  ;;  %v4871_v28 = vadd.f32 %v4870_v32, %v4869_v49  ;;  %v5813_v52 = vld [vmem:[%s8428_s1 + $0x64] ss:$8 sps:$4 sm:$0xff]  }
 0x376   :  { %v5827_v9 = vld [vmem:[%s8429_s4 + $0x20] sm:$0xff]   ;;  %v5828_v49 = vld [vmem:[%s8429_s4 + $0x68] sm:$0xff]  }
 0x377   :  { %v3049_v37 = vadd.f32 %v4871_v28, %v7523_v20  ;;  %5444 = vmatpush3.bf16.msra.mxu0 %v7620_v62  ;;  %v5814_v20 = vld [vmem:[%s8429_s4 + $0x40] sm:$0xff]  }
 0x378   :  { %5445 = vmatprep.subr.bf16.mxu0 %v8435_v61 }
 0x37b   :  { %5446 = vmatpush3.bf16.msra.mxu0 %v7636_v48  ;;  %3576 = vmatmul.mubr.bf16.gmra.mrb[136].mxu1 %v5812_v57  ;;  %v5829_v57 = vld [vmem:[%s8428_s1 + $0x80] ss:$8 sps:$4 sm:$0xff]  }
 0x37c   :  { %4780 = vmatprep.mubr.msk.bf16.mxu1 %vm1436_vm4, %v5813_v52  ;;  %5101 = vmatprep.subr.bf16.mxu0 %v5814_v20  ;;  %v5830_v52 = vld [vmem:[%s8429_s4 + $0x28] sm:$0xff]  }
 0x37e   :  { %5448 = vmatmul.mubr.bf16.vlgmr.msra.gmra.mrb[68].mxu0 %v1769_v41  ;;  %v5820_v41 = vld [vmem:[%s8429_s4 + $0x50] sm:$0xff]  }
 0x37f   :  { %5102 = vmatpush3.bf16.msra.mxu0 %v5815_v24  ;;  %v5831_v24 = vld [vmem:[%s8428_s1 + $0x94] ss:$8 sps:$4 sm:$0xff]  }
 0x380   :  { %5103 = vmatprep.subr.bf16.mxu0 %v5816_v6  ;;  %v5832_v6 = vld [vmem:[%s8429_s4 + $0x70] sm:$0xff]  }
 0x383   :  { %3584 = vmatmul.mubr.bf16.gmra.mrb[140].mxu1 %v5817_v59  ;;  %5104 = vmatpush3.bf16.msra.mxu0 %v5818_v3 }
 0x384   :  { %4781 = vmatprep.mubr.msk.bf16.mxu1 %vm1436_vm4, %v5819_v1  ;;  %5105 = vmatprep.subr.bf16.mxu0 %v5820_v41  ;;  %v5833_v41 = vld [vmem:[%s8429_s4 + $0x30] sm:$0xff]  }
 0x387   :  { %5106 = vmatpush3.bf16.msra.mxu0 %v5821_v23  ;;  %v5834_v23 = vld [vmem:[%s8429_s4 + $0x78] sm:$0xff]  }
 0x388   :  { %5107 = vmatprep.subr.bf16.mxu0 %v5822_v18  ;;  %v5835_v18 = vld [vmem:[%s8428_s1 + $0x90] ss:$8 sps:$4 sm:$0xff]  }
 0x38b   :  { %3592 = vmatmul.mubr.bf16.gmra.mrb[144].mxu1 %v5823_v55  ;;  %5108 = vmatpush3.bf16.msra.mxu0 %v5824_v40  ;;  %v5838_v55 = vld [vmem:[%s8429_s4 + $0xc0] sm:$0xff]  }
 0x38c   :  { %4782 = vmatprep.mubr.msk.bf16.mxu1 %vm1436_vm4, %v5825_v36  ;;  %5109 = vmatprep.subr.bf16.mxu0 %v5826_v54 }
 0x38f   :  { %5110 = vmatpush3.bf16.msra.mxu0 %v5827_v9 }
 0x390   :  { %5111 = vmatprep.subr.bf16.mxu0 %v5828_v49  ;;  %v5839_v49 = vld [vmem:[%s8428_s1 + $0xa0] ss:$8 sps:$4 sm:$0xff]  }
 0x391   :  { %v4888_v34 = vpop.f32.mrb[44].mxu0 }
 0x392   :  { %v4889_v32 = vpop.f32.mrb[45].mxu0 }
 0x393   :  { %v4890_v14 = vadd.f32 %v4889_v32, %v4888_v34  ;;  %v4891_v28 = vpop.f32.mrb[46].mxu0  ;;  %3600 = vmatmul.mubr.bf16.gmra.mrb[148].mxu1 %v5829_v57  ;;  %5112 = vmatpush3.bf16.msra.mxu0 %v5830_v52  ;;  %v5840_v32 = vld [vmem:[%s8428_s1 + $0xb4] ss:$8 sps:$4 sm:$0xff]   ;;  %v5842_v57 = vld [vmem:[%s8428_s1 + $0xc4] ss:$8 sps:$4 sm:$0xff]  }
 0x394   :  { %v4892_v20 = vpop.f32.mrb[47].mxu0  ;;  %4783 = vmatprep.mubr.msk.bf16.mxu1 %vm1436_vm4, %v5831_v24  ;;  %5113 = vmatprep.subr.bf16.mxu0 %v5832_v6 }
 0x395   :  { %v3087_v59 = vadd.f32 %v4890_v14, %v3046_v58  ;;  %v4893_v3 = vadd.f32 %v4892_v20, %v4891_v28  ;;  %v5836_v58 = vld [vmem:[%s8429_s4 + $0x38] sm:$0xff]  }
 0x396   :  { %v5841_v28 = vld [vmem:[%s8428_s1 + $0xb0] ss:$8 sps:$4 sm:$0xff]  }
 0x397   :  { %v3090_v1 = vadd.f32 %v4893_v3, %v3049_v37  ;;  %5114 = vmatpush3.bf16.msra.mxu0 %v5833_v41  ;;  %v5837_v37 = vld [vmem:[%s8428_s1 + $0xa4] ss:$8 sps:$4 sm:$0xff]   ;;  %v5843_v3 = vld [vmem:[%s8428_s1 + $0xc0] ss:$8 sps:$4 sm:$0xff]  }
 0x398   :  { %5115 = vmatprep.subr.bf16.mxu0 %v5834_v23  ;;  %v5844_v23 = vld [vmem:[%s8428_s1 + $0xd4] ss:$8 sps:$4 sm:$0xff]  }
 0x39b   :  { %3608 = vmatmul.mubr.bf16.gmra.mrb[152].mxu1 %v5835_v18  ;;  %5116 = vmatpush3.bf16.msra.mxu0 %v5836_v58 }
 0x39c   :  { %4784 = vmatprep.mubr.msk.bf16.mxu1 %vm1436_vm4, %v5837_v37  ;;  %5123 = vmatprep.subr.bf16.mxu0 %v5838_v55  ;;  %v5845_v55 = vld [vmem:[%s8428_s1 + $0xd0] ss:$8 sps:$4 sm:$0xff]  }
 0x3a1   :  { %v4954_v40 = vpop.f32.mrb[100].mxu1 }
 0x3a2   :  { %v4955_v36 = vpop.f32.mrb[101].mxu1 }
 0x3a3   :  { %v4956_v54 = vadd.f32 %v4955_v36, %v4954_v40  ;;  %v4957_v9 = vpop.f32.mrb[102].mxu1  ;;  %3616 = vmatmul.mubr.bf16.gmra.mrb[156].mxu1 %v5839_v49  ;;  %v5846_v40 = vld [vmem:[%s8428_s1 + $0xe4] ss:$8 sps:$4 sm:$0xff]   ;;  %v5847_v49 = vld [vmem:[%s8428_s1 + $0xe0] ss:$8 sps:$4 sm:$0xff]  }
 0x3a4   :  { %v4958_v34 = vpop.f32.mrb[103].mxu1  ;;  %4785 = vmatprep.mubr.msk.bf16.mxu1 %vm1436_vm4, %v5840_v32 }
 0x3a5   :  { %v4959_v14 = vadd.f32 %v4958_v34, %v4957_v9  ;;  %v5848_v34 = vld [vmem:[%s8428_s1 + $0xf4] ss:$8 sps:$4 sm:$0xff]  }
 0x3ab   :  { %3624 = vmatmul.mubr.bf16.gmra.mrb[160].mxu1 %v5841_v28 }
 0x3ac   :  { %4786 = vmatprep.mubr.msk.bf16.mxu1 %vm1436_vm4, %v5842_v57  ;;  %v5849_v57 = vld [vmem:[%s8428_s1 + $0xf0] ss:$8 sps:$4 sm:$0xff]  }
 0x3b1   :  { %v4910_v52 = vpop.f32.mrb[48].mxu0 }
 0x3b2   :  { %v4911_v20 = vpop.f32.mrb[49].mxu0 }
 0x3b3   :  { %v4912_v24 = vadd.f32 %v4911_v20, %v4910_v52  ;;  %v4913_v6 = vpop.f32.mrb[50].mxu0  ;;  %3632 = vmatmul.mubr.bf16.gmra.mrb[164].mxu1 %v5843_v3  ;;  %v5850_v52 = vld [vmem:[%s8428_s1 + $0x104] ss:$8 sps:$4 sm:$0xff]  }
 0x3b4   :  { %v4914_v41 = vpop.f32.mrb[51].mxu0  ;;  %4787 = vmatprep.mubr.msk.bf16.mxu1 %vm1436_vm4, %v5844_v23 }
 0x3b5   :  { %v3128_v18 = vadd.f32 %v4912_v24, %v3087_v59  ;;  %v4915_v58 = vadd.f32 %v4914_v41, %v4913_v6  ;;  %v5851_v41 = vld [vmem:[%s8428_s1 + $0x100] ss:$8 sps:$4 sm:$0xff]  }
 0x3b7   :  { %v3131_v37 = vadd.f32 %v4915_v58, %v3090_v1  ;;  %v5852_v58 = vld [vmem:[%s8428_s1 + $0x114] ss:$8 sps:$4 sm:$0xff]  }
 0x3bb   :  { %3640 = vmatmul.mubr.bf16.gmra.mrb[168].mxu1 %v5845_v55 }
 0x3bc   :  { %4788 = vmatprep.mubr.msk.bf16.mxu1 %vm1436_vm4, %v5846_v40 }
 0x3c2   :  { %v4998_v36 = vpop.f32.mrb[104].mxu1 }
 0x3c3   :  { %v4999_v9 = vpop.f32.mrb[105].mxu1  ;;  %3648 = vmatmul.mubr.bf16.gmra.mrb[172].mxu1 %v5847_v49 }
 0x3c4   :  { %v5000_v59 = vadd.f32 %v4999_v9, %v4998_v36  ;;  %v5001_v1 = vpop.f32.mrb[106].mxu1  ;;  %4789 = vmatprep.mubr.msk.bf16.mxu1 %vm1436_vm4, %v5848_v34  ;;  %v5854_v34 = vld [vmem:[%s8428_s1 + $0x124] ss:$8 sps:$4 sm:$0xff]  }
 0x3c5   :  { %v5002_v32 = vpop.f32.mrb[107].mxu1 }
 0x3c6   :  { %v5003_v28 = vadd.f32 %v5002_v32, %v5001_v1  ;;  %v5853_v1 = vld [vmem:[%s8428_s1 + $0x110] ss:$8 sps:$4 sm:$0xff]  }
 0x3cb   :  { %3656 = vmatmul.mubr.bf16.gmra.mrb[176].mxu1 %v5849_v57 }
 0x3cc   :  { %4790 = vmatprep.mubr.msk.bf16.mxu1 %vm1436_vm4, %v5850_v52 }
 0x3d1   :  { %v4932_v20 = vpop.f32.mrb[52].mxu0 }
 0x3d2   :  { %v4933_v24 = vpop.f32.mrb[53].mxu0 }
 0x3d3   :  { %v4934_v6 = vadd.f32 %v4933_v24, %v4932_v20  ;;  %v4935_v3 = vpop.f32.mrb[54].mxu0  ;;  %3664 = vmatmul.mubr.bf16.gmra.mrb[180].mxu1 %v5851_v41  ;;  %v5857_v24 = vld [vmem:[%s8428_s1 + $0x130] ss:$8 sps:$4 sm:$0xff]  }
 0x3d4   :  { %v4936_v23 = vpop.f32.mrb[55].mxu0  ;;  %4791 = vmatprep.mubr.msk.bf16.mxu1 %vm1436_vm4, %v5852_v58 }
 0x3d5   :  { %v3169_v55 = vadd.f32 %v4934_v6, %v3128_v18  ;;  %v4937_v40 = vadd.f32 %v4936_v23, %v4935_v3  ;;  %v5855_v18 = vld [vmem:[%s8428_s1 + $0x120] ss:$8 sps:$4 sm:$0xff]   ;;  %v5858_v6 = vld [vmem:[%s8428_s1 + $0x144] ss:$8 sps:$4 sm:$0xff]  }
 0x3d7   :  { %v3172_v36 = vadd.f32 %v4937_v40, %v3131_v37  ;;  %v3210_v9 = vadd.f32 %v4956_v54, %v3169_v55  ;;  %v5856_v37 = vld [vmem:[%s8428_s1 + $0x134] ss:$8 sps:$4 sm:$0xff]   ;;  %v5859_v55 = vld [vmem:[%s8428_s1 + $0x140] ss:$8 sps:$4 sm:$0xff]  }
 0x3d9   :  { %v3213_v49 = vadd.f32 %v4959_v14, %v3172_v36  ;;  %v5860_v36 = vld [vmem:[%s8428_s1 + $0x154] ss:$8 sps:$4 sm:$0xff]  }
 0x3db   :  { %3672 = vmatmul.mubr.bf16.gmra.mrb[184].mxu1 %v5853_v1 }
 0x3dc   :  { %4792 = vmatprep.mubr.msk.bf16.mxu1 %vm1436_vm4, %v5854_v34 }
 0x3e2   :  { %v5042_v32 = vpop.f32.mrb[108].mxu1 }
 0x3e3   :  { %v5043_v57 = vpop.f32.mrb[109].mxu1  ;;  %3680 = vmatmul.mubr.bf16.gmra.mrb[188].mxu1 %v5855_v18 }
 0x3e4   :  { %v5044_v54 = vadd.f32 %v5043_v57, %v5042_v32  ;;  %v5045_v14 = vpop.f32.mrb[110].mxu1  ;;  %4793 = vmatprep.mubr.msk.bf16.mxu1 %vm1436_vm4, %v5856_v37  ;;  %v5862_v37 = vld [vmem:[%s8428_s1 + $0x164] ss:$8 sps:$4 sm:$0xff]  }
 0x3e5   :  { %v5046_v52 = vpop.f32.mrb[111].mxu1 }
 0x3e6   :  { %v5047_v20 = vadd.f32 %v5046_v52, %v5045_v14  ;;  %v5861_v14 = vld [vmem:[%s8428_s1 + $0x150] ss:$8 sps:$4 sm:$0xff]  }
 0x3eb   :  { %3688 = vmatmul.mubr.bf16.gmra.mrb[192].mxu1 %v5857_v24 }
 0x3ec   :  { %4794 = vmatprep.mubr.msk.bf16.mxu1 %vm1436_vm4, %v5858_v6 }
 0x3f1   :  { %v4976_v3 = vpop.f32.mrb[56].mxu0 }
 0x3f2   :  { %v4977_v41 = vpop.f32.mrb[57].mxu0 }
 0x3f3   :  { %v4978_v23 = vadd.f32 %v4977_v41, %v4976_v3  ;;  %v4979_v58 = vpop.f32.mrb[58].mxu0  ;;  %3696 = vmatmul.mubr.bf16.gmra.mrb[196].mxu1 %v5859_v55  ;;  %v5865_v41 = vld [vmem:[%s8428_s1 + $0x170] ss:$8 sps:$4 sm:$0xff]  }
 0x3f4   :  { %v4980_v40 = vpop.f32.mrb[59].mxu0  ;;  %4795 = vmatprep.mubr.msk.bf16.mxu1 %vm1436_vm4, %v5860_v36 }
 0x3f5   :  { %v3251_v1 = vadd.f32 %v4978_v23, %v3210_v9  ;;  %v4981_v34 = vadd.f32 %v4980_v40, %v4979_v58  ;;  %v5863_v9 = vld [vmem:[%s8428_s1 + $0x160] ss:$8 sps:$4 sm:$0xff]   ;;  %v5866_v23 = vld [vmem:[%s8428_s1 + $0x184] ss:$8 sps:$4 sm:$0xff]  }
 0x3f7   :  { %v3254_v32 = vadd.f32 %v4981_v34, %v3213_v49  ;;  %v3292_v57 = vadd.f32 %v5000_v59, %v3251_v1  ;;  %v5864_v49 = vld [vmem:[%s8428_s1 + $0x174] ss:$8 sps:$4 sm:$0xff]   ;;  %v5867_v1 = vld [vmem:[%s8428_s1 + $0x180] ss:$8 sps:$4 sm:$0xff]  }
 0x3f9   :  { %v3295_v18 = vadd.f32 %v5003_v28, %v3254_v32 }
 0x3fb   :  { %3704 = vmatmul.mubr.bf16.gmra.mrb[200].mxu1 %v5861_v14 }
 0x3fc   :  { %4796 = vmatprep.mubr.msk.bf16.mxu1 %vm1436_vm4, %v5862_v37 }
 0x402   :  { %v5086_v52 = vpop.f32.mrb[112].mxu1 }
 0x403   :  { %v5087_v24 = vpop.f32.mrb[113].mxu1  ;;  %3712 = vmatmul.mubr.bf16.gmra.mrb[204].mxu1 %v5863_v9 }
 0x404   :  { %v5088_v59 = vadd.f32 %v5087_v24, %v5086_v52  ;;  %v5089_v28 = vpop.f32.mrb[114].mxu1  ;;  %4797 = vmatprep.mubr.msk.bf16.mxu1 %vm1436_vm4, %v5864_v49 }
 0x405   :  { %v5090_v6 = vpop.f32.mrb[115].mxu1 }
 0x406   :  { %v5091_v3 = vadd.f32 %v5090_v6, %v5089_v28 }
 0x40b   :  { %3720 = vmatmul.mubr.bf16.gmra.mrb[208].mxu1 %v5865_v41 }
 0x40c   :  { %4798 = vmatprep.mubr.msk.bf16.mxu1 %vm1436_vm4, %v5866_v23 }
 0x411   :  { %v5020_v58 = vpop.f32.mrb[60].mxu0 }
 0x412   :  { %v5021_v55 = vpop.f32.mrb[61].mxu0 }
 0x413   :  { %v5022_v40 = vadd.f32 %v5021_v55, %v5020_v58  ;;  %v5023_v36 = vpop.f32.mrb[62].mxu0  ;;  %3728 = vmatmul.mubr.bf16.gmra.mrb[212].mxu1 %v5867_v1 }
 0x414   :  { %v5024_v34 = vpop.f32.mrb[63].mxu0 }
 0x415   :  { %v3333_v32 = vadd.f32 %v5022_v40, %v3292_v57  ;;  %v5025_v14 = vadd.f32 %v5024_v34, %v5023_v36 }
 0x417   :  { %v3336_v37 = vadd.f32 %v5025_v14, %v3295_v18  ;;  %v3374_v52 = vadd.f32 %v5044_v54, %v3333_v32  ;;  %v5868_v54 = vld [vmem:[%s8429_s4 + $0x80] sm:$0xff]  }
 0x419   :  { %v3377_v24 = vadd.f32 %v5047_v20, %v3336_v37  ;;  %v5871_v37 = vld [vmem:[%s8429_s4 + $0xd0] sm:$0xff]  }
 0x426   :  { %v3537_v9 = vpop.f32.mrb[116].mxu1 }
 0x427   :  { %v3539_v28 = vpop.f32.mrb[117].mxu1 }
 0x428   :  { %v3540_v49 = vpop.f32.mrb[118].mxu1 }
 0x429   :  { %v3736_v6 = vpack.c.bf16 %v3540_v49, %v3537_v9  ;;  %v3542_v41 = vpop.f32.mrb[119].mxu1 }
 0x42a   :  { %v5875_v41 = vld [vmem:[%s8429_s4 + $0xe0] sm:$0xff]  }
 0x42e   :  { %v3545_v23 = vpop.f32.mrb[120].mxu1 }
 0x42f   :  { %v3547_v61 = vpop.f32.mrb[121].mxu1 }
 0x430   :  { %v3548_v58 = vpop.f32.mrb[122].mxu1  ;;  %v5869_v61 = vld [vmem:[%s8429_s4 + $0xc8] sm:$0xff]  }
 0x431   :  { %v3737_v55 = vpack.c.bf16 %v3548_v58, %v3545_v23  ;;  %v3550_v47 = vpop.f32.mrb[123].mxu1  ;;  %v5064_v48 = vpop.f32.mrb[64].mxu0  ;;  %v5876_v23 = vld [vmem:[%s8429_s4 + $0xa0] sm:$0xff]   ;;  %v5877_v58 = vld [vmem:[%s8429_s4 + $0xe8] sm:$0xff]  }
 0x432   :  { %v5065_v62 = vpop.f32.mrb[65].mxu0 }
 0x433   :  { %v5066_v56 = vadd.f32 %v5065_v62, %v5064_v48  ;;  %3793 = vmatprep.mubr.bf16.mxu0 %v3737_v55  ;;  %v5067_v1 = vpop.f32.mrb[66].mxu0 }
 0x434   :  { %3794 = vmatmul.mubr.bf16.vlgmr.msra.gmra.mrb[72].mxu0 %v3736_v6  ;;  %v5068_v57 = vpop.f32.mrb[67].mxu0 }
 0x435   :  { %v3415_v18 = vadd.f32 %v5066_v56, %v3374_v52  ;;  %5124 = vmatpush3.bf16.msra.mxu0 %v5868_v54  ;;  %v5069_v20 = vadd.f32 %v5068_v57, %v5067_v1  ;;  %v5870_v56 = vld [vmem:[%s8429_s4 + $0x88] sm:$0xff]   ;;  %v5872_v52 = vld [vmem:[%s8429_s4 + $0x90] sm:$0xff]  }
 0x436   :  { %5125 = vmatprep.subr.bf16.mxu0 %v5869_v61  ;;  %v3553_v47 = vpop.f32.mrb[124].mxu1  ;;  %v5879_v61 = vld [vmem:[%s8429_s4 + $0xf0] sm:$0xff]  }
 0x437   :  { %v3418_v40 = vadd.f32 %v5069_v20, %v3377_v24  ;;  %v3555_v36 = vpop.f32.mrb[125].mxu1  ;;  %v3456_v62 = vadd.f32 %v5088_v59, %v3415_v18  ;;  %v5873_v59 = vld [vmem:[%s8429_s4 + $0xd8] sm:$0xff]   ;;  %v5878_v18 = vld [vmem:[%s8429_s4 + $0xa8] sm:$0xff]  }
 0x438   :  { %v3556_v48 = vpop.f32.mrb[126].mxu1 }
 0x439   :  { %5126 = vmatpush3.bf16.msra.mxu0 %v5870_v56  ;;  %v3738_v34 = vpack.c.bf16 %v3556_v48, %v3553_v47  ;;  %v3558_v32 = vpop.f32.mrb[127].mxu1  ;;  %v3459_v14 = vadd.f32 %v5091_v3, %v3418_v40  ;;  %v5874_v3 = vld [vmem:[%s8429_s4 + $0x98] sm:$0xff]   ;;  %v5880_v47 = vld [vmem:[%s8429_s4 + $0xb0] sm:$0xff]  }
 0x43a   :  { %5127 = vmatprep.subr.bf16.mxu0 %v5871_v37  ;;  %v5881_v40 = vld [vmem:[%s8429_s4 + $0xf8] sm:$0xff]  }
 0x43b   :  { %v5882_v32 = vld [vmem:[%s8429_s4 + $0xb8] sm:$0xff]  }
 0x43d   :  { %5128 = vmatpush3.bf16.msra.mxu0 %v5872_v52  ;;  %v7884_v52 = vld [vmem:[%s8430_s5] ss:$0 sm:$0xff] }
 0x43e   :  { %5129 = vmatprep.subr.bf16.mxu0 %v5873_v59  ;;  %v3561_v24 = vpop.f32.mrb[128].mxu1 }
 0x43f   :  { %v3563_v9 = vpop.f32.mrb[129].mxu1 }
 0x440   :  { %v3564_v28 = vpop.f32.mrb[130].mxu1 }
 0x441   :  { %5130 = vmatpush3.bf16.msra.mxu0 %v5874_v3  ;;  %v3739_v49 = vpack.c.bf16 %v3564_v28, %v3561_v24  ;;  %v3566_v6 = vpop.f32.mrb[131].mxu1  ;;  %v5883_v3 = vld [vmem:[%s8429_s4 + $0x140] sm:$0xff]  }
 0x442   :  { %5131 = vmatprep.subr.bf16.mxu0 %v5875_v41 }
 0x443   :  { %3834 = vmatprep.mubr.bf16.mxu0 %v3739_v49 }
 0x445   :  { %5132 = vmatpush3.bf16.msra.mxu0 %v5876_v23 }
 0x446   :  { %5133 = vmatprep.subr.bf16.mxu0 %v5877_v58  ;;  %v7860_v55 = vpop.f32.mrb[132].mxu1  ;;  %v5884_v58 = vld [vmem:[%s8429_s4 + $0x100] sm:$0xff]  }
 0x447   :  { %v3571_v1 = vpop.f32.mrb[133].mxu1 }
 0x448   :  { %v7862_v57 = vpop.f32.mrb[134].mxu1 }
 0x449   :  { %5134 = vmatpush3.bf16.msra.mxu0 %v5878_v18  ;;  %v3740_v54 = vpack.c.bf16 %v7862_v57, %v7860_v55  ;;  %v3574_v20 = vpop.f32.mrb[135].mxu1  ;;  %v5885_v18 = vld [vmem:[%s8429_s4 + $0x148] sm:$0xff]  }
 0x44a   :  { %5135 = vmatprep.subr.bf16.mxu0 %v5879_v61  ;;  %v5902_v55 = vld [vmem:[%s8429_s4 + $0x188] sm:$0xff]  }
 0x44d   :  { %5136 = vmatpush3.bf16.msra.mxu0 %v5880_v47 }
 0x44e   :  { %5137 = vmatprep.subr.bf16.mxu0 %v5881_v40  ;;  %v3577_v36 = vpop.f32.mrb[136].mxu1  ;;  %v5886_v40 = vld [vmem:[%s8429_s4 + $0x108] sm:$0xff]  }
 0x44f   :  { %v3579_v48 = vpop.f32.mrb[137].mxu1 }
 0x450   :  { %v3580_v56 = vpop.f32.mrb[138].mxu1 }
 0x451   :  { %5138 = vmatpush3.bf16.msra.mxu0 %v5882_v32  ;;  %v3496_v37 = vpop.f32.mrb[68].mxu0  ;;  %v3741_v59 = vpack.c.bf16 %v3580_v56, %v3577_v36  ;;  %v3582_v24 = vpop.f32.mrb[139].mxu1  ;;  %v5887_v32 = vld [vmem:[%s8429_s4 + $0x150] sm:$0xff]  }
 0x452   :  { %v3497_v9 = vadd.f32 %v3496_v37, %v3456_v62  ;;  %v5449_v28 = vpop.f32.mrb[69].mxu0  ;;  %5145 = vmatprep.subr.bf16.mxu0 %v5883_v3  ;;  %v5889_v3 = vld [vmem:[%s8429_s4 + $0x158] sm:$0xff]  }
 0x453   :  { %v3499_v49 = vpop.f32.mrb[70].mxu0  ;;  %v5888_v28 = vld [vmem:[%s8429_s4 + $0x110] sm:$0xff]  }
 0x454   :  { %v4299_v6 = vadd.f32 %v7884_v52, %v3497_v9  ;;  %3835 = vmatmul.mubr.bf16.vlgmr.msra.gmra.mrb[76].mxu0 %v3738_v34  ;;  %v3500_v41 = vadd.f32 %v3499_v49, %v3459_v14  ;;  %v5450_v23 = vpop.f32.mrb[71].mxu0 }
 0x455   :  { %5146 = vmatpush3.bf16.msra.mxu0 %v5884_v58  ;;  %3875 = vmatprep.mubr.bf16.mxu0 %v3741_v59  ;;  %v5890_v23 = vld [vmem:[%s8429_s4 + $0x118] sm:$0xff]  }
 0x456   :  { %vm4303_vm4 = vcmp.ge.f32.partialorder %v4299_v6, 0.0  ;;  %v4307_v62 = vmul.f32 0.01, %v4299_v6  ;;  %v4300_v1 = vadd.f32 %v7884_v52, %v3500_v41  ;;  %5147 = vmatprep.subr.bf16.mxu0 %v5885_v18  ;;  %v7897_v20 = vpop.f32.mrb[140].mxu1  ;;  %v5892_v18 = vld [vmem:[%s8429_s4 + $0x120] sm:$0xff]  }
 0x457   :  { %v3587_v34 = vpop.f32.mrb[141].mxu1 }
 0x458   :  { %v7899_v14 = vsel %vm4303_vm4, %v4299_v6, %v4307_v62  ;;  %vm4304_vm7 = vcmp.ge.f32.partialorder %v4300_v1, 0.0  ;;  %v4308_v61 = vmul.f32 0.01, %v4300_v1  ;;  %v7901_v47 = vpop.f32.mrb[142].mxu1  ;;  %v5893_v34 = vld [vmem:[%s8429_s4 + $0x168] sm:$0xff]  }
 0x459   :  { %5148 = vmatpush3.bf16.msra.mxu0 %v5886_v40  ;;  %v3742_v36 = vpack.c.bf16 %v7901_v47, %v7897_v20  ;;  %v3590_v48 = vpop.f32.mrb[143].mxu1  ;;  %v4326_v37 = vmul.f32 %v7899_v14, %v7899_v14 }
 0x45a   :  { %v7908_v56 = vsel %vm4304_vm7, %v4300_v1, %v4308_v61  ;;  %5149 = vmatprep.subr.bf16.mxu0 %v5887_v32  ;;  %v5891_v1 = vld [vmem:[%s8429_s4 + $0x160] sm:$0xff]   ;;  %v5894_v32 = vld [vmem:[%s8429_s4 + $0x128] sm:$0xff]  }
 0x45b   :  { %v7917_v59 = vadd.f32 %v7908_v56, %v7899_v14  ;;  %v4327_v24 = vmul.f32 %v7908_v56, %v7908_v56 }
 0x45d   :  { %v7921_v9 = vadd.f32 %v4327_v24, %v4326_v37  ;;  %5150 = vmatpush3.bf16.msra.mxu0 %v5888_v28  ;;  %v5895_v28 = vld [vmem:[%s8429_s4 + $0x170] sm:$0xff]  }
 0x45e   :  { %5151 = vmatprep.subr.bf16.mxu0 %v5889_v3  ;;  %v3593_v49 = vpop.f32.mrb[144].mxu1  ;;  %v5896_v3 = vld [vmem:[%s8429_s4 + $0x130] sm:$0xff]  }
 0x45f   :  { %v3595_v6 = vpop.f32.mrb[145].mxu1 }
 0x460   :  { %v3596_v41 = vpop.f32.mrb[146].mxu1 }
 0x461   :  { %5152 = vmatpush3.bf16.msra.mxu0 %v5890_v23  ;;  %v3743_v58 = vpack.c.bf16 %v3596_v41, %v3593_v49  ;;  %v3598_v62 = vpop.f32.mrb[147].mxu1  ;;  %v5897_v49 = vld [vmem:[%s8429_s4 + $0x178] sm:$0xff]  }
 0x462   :  { %5153 = vmatprep.subr.bf16.mxu0 %v5891_v1  ;;  %v5898_v62 = vld [vmem:[%s8429_s4 + $0x138] sm:$0xff]  }
 0x465   :  { %5154 = vmatpush3.bf16.msra.mxu0 %v5892_v18 }
 0x466   :  { %5155 = vmatprep.subr.bf16.mxu0 %v5893_v34  ;;  %v7941_v61 = vpop.f32.mrb[148].mxu1  ;;  %v5899_v34 = vld [vmem:[%s8429_s4 + $0x1c0] sm:$0xff]  }
 0x467   :  { %v3603_v40 = vpop.f32.mrb[149].mxu1 }
 0x468   :  { %v7943_v48 = vpop.f32.mrb[150].mxu1  ;;  %v5900_v40 = vld [vmem:[%s8429_s4 + $0x180] sm:$0xff]  }
 0x469   :  { %5156 = vmatpush3.bf16.msra.mxu0 %v5894_v32  ;;  %v3744_v37 = vpack.c.bf16 %v7943_v48, %v7941_v61  ;;  %v3606_v24 = vpop.f32.mrb[151].mxu1  ;;  %v5901_v32 = vld [vmem:[%s8429_s4 + $0x1c8] sm:$0xff]  }
 0x46a   :  { %5157 = vmatprep.subr.bf16.mxu0 %v5895_v28  ;;  %v5934_v48 = vld [vmem:[%s8429_s4 + $0x288] sm:$0xff]  }
 0x46d   :  { %5158 = vmatpush3.bf16.msra.mxu0 %v5896_v3 }
 0x46e   :  { %5159 = vmatprep.subr.bf16.mxu0 %v5897_v49  ;;  %v7959_v6 = vpop.f32.mrb[152].mxu1  ;;  %v5904_v49 = vld [vmem:[%s8429_s4 + $0x190] sm:$0xff]  }
 0x46f   :  { %v3611_v41 = vpop.f32.mrb[153].mxu1 }
 0x470   :  { %v7961_v23 = vpop.f32.mrb[154].mxu1 }
 0x471   :  { %5160 = vmatpush3.bf16.msra.mxu0 %v5898_v62  ;;  %v3745_v1 = vpack.c.bf16 %v7961_v23, %v7959_v6  ;;  %v3614_v18 = vpop.f32.mrb[155].mxu1  ;;  %v5905_v6 = vld [vmem:[%s8429_s4 + $0x1d8] sm:$0xff]  }
 0x472   :  { %5167 = vmatprep.subr.bf16.mxu0 %v5899_v34  ;;  %v5906_v18 = vld [vmem:[%s8429_s4 + $0x198] sm:$0xff]  }
 0x474   :  { %3876 = vmatmul.mubr.bf16.vlgmr.msra.gmra.mrb[80].mxu0 %v3740_v54 }
 0x475   :  { %5168 = vmatpush3.bf16.msra.mxu0 %v5900_v40  ;;  %3916 = vmatprep.mubr.bf16.mxu0 %v3743_v58  ;;  %v5903_v58 = vld [vmem:[%s8429_s4 + $0x1d0] sm:$0xff]  }
 0x476   :  { %5169 = vmatprep.subr.bf16.mxu0 %v5901_v32  ;;  %v7980_v24 = vpop.f32.mrb[156].mxu1  ;;  %v5907_v32 = vld [vmem:[%s8429_s4 + $0x1e0] sm:$0xff]  }
 0x477   :  { %v3619_v28 = vpop.f32.mrb[157].mxu1 }
 0x478   :  { %v7982_v3 = vpop.f32.mrb[158].mxu1  ;;  %v5908_v28 = vld [vmem:[%s8429_s4 + $0x1a0] sm:$0xff]  }
 0x479   :  { %5170 = vmatpush3.bf16.msra.mxu0 %v5902_v55  ;;  %v3746_v57 = vpack.c.bf16 %v7982_v3, %v7980_v24  ;;  %v3622_v54 = vpop.f32.mrb[159].mxu1  ;;  %v5909_v55 = vld [vmem:[%s8429_s4 + $0x1e8] sm:$0xff]  }
 0x47a   :  { %5171 = vmatprep.subr.bf16.mxu0 %v5903_v58 }
 0x47d   :  { %5172 = vmatpush3.bf16.msra.mxu0 %v5904_v49 }
 0x47e   :  { %5173 = vmatprep.subr.bf16.mxu0 %v5905_v6  ;;  %v7998_v41 = vpop.f32.mrb[160].mxu1  ;;  %v5910_v6 = vld [vmem:[%s8429_s4 + $0x1a8] sm:$0xff]  }
 0x47f   :  { %v3627_v23 = vpop.f32.mrb[161].mxu1 }
 0x480   :  { %v8000_v62 = vpop.f32.mrb[162].mxu1 }
 0x481   :  { %5174 = vmatpush3.bf16.msra.mxu0 %v5906_v18  ;;  %v3747_v34 = vpack.c.bf16 %v8000_v62, %v7998_v41  ;;  %v3630_v40 = vpop.f32.mrb[163].mxu1  ;;  %v5935_v62 = vld [vmem:[%s8429_s4 + $0x2d0] sm:$0xff]  }
 0x482   :  { %5175 = vmatprep.subr.bf16.mxu0 %v5907_v32  ;;  %v5911_v40 = vld [vmem:[%s8429_s4 + $0x1f0] sm:$0xff]  }
 0x483   :  { %v5912_v32 = vld [vmem:[%s8429_s4 + $0x1b0] sm:$0xff]  }
 0x485   :  { %5176 = vmatpush3.bf16.msra.mxu0 %v5908_v28  ;;  %v5913_v28 = vld [vmem:[%s8429_s4 + $0x1f8] sm:$0xff]  }
 0x486   :  { %5177 = vmatprep.subr.bf16.mxu0 %v5909_v55  ;;  %v3633_v54 = vpop.f32.mrb[164].mxu1 }
 0x487   :  { %v3635_v58 = vpop.f32.mrb[165].mxu1 }
 0x488   :  { %v3636_v49 = vpop.f32.mrb[166].mxu1 }
 0x489   :  { %5178 = vmatpush3.bf16.msra.mxu0 %v5910_v6  ;;  %v3748_v23 = vpack.c.bf16 %v3636_v49, %v3633_v54  ;;  %v3638_v18 = vpop.f32.mrb[167].mxu1  ;;  %v5914_v54 = vld [vmem:[%s8429_s4 + $0x1b8] sm:$0xff]  }
 0x48a   :  { %5179 = vmatprep.subr.bf16.mxu0 %v5911_v40  ;;  %v5915_v40 = vld [vmem:[%s8429_s4 + $0x240] sm:$0xff]  }
 0x48d   :  { %5180 = vmatpush3.bf16.msra.mxu0 %v5912_v32  ;;  %v5916_v32 = vld [vmem:[%s8429_s4 + $0x200] sm:$0xff]  }
 0x48e   :  { %5181 = vmatprep.subr.bf16.mxu0 %v5913_v28  ;;  %v3641_v55 = vpop.f32.mrb[168].mxu1  ;;  %v5917_v28 = vld [vmem:[%s8429_s4 + $0x248] sm:$0xff]  }
 0x48f   :  { %v3643_v58 = vpop.f32.mrb[169].mxu1 }
 0x490   :  { %v3644_v6 = vpop.f32.mrb[170].mxu1  ;;  %v5921_v58 = vld [vmem:[%s8429_s4 + $0x258] sm:$0xff]  }
 0x491   :  { %5182 = vmatpush3.bf16.msra.mxu0 %v5914_v54  ;;  %v3749_v49 = vpack.c.bf16 %v3644_v6, %v3641_v55  ;;  %v3646_v18 = vpop.f32.mrb[171].mxu1 }
 0x492   :  { %5189 = vmatprep.subr.bf16.mxu0 %v5915_v40  ;;  %v5925_v40 = vld [vmem:[%s8429_s4 + $0x268] sm:$0xff]  }
 0x493   :  { %4039 = vmatprep.mubr.bf16.mxu1 %v3749_v49 }
 0x494   :  { %3917 = vmatmul.mubr.bf16.vlgmr.msra.gmra.mrb[84].mxu0 %v3742_v36  ;;  %4040 = vmatmul.mubr.bf16.vlgmr.msra.gmra.mrb[216].mxu1 %v3748_v23  ;;  %v5918_v36 = vld [vmem:[%s8429_s4 + $0x208] sm:$0xff]  }
 0x495   :  { %5190 = vmatpush3.bf16.msra.mxu0 %v5916_v32  ;;  %3957 = vmatprep.mubr.bf16.mxu0 %v3745_v1 }
 0x496   :  { %5191 = vmatprep.subr.bf16.mxu0 %v5917_v28  ;;  %5278 = vmatpush3.bf16.msra.mxu1 %v7258_v50  ;;  %v8044_v55 = vpop.f32.mrb[172].mxu1  ;;  %v5919_v50 = vld [vmem:[%s8429_s4 + $0x250] sm:$0xff]  }
 0x497   :  { %5279 = vmatprep.subr.bf16.mxu1 %v7267_v15  ;;  %v3651_v20 = vpop.f32.mrb[173].mxu1  ;;  %v5920_v15 = vld [vmem:[%s8429_s4 + $0x210] sm:$0xff]  }
 0x498   :  { %v8047_v47 = vpop.f32.mrb[174].mxu1 }
 0x499   :  { %5192 = vmatpush3.bf16.msra.mxu0 %v5918_v36  ;;  %v3750_v1 = vpack.c.bf16 %v8047_v47, %v8044_v55  ;;  %v3654_v23 = vpop.f32.mrb[175].mxu1  ;;  %v5966_v55 = vld [vmem:[%s8429_s4 + $0x488] sm:$0xff]   ;;  %v5967_v47 = vld [vmem:[%s8429_s4 + $0x4d0] sm:$0xff]  }
 0x49a   :  { %5193 = vmatprep.subr.bf16.mxu0 %v5919_v50  ;;  %5280 = vmatpush3.bf16.msra.mxu1 %v7282_v2  ;;  %v5927_v23 = vld [vmem:[%s8429_s4 + $0x270] sm:$0xff]  }
 0x49b   :  { %5281 = vmatprep.subr.bf16.mxu1 %v7291_v10  ;;  %v5922_v10 = vld [vmem:[%s8429_s4 + $0x218] sm:$0xff]  }
 0x49d   :  { %5194 = vmatpush3.bf16.msra.mxu0 %v5920_v15 }
 0x49e   :  { %5195 = vmatprep.subr.bf16.mxu0 %v5921_v58  ;;  %5282 = vmatpush3.bf16.msra.mxu1 %v7300_v25  ;;  %v8066_v6 = vpop.f32.mrb[176].mxu1  ;;  %v5923_v25 = vld [vmem:[%s8429_s4 + $0x260] sm:$0xff]  }
 0x49f   :  { %5283 = vmatprep.subr.bf16.mxu1 %v7309_v29  ;;  %v3659_v54 = vpop.f32.mrb[177].mxu1  ;;  %v5924_v29 = vld [vmem:[%s8429_s4 + $0x220] sm:$0xff]  }
 0x4a0   :  { %v8069_v2 = vpop.f32.mrb[178].mxu1 }
 0x4a1   :  { %5196 = vmatpush3.bf16.msra.mxu0 %v5922_v10  ;;  %v3751_v49 = vpack.c.bf16 %v8069_v2, %v8066_v6  ;;  %v3662_v18 = vpop.f32.mrb[179].mxu1  ;;  %v5931_v10 = vld [vmem:[%s8429_s4 + $0x2c0] sm:$0xff]  }
 0x4a2   :  { %5197 = vmatprep.subr.bf16.mxu0 %v5923_v25  ;;  %5284 = vmatpush3.bf16.msra.mxu1 %v7318_v8  ;;  %v5926_v8 = vld [vmem:[%s8429_s4 + $0x228] sm:$0xff]  }
 0x4a3   :  { %5285 = vmatprep.subr.bf16.mxu1 %v7327_v17 }
 0x4a5   :  { %5198 = vmatpush3.bf16.msra.mxu0 %v5924_v29 }
 0x4a6   :  { %5199 = vmatprep.subr.bf16.mxu0 %v5925_v40  ;;  %5286 = vmatpush3.bf16.msra.mxu1 %v7333_v39  ;;  %v3665_v32 = vpop.f32.mrb[180].mxu1  ;;  %v5929_v39 = vld [vmem:[%s8429_s4 + $0x278] sm:$0xff]   ;;  %v5939_v40 = vld [vmem:[%s8429_s4 + $0x2e0] sm:$0xff]  }
 0x4a7   :  { %5287 = vmatprep.subr.bf16.mxu1 %v7339_v13  ;;  %v3667_v28 = vpop.f32.mrb[181].mxu1  ;;  %v5928_v13 = vld [vmem:[%s8429_s4 + $0x230] sm:$0xff]  }
 0x4a8   :  { %v3668_v20 = vpop.f32.mrb[182].mxu1 }
 0x4a9   :  { %5200 = vmatpush3.bf16.msra.mxu0 %v5926_v8  ;;  %v3752_v17 = vpack.c.bf16 %v3668_v20, %v3665_v32  ;;  %v3670_v36 = vpop.f32.mrb[183].mxu1 }
 0x4aa   :  { %5201 = vmatprep.subr.bf16.mxu0 %v5927_v23  ;;  %5288 = vmatpush3.bf16.msra.mxu1 %v7346_v16  ;;  %v5930_v16 = vld [vmem:[%s8429_s4 + $0x238] sm:$0xff]  }
 0x4ab   :  { %5289 = vmatprep.subr.bf16.mxu1 %v7355_v21 }
 0x4ad   :  { %5202 = vmatpush3.bf16.msra.mxu0 %v5928_v13 }
 0x4ae   :  { %5203 = vmatprep.subr.bf16.mxu0 %v5929_v39  ;;  %5290 = vmatpush3.bf16.msra.mxu1 %v7370_v0  ;;  %v3673_v50 = vpop.f32.mrb[184].mxu1  ;;  %v5932_v0 = vld [vmem:[%s8429_s4 + $0x280] sm:$0xff]  }
 0x4af   :  { %v3675_v15 = vpop.f32.mrb[185].mxu1  ;;  %5291 = vmatprep.subr.bf16.mxu1 %v7381_v44  ;;  %v5933_v44 = vld [vmem:[%s8429_s4 + $0x2c8] sm:$0xff]  }
 0x4b0   :  { %v3676_v58 = vpop.f32.mrb[186].mxu1 }
 0x4b1   :  { %5204 = vmatpush3.bf16.msra.mxu0 %v5930_v16  ;;  %v3753_v21 = vpack.c.bf16 %v3676_v58, %v3673_v50  ;;  %v3678_v54 = vpop.f32.mrb[187].mxu1  ;;  %v5947_v50 = vld [vmem:[%s8429_s4 + $0x3c0] sm:$0xff]   ;;  %v5953_v58 = vld [vmem:[%s8429_s4 + $0x3d8] sm:$0xff]  }
 0x4b2   :  { %5211 = vmatprep.subr.bf16.mxu0 %v5931_v10  ;;  %5292 = vmatpush3.bf16.msra.mxu1 %v7388_v42  ;;  %v5954_v54 = vld [vmem:[%s8429_s4 + $0x398] sm:$0xff]  }
 0x4b3   :  { %4121 = vmatprep.mubr.bf16.mxu1 %v3753_v21  ;;  %5321 = vmatprep.subr.bf16.mxu1 %v7397_v11 }
 0x4b4   :  { %3958 = vmatmul.mubr.bf16.vlgmr.msra.gmra.mrb[88].mxu0 %v3744_v37 }
 0x4b5   :  { %5212 = vmatpush3.bf16.msra.mxu0 %v5932_v0  ;;  %3998 = vmatprep.mubr.bf16.mxu0 %v3747_v34 }
 0x4b6   :  { %5213 = vmatprep.subr.bf16.mxu0 %v5933_v44  ;;  %4122 = vmatmul.mubr.bf16.vlgmr.msra.gmra.mrb[220].mxu1 %v3752_v17  ;;  %v8125_v42 = vpop.f32.mrb[188].mxu1  ;;  %v5943_v17 = vld [vmem:[%s8429_s4 + $0x2f0] sm:$0xff]   ;;  %v5955_v44 = vld [vmem:[%s8429_s4 + $0x3e0] sm:$0xff]  }
 0x4b7   :  { %5322 = vmatpush3.bf16.msra.mxu1 %v7404_v31  ;;  %v3683_v11 = vpop.f32.mrb[189].mxu1  ;;  %v5936_v31 = vld [vmem:[%s8429_s4 + $0x290] sm:$0xff]  }
 0x4b8   :  { %5323 = vmatprep.subr.bf16.mxu1 %v7413_v53  ;;  %v8129_v61 = vpop.f32.mrb[190].mxu1  ;;  %v5937_v53 = vld [vmem:[%s8429_s4 + $0x2d8] sm:$0xff]   ;;  %v5957_v11 = vld [vmem:[%s8429_s4 + $0x3e8] sm:$0xff]  }
 0x4b9   :  { %5214 = vmatpush3.bf16.msra.mxu0 %v5934_v48  ;;  %v3754_v37 = vpack.c.bf16 %v8129_v61, %v8125_v42  ;;  %v3686_v41 = vpop.f32.mrb[191].mxu1  ;;  %v5983_v42 = vld [vmem:[%s8429_s4 + $0x5d0] sm:$0xff]  }
 0x4ba   :  { %5215 = vmatprep.subr.bf16.mxu0 %v5935_v62  ;;  %v5984_v61 = vld [vmem:[%s8429_s4 + $0x590] sm:$0xff]  }
 0x4bb   :  { %5324 = vmatpush3.bf16.msra.mxu1 %v7426_v60 }
 0x4bc   :  { %5325 = vmatprep.subr.bf16.mxu1 %v7435_v12  ;;  %v5938_v12 = vld [vmem:[%s8429_s4 + $0x298] sm:$0xff]  }
 0x4bd   :  { %5216 = vmatpush3.bf16.msra.mxu0 %v5936_v31 }
 0x4be   :  { %5217 = vmatprep.subr.bf16.mxu0 %v5937_v53  ;;  %v8147_v34 = vpop.f32.mrb[192].mxu1 }
 0x4bf   :  { %5326 = vmatpush3.bf16.msra.mxu1 %v7442_v7  ;;  %v3691_v18 = vpop.f32.mrb[193].mxu1  ;;  %v5940_v7 = vld [vmem:[%s8429_s4 + $0x2a0] sm:$0xff]  }
 0x4c0   :  { %5327 = vmatprep.subr.bf16.mxu1 %v7451_v45  ;;  %v8151_v60 = vpop.f32.mrb[194].mxu1  ;;  %v5941_v45 = vld [vmem:[%s8429_s4 + $0x2e8] sm:$0xff]   ;;  %v5959_v18 = vld [vmem:[%s8429_s4 + $0x3f0] sm:$0xff]  }
 0x4c1   :  { %5218 = vmatpush3.bf16.msra.mxu0 %v5938_v12  ;;  %v3755_v25 = vpack.c.bf16 %v8151_v60, %v8147_v34  ;;  %v3694_v29 = vpop.f32.mrb[195].mxu1  ;;  %v8456_v12 = vld [vmem:[#allocation4_spill] sm:$0xff]  ;;  %v5969_v34 = vld [vmem:[%s8429_s4 + $0x4d8] sm:$0xff]  }
 0x4c2   :  { %5219 = vmatprep.subr.bf16.mxu0 %v5939_v40  ;;  %v5961_v29 = vld [vmem:[%s8429_s4 + $0x3f8] sm:$0xff]  }
 0x4c3   :  { %5328 = vmatpush3.bf16.msra.mxu1 %v7458_v38  ;;  %v5942_v38 = vld [vmem:[%s8429_s4 + $0x2a8] sm:$0xff]   ;;  %v8457_v40 = vld [vmem:[#allocation5_spill] sm:$0xff] }
 0x4c4   :  { %5329 = vmatprep.subr.bf16.mxu1 %v7467_v27  ;;  %v5970_v60 = vld [vmem:[%s8429_s4 + $0x498] sm:$0xff]  }
 0x4c5   :  { %5220 = vmatpush3.bf16.msra.mxu0 %v5940_v7  ;;  %v5962_v7 = vld [vmem:[%s8429_s4 + $0x3b8] sm:$0xff]  }
 0x4c6   :  { %5221 = vmatprep.subr.bf16.mxu0 %v5941_v45  ;;  %v3697_v32 = vpop.f32.mrb[196].mxu1  ;;  %v5963_v45 = vld [vmem:[%s8429_s4 + $0x4c0] sm:$0xff]  }
 0x4c7   :  { %5330 = vmatpush3.bf16.msra.mxu1 %v7474_v51  ;;  %v3699_v28 = vpop.f32.mrb[197].mxu1  ;;  %v5944_v51 = vld [vmem:[%s8429_s4 + $0x2b0] sm:$0xff]  }
 0x4c8   :  { %5331 = vmatprep.subr.bf16.mxu1 %v7483_v33  ;;  %v3700_v20 = vpop.f32.mrb[198].mxu1  ;;  %v5945_v33 = vld [vmem:[%s8429_s4 + $0x2f8] sm:$0xff]   ;;  %v5964_v28 = vld [vmem:[%s8429_s4 + $0x480] sm:$0xff]  }
 0x4c9   :  { %5222 = vmatpush3.bf16.msra.mxu0 %v5942_v38  ;;  %v3756_v27 = vpack.c.bf16 %v3700_v20, %v3697_v32  ;;  %v3702_v8 = vpop.f32.mrb[199].mxu1  ;;  %v8458_v32 = vld [vmem:[#allocation6_spill] sm:$0xff]  ;;  %v5965_v20 = vld [vmem:[%s8429_s4 + $0x4c8] sm:$0xff]  }
 0x4ca   :  { %5223 = vmatprep.subr.bf16.mxu0 %v5943_v17  ;;  %v5972_v38 = vld [vmem:[%s8429_s4 + $0x4a0] sm:$0xff]  }
 0x4cb   :  { %5332 = vmatpush3.bf16.msra.mxu1 %v7490_v5  ;;  %v5946_v5 = vld [vmem:[%s8429_s4 + $0x2b8] sm:$0xff]  }
 0x4cc   :  { %5333 = vmatprep.subr.bf16.mxu1 %v7499_v35 }
 0x4cd   :  { %5224 = vmatpush3.bf16.msra.mxu0 %v5944_v51 }
 0x4ce   :  { %5225 = vmatprep.subr.bf16.mxu0 %v5945_v33  ;;  %v3705_v36 = vpop.f32.mrb[200].mxu1  ;;  %v5974_v33 = vld [vmem:[%s8429_s4 + $0x4a8] sm:$0xff]  }
 0x4cf   :  { %5334 = vmatpush3.bf16.msra.mxu1 %v7511_v43  ;;  %v3707_v23 = vpop.f32.mrb[201].mxu1  ;;  %v8455_v43 = vmov 0.0  }
 0x4d0   :  { %v3708_v13 = vpop.f32.mrb[202].mxu1  ;;  %5335 = vmatprep.subr.bf16.mxu1 %v7521_v63  ;;  %v5948_v63 = vld [vmem:[%s8429_s4 + $0x380] sm:$0xff]  }
 0x4d1   :  { %5226 = vmatpush3.bf16.msra.mxu0 %v5946_v5  ;;  %v3757_v35 = vpack.c.bf16 %v3708_v13, %v3705_v36  ;;  %v3710_v39 = vpop.f32.mrb[203].mxu1  ;;  %v5975_v13 = vld [vmem:[%s8429_s4 + $0x4f0] sm:$0xff]  }
 0x4d2   :  { %5255 = vmatprep.subr.bf16.mxu0 %v5947_v50  ;;  %v5977_v39 = vld [vmem:[%s8429_s4 + $0x4f8] sm:$0xff]  }
 0x4d3   :  { %5336 = vmatpush3.bf16.msra.mxu1 %v7531_v26  ;;  %4203 = vmatprep.mubr.bf16.mxu1 %v3757_v35  ;;  %v5949_v26 = vld [vmem:[%s8429_s4 + $0x3c8] sm:$0xff]   ;;  %v5976_v35 = vld [vmem:[%s8429_s4 + $0x4b0] sm:$0xff]   ;;  %v5978_v50 = vld [vmem:[%s8429_s4 + $0x4b8] sm:$0xff]  }
 0x4d4   :  { %3999 = vmatmul.mubr.bf16.vlgmr.msra.gmra.mrb[92].mxu0 %v3746_v57  ;;  %5451 = vmatprep.subr.bf16.mxu1 %v8455_v43  ;;  %v5950_v57 = vld [vmem:[%s8429_s4 + $0x388] sm:$0xff]  }
 0x4d5   :  { %5256 = vmatpush3.bf16.msra.mxu0 %v5948_v63  ;;  %4080 = vmatprep.mubr.bf16.mxu0 %v3751_v49  ;;  %v5952_v49 = vld [vmem:[%s8429_s4 + $0x390] sm:$0xff]   ;;  %v5979_v63 = vld [vmem:[%s8429_s4 + $0x5c0] sm:$0xff]  }
 0x4d6   :  { %5257 = vmatprep.subr.bf16.mxu0 %v5949_v26  ;;  %4204 = vmatmul.mubr.bf16.vlgmr.msra.gmra.mrb[224].mxu1 %v3756_v27  ;;  %v8207_v15 = vpop.f32.mrb[204].mxu1  ;;  %v5973_v27 = vld [vmem:[%s8429_s4 + $0x4e8] sm:$0xff]   ;;  %v5980_v26 = vld [vmem:[%s8429_s4 + $0x580] sm:$0xff]  }
 0x4d7   :  { %5452 = vmatpush3.bf16.msra.mxu1 %v7543_v46  ;;  %v3715_v24 = vpop.f32.mrb[205].mxu1  ;;  %5467 = vmatprep.mubr.msk.bf16.mxu1 %vm5997_vm6, %v8455_v43  ;;  %v5951_v46 = vld [vmem:[%s8429_s4 + $0x3d0] sm:$0xff]  }
 0x4d8   :  { %5453 = vmatprep.subr.bf16.mxu1 %v8455_v43  ;;  %v8213_v3 = vpop.f32.mrb[206].mxu1  ;;  %v5981_v24 = vld [vmem:[%s8429_s4 + $0x5c8] sm:$0xff]  }
 0x4d9   :  { %5258 = vmatpush3.bf16.msra.mxu0 %v5950_v57  ;;  %v3758_v6 = vpack.c.bf16 %v8213_v3, %v8207_v15  ;;  %v3718_v2 = vpop.f32.mrb[207].mxu1  ;;  %v5982_v57 = vld [vmem:[%s8429_s4 + $0x588] sm:$0xff]  }
 0x4da   :  { %5259 = vmatprep.subr.bf16.mxu0 %v5951_v46  ;;  %v5986_v2 = vld [vmem:[%s8429_s4 + $0x598] sm:$0xff]   ;;  %v5987_v46 = vld [vmem:[%s8429_s4 + $0x5e0] sm:$0xff]  }
 0x4db   :  { %5454 = vmatpush3.bf16.msra.mxu1 %v7559_v30 }
 0x4dc   :  { %5455 = vmatprep.subr.bf16.mxu1 %v8455_v43 }
 0x4dd   :  { %5260 = vmatpush3.bf16.msra.mxu0 %v5952_v49  ;;  %v5988_v49 = vld [vmem:[%s8429_s4 + $0x5a0] sm:$0xff]  }
 0x4de   :  { %5261 = vmatprep.subr.bf16.mxu0 %v5953_v58  ;;  %v8231_v16 = vpop.f32.mrb[208].mxu1  ;;  %v5989_v58 = vld [vmem:[%s8429_s4 + $0x5e8] sm:$0xff]  }
 0x4df   :  { %5456 = vmatpush3.bf16.msra.mxu1 %v7570_v19  ;;  %v3723_v21 = vpop.f32.mrb[209].mxu1  ;;  %v5956_v19 = vld [vmem:[%s8429_s4 + $0x3a0] sm:$0xff]  }
 0x4e0   :  { %5457 = vmatprep.subr.bf16.mxu1 %v8455_v43  ;;  %v8235_v30 = vpop.f32.mrb[210].mxu1 }
 0x4e1   :  { %5262 = vmatpush3.bf16.msra.mxu0 %v5954_v54  ;;  %v3759_v10 = vpack.c.bf16 %v8235_v30, %v8231_v16  ;;  %v3726_v0 = vpop.f32.mrb[211].mxu1 }
 0x4e2   :  { %5263 = vmatprep.subr.bf16.mxu0 %v5955_v44  ;;  %v5991_v44 = vld [vmem:[%s8429_s4 + $0x5f0] sm:$0xff]  }
 0x4e3   :  { %5458 = vmatpush3.bf16.msra.mxu1 %v7586_v22  ;;  %v5958_v22 = vld [vmem:[%s8429_s4 + $0x3a8] sm:$0xff]  }
 0x4e4   :  { %5459 = vmatprep.subr.bf16.mxu1 %v8455_v43 }
 0x4e5   :  { %5264 = vmatpush3.bf16.msra.mxu0 %v5956_v19 }
 0x4e6   :  { %5265 = vmatprep.subr.bf16.mxu0 %v5957_v11  ;;  %v3729_v48 = vpop.f32.mrb[212].mxu1 }
 0x4e7   :  { %5460 = vmatpush3.bf16.msra.mxu1 %v7595_v4  ;;  %v3731_v41 = vpop.f32.mrb[213].mxu1  ;;  %v5960_v4 = vld [vmem:[%s8429_s4 + $0x3b0] sm:$0xff]  }
 0x4e8   :  { %5461 = vmatprep.subr.bf16.mxu1 %v8455_v43  ;;  %v3732_v62 = vpop.f32.mrb[214].mxu1  ;;  %v5992_v41 = vld [vmem:[%s8429_s4 + $0x5b0] sm:$0xff]  }
 0x4e9   :  { %5266 = vmatpush3.bf16.msra.mxu0 %v5958_v22  ;;  %v3760_v31 = vpack.c.bf16 %v3732_v62, %v3729_v48  ;;  %v3734_v53 = vpop.f32.mrb[215].mxu1  ;;  %v5993_v62 = vld [vmem:[%s8429_s4 + $0x5f8] sm:$0xff]  }
 0x4ea   :  { %5267 = vmatprep.subr.bf16.mxu0 %v5959_v18  ;;  %v5994_v22 = vld [vmem:[%s8429_s4 + $0x5b8] sm:$0xff]  }
 0x4eb   :  { %5462 = vmatpush3.bf16.msra.mxu1 %v8456_v12 }
 0x4ec   :  { %5463 = vmatprep.subr.bf16.mxu1 %v8455_v43 }
 0x4ed   :  { %5268 = vmatpush3.bf16.msra.mxu0 %v5960_v4 }
 0x4ee   :  { %5269 = vmatprep.subr.bf16.mxu0 %v5961_v29 }
 0x4ef   :  { %5464 = vmatpush3.bf16.msra.mxu1 %v8457_v40 }
 0x4f0   :  { %5465 = vmatprep.subr.bf16.mxu1 %v8455_v43 }
 0x4f1   :  { %5270 = vmatpush3.bf16.msra.mxu0 %v5962_v7 }
 0x4f2   :  { %5299 = vmatprep.subr.bf16.mxu0 %v5963_v45 }
 0x4f3   :  { %5466 = vmatpush3.bf16.msra.mxu1 %v8458_v32 }
 0x4f4   :  { %4081 = vmatmul.mubr.bf16.vlgmr.msra.gmra.mrb[96].mxu0 %v3750_v1  ;;  %v5968_v1 = vld [vmem:[%s8429_s4 + $0x490] sm:$0xff]  }
 0x4f5   :  { %5300 = vmatpush3.bf16.msra.mxu0 %v5964_v28  ;;  %4162 = vmatprep.mubr.bf16.mxu0 %v3755_v25  ;;  %v5971_v25 = vld [vmem:[%s8429_s4 + $0x4e0] sm:$0xff]  }
 0x4f6   :  { %5301 = vmatprep.subr.bf16.mxu0 %v5965_v20  ;;  %5468 = vmatmul.mubr.bf16.vlgmr.msra.gmra.mrb[228].mxu1 %v3760_v31 }
 0x4f9   :  { %5302 = vmatpush3.bf16.msra.mxu0 %v5966_v55 }
 0x4fa   :  { %5303 = vmatprep.subr.bf16.mxu0 %v5967_v47 }
 0x4fd   :  { %5304 = vmatpush3.bf16.msra.mxu0 %v5968_v1 }
 0x4fe   :  { %5305 = vmatprep.subr.bf16.mxu0 %v5969_v34 }
 0x501   :  { %5306 = vmatpush3.bf16.msra.mxu0 %v5970_v60 }
 0x502   :  { %5307 = vmatprep.subr.bf16.mxu0 %v5971_v25 }
 0x505   :  { %5308 = vmatpush3.bf16.msra.mxu0 %v5972_v38 }
 0x506   :  { %5309 = vmatprep.subr.bf16.mxu0 %v5973_v27 }
 0x507   :  { %v5117_v8 = vpop.f32.mrb[72].mxu0 }
 0x508   :  { %v5118_v17 = vpop.f32.mrb[73].mxu0 }
 0x509   :  { %v5119_v51 = vadd.f32 %v5118_v17, %v5117_v8  ;;  %5310 = vmatpush3.bf16.msra.mxu0 %v5974_v33  ;;  %v5120_v36 = vpop.f32.mrb[74].mxu0 }
 0x50a   :  { %v5121_v23 = vpop.f32.mrb[75].mxu0  ;;  %5311 = vmatprep.subr.bf16.mxu0 %v5975_v13 }
 0x50b   :  { %v5122_v5 = vadd.f32 %v5121_v23, %v5120_v36 }
 0x50d   :  { %5312 = vmatpush3.bf16.msra.mxu0 %v5976_v35 }
 0x50e   :  { %5313 = vmatprep.subr.bf16.mxu0 %v5977_v39 }
 0x511   :  { %5314 = vmatpush3.bf16.msra.mxu0 %v5978_v50 }
 0x512   :  { %5343 = vmatprep.subr.bf16.mxu0 %v5979_v63 }
 0x514   :  { %4163 = vmatmul.mubr.bf16.vlgmr.msra.gmra.mrb[100].mxu0 %v3754_v37  ;;  %v5985_v37 = vld [vmem:[%s8429_s4 + $0x5d8] sm:$0xff]  }
 0x515   :  { %5344 = vmatpush3.bf16.msra.mxu0 %v5980_v26  ;;  %4244 = vmatprep.mubr.bf16.mxu0 %v3759_v10  ;;  %v5990_v10 = vld [vmem:[%s8429_s4 + $0x5a8] sm:$0xff]  }
 0x516   :  { %5345 = vmatprep.subr.bf16.mxu0 %v5981_v24 }
 0x519   :  { %5346 = vmatpush3.bf16.msra.mxu0 %v5982_v57 }
 0x51a   :  { %5347 = vmatprep.subr.bf16.mxu0 %v5983_v42 }
 0x51d   :  { %5348 = vmatpush3.bf16.msra.mxu0 %v5984_v61 }
 0x51e   :  { %5349 = vmatprep.subr.bf16.mxu0 %v5985_v37 }
 0x521   :  { %5350 = vmatpush3.bf16.msra.mxu0 %v5986_v2 }
 0x522   :  { %5351 = vmatprep.subr.bf16.mxu0 %v5987_v46 }
 0x525   :  { %5352 = vmatpush3.bf16.msra.mxu0 %v5988_v49 }
 0x526   :  { %5353 = vmatprep.subr.bf16.mxu0 %v5989_v58 }
 0x527   :  { %v5139_v16 = vpop.f32.mrb[76].mxu0 }
 0x528   :  { %v5140_v21 = vpop.f32.mrb[77].mxu0 }
 0x529   :  { %v5141_v30 = vadd.f32 %v5140_v21, %v5139_v16  ;;  %v5142_v54 = vpop.f32.mrb[78].mxu0  ;;  %5354 = vmatpush3.bf16.msra.mxu0 %v5990_v10 }
 0x52a   :  { %v5143_v0 = vpop.f32.mrb[79].mxu0  ;;  %5355 = vmatprep.subr.bf16.mxu0 %v5991_v44  ;;  %v5998_v44 = vmov 0.0|0.0  }
 0x52b   :  { %v3837_v19 = vadd.f32 %v5141_v30, %v5119_v51  ;;  %v5144_v11 = vadd.f32 %v5143_v0, %v5142_v54 }
 0x52d   :  { %v3840_v48 = vadd.f32 %v5144_v11, %v5122_v5  ;;  %5356 = vmatpush3.bf16.msra.mxu0 %v5992_v41 }
 0x52e   :  { %5357 = vmatprep.subr.bf16.mxu0 %v5993_v62 }
 0x531   :  { %5358 = vmatpush3.bf16.msra.mxu0 %v5994_v22 }
 0x532   :  { %5482 = vmatprep.subr.bf16.mxu0 %v5998_v44 }
 0x534   :  { %4245 = vmatmul.mubr.bf16.vlgmr.msra.gmra.mrb[104].mxu0 %v3758_v6 }
 0x535   :  { %5479 = vmatprep.mubr.msk.f32.mxu0 %vm5997_vm6, %v8455_v43 }
 0x547   :  { %v5161_v31 = vpop.f32.mrb[80].mxu0 }
 0x548   :  { %v5162_v53 = vpop.f32.mrb[81].mxu0 }
 0x549   :  { %v5163_v18 = vadd.f32 %v5162_v53, %v5161_v31  ;;  %v5164_v12 = vpop.f32.mrb[82].mxu0 }
 0x54a   :  { %v5165_v4 = vpop.f32.mrb[83].mxu0 }
 0x54b   :  { %v3878_v29 = vadd.f32 %v5163_v18, %v3837_v19  ;;  %v5166_v40 = vadd.f32 %v5165_v4, %v5164_v12 }
 0x54d   :  { %v3881_v7 = vadd.f32 %v5166_v40, %v3840_v48 }
 0x567   :  { %v5183_v45 = vpop.f32.mrb[84].mxu0  ;;  %v5249_v32 = vpop.f32.mrb[216].mxu1 }
 0x568   :  { %v5184_v28 = vpop.f32.mrb[85].mxu0  ;;  %v5250_v20 = vpop.f32.mrb[217].mxu1 }
 0x569   :  { %v5185_v55 = vadd.f32 %v5184_v28, %v5183_v45  ;;  %v5186_v47 = vpop.f32.mrb[86].mxu0  ;;  %v5251_v1 = vadd.f32 %v5250_v20, %v5249_v32  ;;  %v5252_v15 = vpop.f32.mrb[218].mxu1 }
 0x56a   :  { %v5187_v3 = vpop.f32.mrb[87].mxu0  ;;  %v5253_v6 = vpop.f32.mrb[219].mxu1 }
 0x56b   :  { %v3919_v34 = vadd.f32 %v5185_v55, %v3878_v29  ;;  %v5188_v43 = vadd.f32 %v5187_v3, %v5186_v47  ;;  %v5254_v60 = vadd.f32 %v5253_v6, %v5252_v15 }
 0x56d   :  { %v3922_v25 = vadd.f32 %v5188_v43, %v3881_v7 }
 0x587   :  { %v5205_v38 = vpop.f32.mrb[88].mxu0 }
 0x588   :  { %v5206_v27 = vpop.f32.mrb[89].mxu0 }
 0x589   :  { %v5207_v8 = vadd.f32 %v5206_v27, %v5205_v38  ;;  %v5208_v17 = vpop.f32.mrb[90].mxu0  ;;  %v5293_v51 = vpop.f32.mrb[220].mxu1 }
 0x58a   :  { %v5209_v33 = vpop.f32.mrb[91].mxu0  ;;  %v5294_v36 = vpop.f32.mrb[221].mxu1 }
 0x58b   :  { %v3960_v23 = vadd.f32 %v5207_v8, %v3919_v34  ;;  %v5210_v13 = vadd.f32 %v5209_v33, %v5208_v17  ;;  %v5295_v5 = vadd.f32 %v5294_v36, %v5293_v51  ;;  %v5296_v35 = vpop.f32.mrb[222].mxu1 }
 0x58c   :  { %v5297_v39 = vpop.f32.mrb[223].mxu1 }
 0x58d   :  { %v3963_v50 = vadd.f32 %v5210_v13, %v3922_v25  ;;  %v5298_v63 = vadd.f32 %v5297_v39, %v5296_v35 }
 0x5a7   :  { %v5227_v26 = vpop.f32.mrb[92].mxu0 }
 0x5a8   :  { %v5228_v24 = vpop.f32.mrb[93].mxu0 }
 0x5a9   :  { %v5229_v57 = vadd.f32 %v5228_v24, %v5227_v26  ;;  %v5230_v42 = vpop.f32.mrb[94].mxu0  ;;  %v5337_v61 = vpop.f32.mrb[224].mxu1 }
 0x5aa   :  { %v5231_v37 = vpop.f32.mrb[95].mxu0  ;;  %v5338_v2 = vpop.f32.mrb[225].mxu1 }
 0x5ab   :  { %v4001_v46 = vadd.f32 %v5229_v57, %v3960_v23  ;;  %v5232_v49 = vadd.f32 %v5231_v37, %v5230_v42  ;;  %v5339_v58 = vadd.f32 %v5338_v2, %v5337_v61  ;;  %v5340_v16 = vpop.f32.mrb[226].mxu1 }
 0x5ac   :  { %v5341_v21 = vpop.f32.mrb[227].mxu1 }
 0x5ad   :  { %v4004_v30 = vadd.f32 %v5232_v49, %v3963_v50  ;;  %v4042_v54 = vadd.f32 %v5251_v1, %v4001_v46  ;;  %v5342_v10 = vadd.f32 %v5341_v21, %v5340_v16 }
 0x5af   :  { %v4045_v0 = vadd.f32 %v5254_v60, %v4004_v30 }
 0x5c7   :  { %v5271_v19 = vpop.f32.mrb[96].mxu0 }
 0x5c8   :  { %v5272_v11 = vpop.f32.mrb[97].mxu0 }
 0x5c9   :  { %v5273_v48 = vadd.f32 %v5272_v11, %v5271_v19  ;;  %v5274_v41 = vpop.f32.mrb[98].mxu0  ;;  %v4287_v62 = vpop.f32.mrb[228].mxu1 }
 0x5ca   :  { %v5275_v22 = vpop.f32.mrb[99].mxu0  ;;  %v5469_v31 = vpop.f32.mrb[229].mxu1 }
 0x5cb   :  { %v4083_v53 = vadd.f32 %v5273_v48, %v4042_v54  ;;  %v5276_v18 = vadd.f32 %v5275_v22, %v5274_v41  ;;  %v4290_v12 = vpop.f32.mrb[230].mxu1  ;;  %v4342_v48 = vld [vmem:[%s8430_s5 + $0x1] sm:$0x1]  ;;  %v4346_v22 = vld [vmem:[%s8430_s5 + $0x2] sm:$0x1] }
 0x5cc   :  { %v5470_v4 = vpop.f32.mrb[231].mxu1 }
 0x5cd   :  { %v4086_v29 = vadd.f32 %v5276_v18, %v4045_v0  ;;  %v4124_v40 = vadd.f32 %v5295_v5, %v4083_v53  ;;  %v8459_v53 = vld [vmem:[#allocation3_spill] sm:$0xff] }
 0x5cf   :  { %v4127_v7 = vadd.f32 %v5298_v63, %v4086_v29 }
 0x5e7   :  { %v5315_v45 = vpop.f32.mrb[100].mxu0 }
 0x5e8   :  { %v5316_v32 = vpop.f32.mrb[101].mxu0 }
 0x5e9   :  { %v5317_v28 = vadd.f32 %v5316_v32, %v5315_v45  ;;  %v5318_v20 = vpop.f32.mrb[102].mxu0  ;;  %v4365_v32 = vld [vmem:[%s8431_s6] sm:$0xff] }
 0x5ea   :  { %v5319_v55 = vpop.f32.mrb[103].mxu0 }
 0x5eb   :  { %v4165_v47 = vadd.f32 %v5317_v28, %v4124_v40  ;;  %v5320_v1 = vadd.f32 %v5319_v55, %v5318_v20  ;;  %v4366_v28 = vld [vmem:[%s8431_s6 + $0x8] sm:$0xff]  ;;  %v4367_v20 = vld [vmem:[%s8431_s6 + $0x10] sm:$0xff] }
 0x5ed   :  { %v4168_v15 = vadd.f32 %v5320_v1, %v4127_v7  ;;  %v4206_v3 = vadd.f32 %v5339_v58, %v4165_v47 }
 0x5ef   :  { %v4209_v6 = vadd.f32 %v5342_v10, %v4168_v15 }
 0x607   :  { %v5359_v34 = vpop.f32.mrb[104].mxu0 }
 0x608   :  { %v5360_v43 = vpop.f32.mrb[105].mxu0 }
 0x609   :  { %v5361_v60 = vadd.f32 %v5360_v43, %v5359_v34  ;;  %v5362_v25 = vpop.f32.mrb[106].mxu0 }
 0x60a   :  { %v5363_v38 = vpop.f32.mrb[107].mxu0 }
 0x60b   :  { %v4247_v27 = vadd.f32 %v5361_v60, %v4206_v3  ;;  %v5364_v8 = vadd.f32 %v5363_v38, %v5362_v25  ;;  %v4373_v25 = vld [vmem:[%s8432_s7] sm:$0x3]  ;;  %v14_v38 = vstv %s8433_s8 }
 0x60c   :  { %15 = vst [vmem:[#allocation2] sm:$0x1] %v14_v38 }
 0x60d   :  { %v4288_v17 = vadd.f32 %v4287_v62, %v4247_v27  ;;  %v4250_v51 = vadd.f32 %v5364_v8, %v4209_v6 }
 0x60f   :  { %v4301_v33 = vadd.f32 %v7884_v52, %v4288_v17  ;;  %v4291_v36 = vadd.f32 %v4290_v12, %v4250_v51 }
 0x611   :  { %vm4305_vm8 = vcmp.ge.f32.partialorder %v4301_v33, 0.0  ;;  %v4309_v23 = vmul.f32 0.01, %v4301_v33  ;;  %v4302_v13 = vadd.f32 %v7884_v52, %v4291_v36 }
 0x613   :  { %v4313_v5 = vsel %vm4305_vm8, %v4301_v33, %v4309_v23  ;;  %vm4306_vm9 = vcmp.ge.f32.partialorder %v4302_v13, 0.0  ;;  %v4310_v35 = vmul.f32 0.01, %v4302_v13  ;;  %v4801_v51 = vld [vmem:[#allocation2] ss:$0 sm:$0xff] }
 0x614   :  { %v4316_v39 = vadd.f32 %v7917_v59, %v4313_v5  ;;  %v4328_v50 = vmul.f32 %v4313_v5, %v4313_v5 }
 0x615   :  { %v4314_v63 = vsel %vm4306_vm9, %v4302_v13, %v4310_v35 }
 0x616   :  { %v4331_v26 = vadd.f32 %v7921_v9, %v4328_v50  ;;  %v4317_v24 = vadd.f32 %v4316_v39, %v4314_v63  ;;  %v4329_v57 = vmul.f32 %v4314_v63, %v4314_v63 }
 0x618   :  { %v4318_v42 = vrot.slane %v4317_v24, 4  ;;  %v4332_v61 = vadd.f32 %v4331_v26, %v4329_v57 }
 0x61a   :  { %v4319_v37 = vadd.f32 %v4318_v42, %v4317_v24  ;;  %v4333_v2 = vrot.slane %v4332_v61, 4 }
 0x61c   :  { %v4320_v46 = vrot.slane %v4319_v37, 2  ;;  %v4334_v49 = vadd.f32 %v4333_v2, %v4332_v61 }
 0x61e   :  { %v4321_v58 = vadd.f32 %v4320_v46, %v4319_v37  ;;  %v4335_v16 = vrot.slane %v4334_v49, 2 }
 0x620   :  { %v4322_v52 = vrot.slane %v4321_v58, 1  ;;  %v4336_v21 = vadd.f32 %v4335_v16, %v4334_v49 }
 0x622   :  { %v4323_v30 = vadd.f32 %v4322_v52, %v4321_v58  ;;  %v4337_v54 = vrot.slane %v4336_v21, 1 }
 0x624   :  { %v4325_v10 = vmul.f32 0.03125, %v4323_v30  ;;  %v4338_v59 = vadd.f32 %v4337_v54, %v4336_v21 }
 0x626   :  { %v4339_v0 = vmul.f32 0.03125, %v4338_v59  ;;  %v4340_v19 = vmul.f32 %v4325_v10, %v4325_v10 }
 0x628   :  { %v4341_v11 = vsub.f32 %v4339_v0, %v4340_v19 }
 0x62a   :  { %v4343_v9 = vadd.f32 1e-05, %v4341_v11 }
 0x62c   :  { %5795 = vrsqrt.f32 %v4343_v9 }
 0x636   :  { %v5796_v41 = vpop.eup %5795 }
 0x637   :  { %v4345_v62 = vmul.f32 %v5796_v41, %v4342_v48 }
 0x639   :  { %v4347_v31 = vmul.f32 %v4345_v62, %v4325_v10  ;;  %v4352_v18 = vrot.slane %v4345_v62, %v8459_v53 }
 0x63b   :  { %v4356_v12 = vmul.f32 %v4352_v18, %v4314_v63  ;;  %v4348_v4 = vsub.f32 %v4346_v22, %v4347_v31  ;;  %v4353_v29 = vmul.f32 %v4352_v18, %v7899_v14  ;;  %v4354_v40 = vmul.f32 %v4352_v18, %v7908_v56  ;;  %v4368_v14 = vld [vmem:[%s8431_s6 + $0x18] sm:$0xff] }
 0x63c   :  { %v4355_v7 = vmul.f32 %v4352_v18, %v4313_v5 }
 0x63d   :  { %v4360_v45 = vrot.slane %v4348_v4, %v8459_v53 }
 0x63f   :  { %v4361_v56 = vadd.f32 %v4360_v45, %v4353_v29  ;;  %v4362_v55 = vadd.f32 %v4360_v45, %v4354_v40  ;;  %v4363_v47 = vadd.f32 %v4360_v45, %v4355_v7  ;;  %v4364_v1 = vadd.f32 %v4360_v45, %v4356_v12 }
 0x641   :  { %v4369_v15 = vmul.f32 %v4365_v32, %v4361_v56  ;;  %v4370_v3 = vmul.f32 %v4366_v28, %v4362_v55  ;;  %v4371_v6 = vmul.f32 %v4367_v20, %v4363_v47  ;;  %v4372_v34 = vmul.f32 %v4368_v14, %v4364_v1 }
 0x643   :  { %v5483_v43 = vpack.c.bf16 %v4370_v3, %v4369_v15  ;;  %v5486_v60 = vpack.c.bf16 %v4372_v34, %v4371_v6 }
 0x645   :  { %5484 = vmatpush3.bf16.msra.mxu0 %v5483_v43 }
 0x646   :  { %5485 = vmatprep.subr.bf16.mxu0 %v5998_v44 }
 0x649   :  { %5487 = vmatpush3.bf16.msra.mxu0 %v5486_v60 }
 0x64c   :  { %5480 = vmatmul.mubr.msk.f32.vlgmr.msra.gmra.mrb[108].mxu0 %vm4374_vm10, %v4373_v25 }
 0x71f   :  { %v4444_v27 = vpop.f32.mrb[108].mxu0 }
 0x720   :  { %v5481_v8 = vpop.f32.mrb[109].mxu0  ;;  %v4449_v17 = vsel %vm4448_vm11, %v4444_v27, 0.0 }
 0x721   :  { %4450 = vadd.xlane.f32.xlu0 %v4449_v17 }
 0x7ae   :  { %v4451_v33 = vpop.xlane.xlu0 %4450 }
 0x7af   :  { %v4459_v44 = vadd.f32 %v4801_v51, %v4451_v33 }
 0x7b1   :  { %v4460_v36 = vsub.f32 0.0, %v4459_v44 }
 0x7b3   :  { %v4461_v23 = vmul.f32 1.442695, %v4460_v36 }
 0x7b5   :  { %5797 = vpow2.f32 %v4461_v23 }
 0x7bf   :  { %v5798_v13 = vpop.eup %5797 }
 0x7c0   :  { %v4463_v5 = vadd.f32 1.0, %v5798_v13 }
 0x7c2   :  { %5799 = vrcp.f32 %v4463_v5 }
 0x7cc   :  { %v5800_v35 = vpop.eup %5799 }
 0x7cd   :  { %4467 = vst.msk [vmem:[%s8434_s9] sm:$0x3] %vm4466_vm12, %v5800_v35 }

</bundles_post_ra>
